<compile_context>
chip_gen: v7x
topology: tpu7x:2x2x1
jax: 0.10.0
libtpu: 0.0.40
codegen_flags: <defaults>
</compile_context>

<pallas_src>
import jax
import jax.numpy as jnp
from jax import lax
from jax.experimental import pallas as pl
from jax.experimental.pallas import tpu as pltpu

# ---- model config (matches the PyTorch module's demo sizes) ----
BATCH = 16          # batchSize (demo size; padded inside the wrapper)
M = 8               # m (number of history behaviors)
D = 32              # mFeas (item feature dim == GRU hidden size)
F_OTHER = 32        # "other features" dim
TOTAL = D + D + F_OTHER      # totalFeaDim = 96 (AUGRU last hidden + target + other)
LAYERS = 2                   # layers: mlp1 96->48, mlp2 48->32, final 32->1
H1 = TOTAL // 2              # 48
H2 = TOTAL // 3              # 32

# ---- kernel layout config ----
G = 4               # batch groups packed on the lane axis (G*D = 128 lanes)
GD = G * D          # 128
MAX_TILE_ROWS = 256  # sublane rows per grid step cap (=> up to 1024 batch rows per step)


def dien_kernel(hist_ref, target_ref, other_ref,
                gwx_ref, gwh_ref, gb_ref,
                awx_ref, awh_ref, ab_ref,
                sel_ref, selt_ref,
                w1h_ref, w1t_ref, w1o_ref, b1_ref,
                w2_ref, b2_ref, wf_ref, bf_ref,
                out_ref,
                gx_ref, gru_out_ref, att_ref):
    bt = hist_ref.shape[1]                       # sublane rows in this tile (static)
    target = target_ref[...]                     # (bt, GD) lane-packed

    # ---------- fused, hoisted GRU input projection (off the serial chain) ----------
    hist2d = hist_ref[...].reshape(M * bt, GD)
    gx_ref[...] = (jnp.dot(hist2d, gwx_ref[...], preferred_element_type=jnp.float32)
                   + gb_ref[...]).reshape(M, bt, 3 * GD)

    wh_g = gwh_ref[...]                          # (GD, 3*GD), loaded once

    # ---------- GRU over history: one MXU push + 128-lane gate math per step ----------
    def gru_step(t, h):
        gh = jnp.dot(h, wh_g, preferred_element_type=jnp.float32)        # (bt, 3*GD)
        gx = gx_ref[t]
        r = jax.nn.sigmoid(gx[:, 0:GD] + gh[:, 0:GD])
        u = jax.nn.sigmoid(gx[:, GD:2 * GD] + gh[:, GD:2 * GD])
        n = jnp.tanh(gx[:, 2 * GD:3 * GD] + r * gh[:, 2 * GD:3 * GD])
        h_new = (1.0 - u) * h + u * n
        gru_out_ref[t] = h_new
        return h_new

    lax.fori_loop(0, M, gru_step, jnp.zeros((bt, GD), jnp.float32), unroll=True)

    # ---------- dot-product attention vs. the target item (softmax over time) ----------
    gru_out = gru_out_ref[...]                                            # (M, bt, GD)
    prod = (gru_out * target[None]).reshape(M * bt, GD)
    s = jnp.dot(prod, sel_ref[...], preferred_element_type=jnp.float32)   # per-group sums
    s = s.reshape(M, bt, G)
    s = s - jnp.max(s, axis=0, keepdims=True)
    e = jnp.exp(s)
    att = e / jnp.sum(e, axis=0, keepdims=True)                           # exact reciprocal
    # broadcast attention back to dense 128-lane tiles via a tiny (G, GD) matmul
    att_ref[...] = jnp.dot(att.reshape(M * bt, G), selt_ref[...],
                           preferred_element_type=jnp.float32).reshape(M, bt, GD)

    # ---------- fused, hoisted AUGRU input projection (reuses gx scratch) ----------
    gru2d = gru_out.reshape(M * bt, GD)
    gx_ref[...] = (jnp.dot(gru2d, awx_ref[...], preferred_element_type=jnp.float32)
                   + ab_ref[...]).reshape(M, bt, 3 * GD)

    wh_a = awh_ref[...]

    # ---------- AUGRU (attention-scaled update gate, DIEN-paper form) ----------
    def augru_step(t, h):
        gh = jnp.dot(h, wh_a, preferred_element_type=jnp.float32)
        gx = gx_ref[t]
        r = jax.nn.sigmoid(gx[:, 0:GD] + gh[:, 0:GD])
        u = jax.nn.sigmoid(gx[:, GD:2 * GD] + gh[:, GD:2 * GD])
        n = jnp.tanh(gx[:, 2 * GD:3 * GD] + r * gh[:, 2 * GD:3 * GD])
        u = att_ref[t] * u                       # low attention -> retain h_{t-1}
        return (1.0 - u) * h + u * n

    h_au = lax.fori_loop(0, M, augru_step, jnp.zeros((bt, GD), jnp.float32), unroll=True)

    # ---------- concat (as split block-diag matmuls) + MLP(ReLU) x2 + final + sigmoid ----------
    pre1 = (jnp.dot(h_au, w1h_ref[...], preferred_element_type=jnp.float32)
            + jnp.dot(target, w1t_ref[...], preferred_element_type=jnp.float32)
            + jnp.dot(other_ref[...], w1o_ref[...], preferred_element_type=jnp.float32)
            + b1_ref[...])
    f = jnp.maximum(pre1, 0.0)                                            # mlp1 + ReLU
    f = jnp.maximum(jnp.dot(f, w2_ref[...], preferred_element_type=jnp.float32)
                    + b2_ref[...], 0.0)                                   # mlp2 + ReLU
    logit = jnp.dot(f, wf_ref[...], preferred_element_type=jnp.float32) + bf_ref[...]
    out_ref[...] = jax.nn.sigmoid(logit)         # (bt, G): G lane-packed predictions per row


def _round_up(x, m):
    return ((x + m - 1) // m) * m


def _block_diag(w):
    """(in, out) -> (G*in, G*out) block-diagonal replication of w."""
    return jnp.kron(jnp.eye(G, dtype=w.dtype), w)


def dien_pallas(hist_mbd, target, other, params):
    (gwx, gwh, gb, awx, awh, ab, w1, b1, w2, b2, wf, bf) = params

    # ---- lane-packed / block-diagonal weight prep (done once, outside the kernel) ----
    def pack_gate_w(w):     # (D, 3D) -> (GD, 3*GD); output ordered gate-major, then group
        return jnp.concatenate(
            [_block_diag(w[:, g * D:(g + 1) * D]) for g in range(3)], axis=1)

    def pack_gate_b(b):     # (1, 3D) -> (1, 3*GD)
        return jnp.concatenate(
            [jnp.tile(b[:, g * D:(g + 1) * D], (1, G)) for g in range(3)], axis=1)

    sel = jnp.kron(jnp.eye(G, dtype=jnp.float32), jnp.ones((D, 1), jnp.float32))   # (GD, G)
    selt = sel.T                                                                    # (G, GD)

    weights = (pack_gate_w(gwx), pack_gate_w(gwh), pack_gate_b(gb),
               pack_gate_w(awx), pack_gate_w(awh), pack_gate_b(ab),
               sel, selt,
               _block_diag(w1[0:D]), _block_diag(w1[D:2 * D]), _block_diag(w1[2 * D:]),
               jnp.tile(b1, (1, G)),
               _block_diag(w2), jnp.tile(b2, (1, G)),
               _block_diag(wf), jnp.tile(bf, (1, G)))

    # ---- batch padding / lane packing (G consecutive batch rows share one sublane row) ----
    b_total = target.shape[0]
    rows_needed = -(-b_total // G)
    # up to MAX_TILE_ROWS sublane rows per grid step, but keep >=2 grid steps when possible
    bt_rows = max(8, min(MAX_TILE_ROWS, _round_up(-(-rows_needed // 2), 8)))
    rows_pad = _round_up(rows_needed, bt_rows)
    pad = rows_pad * G - b_total
    if pad:
        hist_mbd = jnp.pad(hist_mbd, ((0, 0), (0, pad), (0, 0)))
        target = jnp.pad(target, ((0, pad), (0, 0)))
        other = jnp.pad(other, ((0, pad), (0, 0)))
    hist_p = hist_mbd.reshape(M, rows_pad, GD)
    target_p = target.reshape(rows_pad, GD)
    other_p = other.reshape(rows_pad, G * F_OTHER)

    full_spec = lambda a: pl.BlockSpec(a.shape, lambda i: (0,) * a.ndim)
    in_specs = ([pl.BlockSpec((M, bt_rows, GD), lambda i: (0, i, 0)),
                 pl.BlockSpec((bt_rows, GD), lambda i: (i, 0)),
                 pl.BlockSpec((bt_rows, G * F_OTHER), lambda i: (i, 0))]
                + [full_spec(w) for w in weights])

    out = pl.pallas_call(
        dien_kernel,
        out_shape=jax.ShapeDtypeStruct((rows_pad, G), jnp.float32),
        grid=(rows_pad // bt_rows,),
        in_specs=in_specs,
        out_specs=pl.BlockSpec((bt_rows, G), lambda i: (i, 0)),
        scratch_shapes=[pltpu.VMEM((M, bt_rows, 3 * GD), jnp.float32),   # fused gate inputs
                        pltpu.VMEM((M, bt_rows, GD), jnp.float32),       # GRU outputs
                        pltpu.VMEM((M, bt_rows, GD), jnp.float32)],      # dense attention
        compiler_params=pltpu.CompilerParams(dimension_semantics=("parallel",)),
    )(hist_p, target_p, other_p, *weights)
    return out.reshape(rows_pad * G, 1)[:b_total]


def dien_reference(hist_mbd, target, other, params):
    (gwx, gwh, gb, awx, awh, ab, w1, b1, w2, b2, wf, bf) = params

    def gates(x, h, wx, wh, b):
        gx = x @ wx + b
        gh = h @ wh
        r = jax.nn.sigmoid(gx[:, :D] + gh[:, :D])
        u = jax.nn.sigmoid(gx[:, D:2 * D] + gh[:, D:2 * D])
        n = jnp.tanh(gx[:, 2 * D:] + r * gh[:, 2 * D:])
        return u, n

    b_total = target.shape[0]
    h = jnp.zeros((b_total, D), jnp.float32)
    outs = []
    for t in range(M):
        u, n = gates(hist_mbd[t], h, gwx, gwh, gb)
        h = (1.0 - u) * h + u * n
        outs.append(h)
    gru_out = jnp.stack(outs)                                 # (M, B, D)

    s = jnp.sum(gru_out * target[None], axis=-1, keepdims=True)
    s = s - jnp.max(s, axis=0, keepdims=True)
    e = jnp.exp(s)
    att = e / jnp.sum(e, axis=0, keepdims=True)

    h = jnp.zeros((b_total, D), jnp.float32)
    for t in range(M):
        u, n = gates(gru_out[t], h, awx, awh, ab)
        u = att[t] * u
        h = (1.0 - u) * h + u * n

    pre1 = h @ w1[:D] + target @ w1[D:2 * D] + other @ w1[2 * D:] + b1
    f = jnp.maximum(pre1, 0.0)
    f = jnp.maximum(f @ w2 + b2, 0.0)
    return jax.nn.sigmoid(f @ wf + bf)


if __name__ == "__main__":
    key = jax.random.PRNGKey(0)
    ks = jax.random.split(key, 16)

    # inputs: m history behaviors (time-major), target item, other features
    hist_mbd = jax.random.normal(ks[0], (M, BATCH, D), jnp.float32)
    target = jax.random.normal(ks[1], (BATCH, D), jnp.float32)
    other = jax.random.normal(ks[2], (BATCH, F_OTHER), jnp.float32)

    sc = 0.1
    params = (
        sc * jax.random.normal(ks[3], (D, 3 * D), jnp.float32),    # GRU  W_x  (r|u|n)
        sc * jax.random.normal(ks[4], (D, 3 * D), jnp.float32),    # GRU  W_h
        sc * jax.random.normal(ks[5], (1, 3 * D), jnp.float32),    # GRU  bias
        sc * jax.random.normal(ks[6], (D, 3 * D), jnp.float32),    # AUGRU W_x
        sc * jax.random.normal(ks[7], (D, 3 * D), jnp.float32),    # AUGRU W_h
        sc * jax.random.normal(ks[8], (1, 3 * D), jnp.float32),    # AUGRU bias
        sc * jax.random.normal(ks[9], (TOTAL, H1), jnp.float32),   # mlp1 W (96 -> 48)
        sc * jax.random.normal(ks[10], (1, H1), jnp.float32),      # mlp1 b
        sc * jax.random.normal(ks[11], (H1, H2), jnp.float32),     # mlp2 W (48 -> 32)
        sc * jax.random.normal(ks[12], (1, H2), jnp.float32),      # mlp2 b
        sc * jax.random.normal(ks[13], (H2, 1), jnp.float32),      # finalOut W (32 -> 1)
        sc * jax.random.normal(ks[14], (1, 1), jnp.float32),       # finalOut b
    )

    out = jax.block_until_ready(dien_pallas(hist_mbd, target, other, params))
    ref = jax.block_until_ready(dien_reference(hist_mbd, target, other, params))

    assert out.shape == (BATCH, 1)
    assert bool(jnp.all(jnp.isfinite(out)))
    assert bool(jnp.allclose(out, ref, atol=1e-3, rtol=1e-3)), (out, ref)

    print("KERNEL_OK")
</pallas_src>

<mosaic_0001>
module attributes {stable_mosaic.version = 11 : i64} {
  func.func @dien_kernel(%arg0: i32, %arg1: memref<8x8x128xf32, #tpu.memory_space<vmem>>, %arg2: memref<8x128xf32, #tpu.memory_space<vmem>>, %arg3: memref<8x128xf32, #tpu.memory_space<vmem>>, %arg4: memref<128x384xf32, #tpu.memory_space<vmem>>, %arg5: memref<128x384xf32, #tpu.memory_space<vmem>>, %arg6: memref<1x384xf32, #tpu.memory_space<vmem>>, %arg7: memref<128x384xf32, #tpu.memory_space<vmem>>, %arg8: memref<128x384xf32, #tpu.memory_space<vmem>>, %arg9: memref<1x384xf32, #tpu.memory_space<vmem>>, %arg10: memref<128x4xf32, #tpu.memory_space<vmem>>, %arg11: memref<4x128xf32, #tpu.memory_space<vmem>>, %arg12: memref<128x192xf32, #tpu.memory_space<vmem>>, %arg13: memref<128x192xf32, #tpu.memory_space<vmem>>, %arg14: memref<128x192xf32, #tpu.memory_space<vmem>>, %arg15: memref<1x192xf32, #tpu.memory_space<vmem>>, %arg16: memref<192x128xf32, #tpu.memory_space<vmem>>, %arg17: memref<1x128xf32, #tpu.memory_space<vmem>>, %arg18: memref<128x4xf32, #tpu.memory_space<vmem>>, %arg19: memref<1x4xf32, #tpu.memory_space<vmem>>, %arg20: memref<8x4xf32, #tpu.memory_space<vmem>>, %arg21: memref<8x8x384xf32, #tpu.memory_space<vmem>>, %arg22: memref<8x8x128xf32, #tpu.memory_space<vmem>>, %arg23: memref<8x8x128xf32, #tpu.memory_space<vmem>>) attributes {dimension_semantics = [#tpu.dimension_semantics<parallel>], iteration_bounds = array<i64: 1>, scalar_prefetch = 0 : i64, scratch_operands = 3 : i64, tpu.core_type = #tpu.core_type<tc>, window_params = [{transform_indices = @transform_0, window_bounds = array<i64: 8, 8, 128>}, {transform_indices = @transform_1, window_bounds = array<i64: 8, 128>}, {transform_indices = @transform_2, window_bounds = array<i64: 8, 128>}, {pipeline_mode = #tpu.pipeline_mode<synchronous>, transform_indices = @transform_3, window_bounds = array<i64: 128, 384>}, {pipeline_mode = #tpu.pipeline_mode<synchronous>, transform_indices = @transform_4, window_bounds = array<i64: 128, 384>}, {pipeline_mode = #tpu.pipeline_mode<synchronous>, transform_indices = @transform_5, window_bounds = array<i64: 1, 384>}, {pipeline_mode = #tpu.pipeline_mode<synchronous>, transform_indices = @transform_6, window_bounds = array<i64: 128, 384>}, {pipeline_mode = #tpu.pipeline_mode<synchronous>, transform_indices = @transform_7, window_bounds = array<i64: 128, 384>}, {pipeline_mode = #tpu.pipeline_mode<synchronous>, transform_indices = @transform_8, window_bounds = array<i64: 1, 384>}, {pipeline_mode = #tpu.pipeline_mode<synchronous>, transform_indices = @transform_9, window_bounds = array<i64: 128, 4>}, {pipeline_mode = #tpu.pipeline_mode<synchronous>, transform_indices = @transform_10, window_bounds = array<i64: 4, 128>}, {pipeline_mode = #tpu.pipeline_mode<synchronous>, transform_indices = @transform_11, window_bounds = array<i64: 128, 192>}, {pipeline_mode = #tpu.pipeline_mode<synchronous>, transform_indices = @transform_12, window_bounds = array<i64: 128, 192>}, {pipeline_mode = #tpu.pipeline_mode<synchronous>, transform_indices = @transform_13, window_bounds = array<i64: 128, 192>}, {pipeline_mode = #tpu.pipeline_mode<synchronous>, transform_indices = @transform_14, window_bounds = array<i64: 1, 192>}, {pipeline_mode = #tpu.pipeline_mode<synchronous>, transform_indices = @transform_15, window_bounds = array<i64: 192, 128>}, {pipeline_mode = #tpu.pipeline_mode<synchronous>, transform_indices = @transform_16, window_bounds = array<i64: 1, 128>}, {pipeline_mode = #tpu.pipeline_mode<synchronous>, transform_indices = @transform_17, window_bounds = array<i64: 128, 4>}, {pipeline_mode = #tpu.pipeline_mode<synchronous>, transform_indices = @transform_18, window_bounds = array<i64: 1, 4>}, {transform_indices = @transform_19, window_bounds = array<i64: 8, 4>}]} {
    %c0 = arith.constant 0 : index
    %c0_0 = arith.constant 0 : index
    %0 = vector.load %arg2[%c0, %c0_0] : memref<8x128xf32, #tpu.memory_space<vmem>>, vector<8x128xf32>
    %c0_1 = arith.constant 0 : index
    %c0_2 = arith.constant 0 : index
    %c0_3 = arith.constant 0 : index
    %1 = vector.load %arg1[%c0_1, %c0_2, %c0_3] : memref<8x8x128xf32, #tpu.memory_space<vmem>>, vector<8x8x128xf32>
    %2 = vector.shape_cast %1 : vector<8x8x128xf32> to vector<64x128xf32>
    %c0_4 = arith.constant 0 : index
    %c0_5 = arith.constant 0 : index
    %3 = vector.load %arg4[%c0_4, %c0_5] : memref<128x384xf32, #tpu.memory_space<vmem>>, vector<128x384xf32>
    %cst = arith.constant dense<0.000000e+00> : vector<64x384xf32>
    %4 = tpu.matmul %2, %3, %cst {dimension_numbers = #tpu.dot_dimension_numbers<[1], [0], [0], [1], [0, 0, 1, 1], [], []>} : vector<64x128xf32>, vector<128x384xf32>, vector<64x384xf32> -> vector<64x384xf32>
    %c0_6 = arith.constant 0 : index
    %c0_7 = arith.constant 0 : index
    %5 = vector.load %arg6[%c0_6, %c0_7] : memref<1x384xf32, #tpu.memory_space<vmem>>, vector<1x384xf32>
    %6 = vector.broadcast %5 : vector<1x384xf32> to vector<64x384xf32>
    %7 = arith.addf %4, %6 : vector<64x384xf32>
    %8 = vector.shape_cast %7 : vector<64x384xf32> to vector<8x8x384xf32>
    %c0_8 = arith.constant 0 : index
    %c0_9 = arith.constant 0 : index
    %c0_10 = arith.constant 0 : index
    %9 = vector.load %arg21[%c0_8, %c0_9, %c0_10] : memref<8x8x384xf32, #tpu.memory_space<vmem>>, vector<8x8x384xf32>
    tpu.vector_store %arg21[%c0_8, %c0_9, %c0_10], %8 {strides = array<i32>} : memref<8x8x384xf32, #tpu.memory_space<vmem>>, vector<8x8x384xf32>,
    %c0_11 = arith.constant 0 : index
    %c0_12 = arith.constant 0 : index
    %10 = vector.load %arg5[%c0_11, %c0_12] : memref<128x384xf32, #tpu.memory_space<vmem>>, vector<128x384xf32>
    %cst_13 = arith.constant 0.000000e+00 : f32
    %11 = vector.broadcast %cst_13 : f32 to vector<8x128xf32>
    %c0_i32 = arith.constant 0 : i32
    %cst_14 = arith.constant dense<0.000000e+00> : vector<8x384xf32>
    %12 = tpu.matmul %11, %10, %cst_14 {dimension_numbers = #tpu.dot_dimension_numbers<[1], [0], [0], [1], [0, 0, 1, 1], [], []>} : vector<8x128xf32>, vector<128x384xf32>, vector<8x384xf32> -> vector<8x384xf32>
    %13 = arith.index_cast %c0_i32 : i32 to index
    %c0_15 = arith.constant 0 : index
    %c0_16 = arith.constant 0 : index
    %14 = vector.load %arg21[%13, %c0_15, %c0_16] : memref<8x8x384xf32, #tpu.memory_space<vmem>>, vector<1x8x384xf32>
    %15 = vector.shape_cast %14 : vector<1x8x384xf32> to vector<8x384xf32>
    %16 = vector.extract_strided_slice %15 {offsets = [0, 0], sizes = [8, 128], strides = [1, 1]} : vector<8x384xf32> to vector<8x128xf32>
    %17 = vector.extract_strided_slice %12 {offsets = [0, 0], sizes = [8, 128], strides = [1, 1]} : vector<8x384xf32> to vector<8x128xf32>
    %18 = arith.addf %16, %17 : vector<8x128xf32>
    %19 = arith.negf %18 : vector<8x128xf32>
    %20 = math.exp %19 : vector<8x128xf32>
    %cst_17 = arith.constant 1.000000e+00 : f32
    %21 = vector.broadcast %cst_17 : f32 to vector<8x128xf32>
    %22 = arith.addf %21, %20 : vector<8x128xf32>
    %23 = arith.divf %21, %22 : vector<8x128xf32>
    %24 = vector.extract_strided_slice %15 {offsets = [0, 128], sizes = [8, 128], strides = [1, 1]} : vector<8x384xf32> to vector<8x128xf32>
    %25 = vector.extract_strided_slice %12 {offsets = [0, 128], sizes = [8, 128], strides = [1, 1]} : vector<8x384xf32> to vector<8x128xf32>
    %26 = arith.addf %24, %25 : vector<8x128xf32>
    %27 = arith.negf %26 : vector<8x128xf32>
    %28 = math.exp %27 : vector<8x128xf32>
    %cst_18 = arith.constant 1.000000e+00 : f32
    %29 = vector.broadcast %cst_18 : f32 to vector<8x128xf32>
    %30 = arith.addf %29, %28 : vector<8x128xf32>
    %31 = arith.divf %29, %30 : vector<8x128xf32>
    %32 = vector.extract_strided_slice %15 {offsets = [0, 256], sizes = [8, 128], strides = [1, 1]} : vector<8x384xf32> to vector<8x128xf32>
    %33 = vector.extract_strided_slice %12 {offsets = [0, 256], sizes = [8, 128], strides = [1, 1]} : vector<8x384xf32> to vector<8x128xf32>
    %34 = arith.mulf %23, %33 : vector<8x128xf32>
    %35 = arith.addf %32, %34 : vector<8x128xf32>
    %36 = math.tanh %35 : vector<8x128xf32>
    %cst_19 = arith.constant 1.000000e+00 : f32
    %37 = vector.broadcast %cst_19 : f32 to vector<8x128xf32>
    %38 = arith.subf %37, %31 : vector<8x128xf32>
    %39 = arith.mulf %38, %11 : vector<8x128xf32>
    %40 = arith.mulf %31, %36 : vector<8x128xf32>
    %41 = arith.addf %39, %40 : vector<8x128xf32>
    %42 = arith.index_cast %c0_i32 : i32 to index
    %c0_20 = arith.constant 0 : index
    %c0_21 = arith.constant 0 : index
    %43 = vector.load %arg22[%42, %c0_20, %c0_21] : memref<8x8x128xf32, #tpu.memory_space<vmem>>, vector<1x8x128xf32>
    %44 = vector.shape_cast %43 : vector<1x8x128xf32> to vector<8x128xf32>
    %45 = vector.shape_cast %41 : vector<8x128xf32> to vector<1x8x128xf32>
    tpu.vector_store %arg22[%42, %c0_20, %c0_21], %45 {strides = array<i32>} : memref<8x8x128xf32, #tpu.memory_space<vmem>>, vector<1x8x128xf32>,
    %c1_i32 = arith.constant 1 : i32
    %cst_22 = arith.constant dense<0.000000e+00> : vector<8x384xf32>
    %46 = tpu.matmul %41, %10, %cst_22 {dimension_numbers = #tpu.dot_dimension_numbers<[1], [0], [0], [1], [0, 0, 1, 1], [], []>} : vector<8x128xf32>, vector<128x384xf32>, vector<8x384xf32> -> vector<8x384xf32>
    %47 = arith.index_cast %c1_i32 : i32 to index
    %c0_23 = arith.constant 0 : index
    %c0_24 = arith.constant 0 : index
    %48 = vector.load %arg21[%47, %c0_23, %c0_24] : memref<8x8x384xf32, #tpu.memory_space<vmem>>, vector<1x8x384xf32>
    %49 = vector.shape_cast %48 : vector<1x8x384xf32> to vector<8x384xf32>
    %50 = vector.extract_strided_slice %49 {offsets = [0, 0], sizes = [8, 128], strides = [1, 1]} : vector<8x384xf32> to vector<8x128xf32>
    %51 = vector.extract_strided_slice %46 {offsets = [0, 0], sizes = [8, 128], strides = [1, 1]} : vector<8x384xf32> to vector<8x128xf32>
    %52 = arith.addf %50, %51 : vector<8x128xf32>
    %53 = arith.negf %52 : vector<8x128xf32>
    %54 = math.exp %53 : vector<8x128xf32>
    %cst_25 = arith.constant 1.000000e+00 : f32
    %55 = vector.broadcast %cst_25 : f32 to vector<8x128xf32>
    %56 = arith.addf %55, %54 : vector<8x128xf32>
    %57 = arith.divf %55, %56 : vector<8x128xf32>
    %58 = vector.extract_strided_slice %49 {offsets = [0, 128], sizes = [8, 128], strides = [1, 1]} : vector<8x384xf32> to vector<8x128xf32>
    %59 = vector.extract_strided_slice %46 {offsets = [0, 128], sizes = [8, 128], strides = [1, 1]} : vector<8x384xf32> to vector<8x128xf32>
    %60 = arith.addf %58, %59 : vector<8x128xf32>
    %61 = arith.negf %60 : vector<8x128xf32>
    %62 = math.exp %61 : vector<8x128xf32>
    %cst_26 = arith.constant 1.000000e+00 : f32
    %63 = vector.broadcast %cst_26 : f32 to vector<8x128xf32>
    %64 = arith.addf %63, %62 : vector<8x128xf32>
    %65 = arith.divf %63, %64 : vector<8x128xf32>
    %66 = vector.extract_strided_slice %49 {offsets = [0, 256], sizes = [8, 128], strides = [1, 1]} : vector<8x384xf32> to vector<8x128xf32>
    %67 = vector.extract_strided_slice %46 {offsets = [0, 256], sizes = [8, 128], strides = [1, 1]} : vector<8x384xf32> to vector<8x128xf32>
    %68 = arith.mulf %57, %67 : vector<8x128xf32>
    %69 = arith.addf %66, %68 : vector<8x128xf32>
    %70 = math.tanh %69 : vector<8x128xf32>
    %cst_27 = arith.constant 1.000000e+00 : f32
    %71 = vector.broadcast %cst_27 : f32 to vector<8x128xf32>
    %72 = arith.subf %71, %65 : vector<8x128xf32>
    %73 = arith.mulf %72, %41 : vector<8x128xf32>
    %74 = arith.mulf %65, %70 : vector<8x128xf32>
    %75 = arith.addf %73, %74 : vector<8x128xf32>
    %76 = arith.index_cast %c1_i32 : i32 to index
    %c0_28 = arith.constant 0 : index
    %c0_29 = arith.constant 0 : index
    %77 = vector.load %arg22[%76, %c0_28, %c0_29] : memref<8x8x128xf32, #tpu.memory_space<vmem>>, vector<1x8x128xf32>
    %78 = vector.shape_cast %77 : vector<1x8x128xf32> to vector<8x128xf32>
    %79 = vector.shape_cast %75 : vector<8x128xf32> to vector<1x8x128xf32>
    tpu.vector_store %arg22[%76, %c0_28, %c0_29], %79 {strides = array<i32>} : memref<8x8x128xf32, #tpu.memory_space<vmem>>, vector<1x8x128xf32>,
    %c2_i32 = arith.constant 2 : i32
    %cst_30 = arith.constant dense<0.000000e+00> : vector<8x384xf32>
    %80 = tpu.matmul %75, %10, %cst_30 {dimension_numbers = #tpu.dot_dimension_numbers<[1], [0], [0], [1], [0, 0, 1, 1], [], []>} : vector<8x128xf32>, vector<128x384xf32>, vector<8x384xf32> -> vector<8x384xf32>
    %81 = arith.index_cast %c2_i32 : i32 to index
    %c0_31 = arith.constant 0 : index
    %c0_32 = arith.constant 0 : index
    %82 = vector.load %arg21[%81, %c0_31, %c0_32] : memref<8x8x384xf32, #tpu.memory_space<vmem>>, vector<1x8x384xf32>
    %83 = vector.shape_cast %82 : vector<1x8x384xf32> to vector<8x384xf32>
    %84 = vector.extract_strided_slice %83 {offsets = [0, 0], sizes = [8, 128], strides = [1, 1]} : vector<8x384xf32> to vector<8x128xf32>
    %85 = vector.extract_strided_slice %80 {offsets = [0, 0], sizes = [8, 128], strides = [1, 1]} : vector<8x384xf32> to vector<8x128xf32>
    %86 = arith.addf %84, %85 : vector<8x128xf32>
    %87 = arith.negf %86 : vector<8x128xf32>
    %88 = math.exp %87 : vector<8x128xf32>
    %cst_33 = arith.constant 1.000000e+00 : f32
    %89 = vector.broadcast %cst_33 : f32 to vector<8x128xf32>
    %90 = arith.addf %89, %88 : vector<8x128xf32>
    %91 = arith.divf %89, %90 : vector<8x128xf32>
    %92 = vector.extract_strided_slice %83 {offsets = [0, 128], sizes = [8, 128], strides = [1, 1]} : vector<8x384xf32> to vector<8x128xf32>
    %93 = vector.extract_strided_slice %80 {offsets = [0, 128], sizes = [8, 128], strides = [1, 1]} : vector<8x384xf32> to vector<8x128xf32>
    %94 = arith.addf %92, %93 : vector<8x128xf32>
    %95 = arith.negf %94 : vector<8x128xf32>
    %96 = math.exp %95 : vector<8x128xf32>
    %cst_34 = arith.constant 1.000000e+00 : f32
    %97 = vector.broadcast %cst_34 : f32 to vector<8x128xf32>
    %98 = arith.addf %97, %96 : vector<8x128xf32>
    %99 = arith.divf %97, %98 : vector<8x128xf32>
    %100 = vector.extract_strided_slice %83 {offsets = [0, 256], sizes = [8, 128], strides = [1, 1]} : vector<8x384xf32> to vector<8x128xf32>
    %101 = vector.extract_strided_slice %80 {offsets = [0, 256], sizes = [8, 128], strides = [1, 1]} : vector<8x384xf32> to vector<8x128xf32>
    %102 = arith.mulf %91, %101 : vector<8x128xf32>
    %103 = arith.addf %100, %102 : vector<8x128xf32>
    %104 = math.tanh %103 : vector<8x128xf32>
    %cst_35 = arith.constant 1.000000e+00 : f32
    %105 = vector.broadcast %cst_35 : f32 to vector<8x128xf32>
    %106 = arith.subf %105, %99 : vector<8x128xf32>
    %107 = arith.mulf %106, %75 : vector<8x128xf32>
    %108 = arith.mulf %99, %104 : vector<8x128xf32>
    %109 = arith.addf %107, %108 : vector<8x128xf32>
    %110 = arith.index_cast %c2_i32 : i32 to index
    %c0_36 = arith.constant 0 : index
    %c0_37 = arith.constant 0 : index
    %111 = vector.load %arg22[%110, %c0_36, %c0_37] : memref<8x8x128xf32, #tpu.memory_space<vmem>>, vector<1x8x128xf32>
    %112 = vector.shape_cast %111 : vector<1x8x128xf32> to vector<8x128xf32>
    %113 = vector.shape_cast %109 : vector<8x128xf32> to vector<1x8x128xf32>
    tpu.vector_store %arg22[%110, %c0_36, %c0_37], %113 {strides = array<i32>} : memref<8x8x128xf32, #tpu.memory_space<vmem>>, vector<1x8x128xf32>,
    %c3_i32 = arith.constant 3 : i32
    %cst_38 = arith.constant dense<0.000000e+00> : vector<8x384xf32>
    %114 = tpu.matmul %109, %10, %cst_38 {dimension_numbers = #tpu.dot_dimension_numbers<[1], [0], [0], [1], [0, 0, 1, 1], [], []>} : vector<8x128xf32>, vector<128x384xf32>, vector<8x384xf32> -> vector<8x384xf32>
    %115 = arith.index_cast %c3_i32 : i32 to index
    %c0_39 = arith.constant 0 : index
    %c0_40 = arith.constant 0 : index
    %116 = vector.load %arg21[%115, %c0_39, %c0_40] : memref<8x8x384xf32, #tpu.memory_space<vmem>>, vector<1x8x384xf32>
    %117 = vector.shape_cast %116 : vector<1x8x384xf32> to vector<8x384xf32>
    %118 = vector.extract_strided_slice %117 {offsets = [0, 0], sizes = [8, 128], strides = [1, 1]} : vector<8x384xf32> to vector<8x128xf32>
    %119 = vector.extract_strided_slice %114 {offsets = [0, 0], sizes = [8, 128], strides = [1, 1]} : vector<8x384xf32> to vector<8x128xf32>
    %120 = arith.addf %118, %119 : vector<8x128xf32>
    %121 = arith.negf %120 : vector<8x128xf32>
    %122 = math.exp %121 : vector<8x128xf32>
    %cst_41 = arith.constant 1.000000e+00 : f32
    %123 = vector.broadcast %cst_41 : f32 to vector<8x128xf32>
    %124 = arith.addf %123, %122 : vector<8x128xf32>
    %125 = arith.divf %123, %124 : vector<8x128xf32>
    %126 = vector.extract_strided_slice %117 {offsets = [0, 128], sizes = [8, 128], strides = [1, 1]} : vector<8x384xf32> to vector<8x128xf32>
    %127 = vector.extract_strided_slice %114 {offsets = [0, 128], sizes = [8, 128], strides = [1, 1]} : vector<8x384xf32> to vector<8x128xf32>
    %128 = arith.addf %126, %127 : vector<8x128xf32>
    %129 = arith.negf %128 : vector<8x128xf32>
    %130 = math.exp %129 : vector<8x128xf32>
    %cst_42 = arith.constant 1.000000e+00 : f32
    %131 = vector.broadcast %cst_42 : f32 to vector<8x128xf32>
    %132 = arith.addf %131, %130 : vector<8x128xf32>
    %133 = arith.divf %131, %132 : vector<8x128xf32>
    %134 = vector.extract_strided_slice %117 {offsets = [0, 256], sizes = [8, 128], strides = [1, 1]} : vector<8x384xf32> to vector<8x128xf32>
    %135 = vector.extract_strided_slice %114 {offsets = [0, 256], sizes = [8, 128], strides = [1, 1]} : vector<8x384xf32> to vector<8x128xf32>
    %136 = arith.mulf %125, %135 : vector<8x128xf32>
    %137 = arith.addf %134, %136 : vector<8x128xf32>
    %138 = math.tanh %137 : vector<8x128xf32>
    %cst_43 = arith.constant 1.000000e+00 : f32
    %139 = vector.broadcast %cst_43 : f32 to vector<8x128xf32>
    %140 = arith.subf %139, %133 : vector<8x128xf32>
    %141 = arith.mulf %140, %109 : vector<8x128xf32>
    %142 = arith.mulf %133, %138 : vector<8x128xf32>
    %143 = arith.addf %141, %142 : vector<8x128xf32>
    %144 = arith.index_cast %c3_i32 : i32 to index
    %c0_44 = arith.constant 0 : index
    %c0_45 = arith.constant 0 : index
    %145 = vector.load %arg22[%144, %c0_44, %c0_45] : memref<8x8x128xf32, #tpu.memory_space<vmem>>, vector<1x8x128xf32>
    %146 = vector.shape_cast %145 : vector<1x8x128xf32> to vector<8x128xf32>
    %147 = vector.shape_cast %143 : vector<8x128xf32> to vector<1x8x128xf32>
    tpu.vector_store %arg22[%144, %c0_44, %c0_45], %147 {strides = array<i32>} : memref<8x8x128xf32, #tpu.memory_space<vmem>>, vector<1x8x128xf32>,
    %c4_i32 = arith.constant 4 : i32
    %cst_46 = arith.constant dense<0.000000e+00> : vector<8x384xf32>
    %148 = tpu.matmul %143, %10, %cst_46 {dimension_numbers = #tpu.dot_dimension_numbers<[1], [0], [0], [1], [0, 0, 1, 1], [], []>} : vector<8x128xf32>, vector<128x384xf32>, vector<8x384xf32> -> vector<8x384xf32>
    %149 = arith.index_cast %c4_i32 : i32 to index
    %c0_47 = arith.constant 0 : index
    %c0_48 = arith.constant 0 : index
    %150 = vector.load %arg21[%149, %c0_47, %c0_48] : memref<8x8x384xf32, #tpu.memory_space<vmem>>, vector<1x8x384xf32>
    %151 = vector.shape_cast %150 : vector<1x8x384xf32> to vector<8x384xf32>
    %152 = vector.extract_strided_slice %151 {offsets = [0, 0], sizes = [8, 128], strides = [1, 1]} : vector<8x384xf32> to vector<8x128xf32>
    %153 = vector.extract_strided_slice %148 {offsets = [0, 0], sizes = [8, 128], strides = [1, 1]} : vector<8x384xf32> to vector<8x128xf32>
    %154 = arith.addf %152, %153 : vector<8x128xf32>
    %155 = arith.negf %154 : vector<8x128xf32>
    %156 = math.exp %155 : vector<8x128xf32>
    %cst_49 = arith.constant 1.000000e+00 : f32
    %157 = vector.broadcast %cst_49 : f32 to vector<8x128xf32>
    %158 = arith.addf %157, %156 : vector<8x128xf32>
    %159 = arith.divf %157, %158 : vector<8x128xf32>
    %160 = vector.extract_strided_slice %151 {offsets = [0, 128], sizes = [8, 128], strides = [1, 1]} : vector<8x384xf32> to vector<8x128xf32>
    %161 = vector.extract_strided_slice %148 {offsets = [0, 128], sizes = [8, 128], strides = [1, 1]} : vector<8x384xf32> to vector<8x128xf32>
    %162 = arith.addf %160, %161 : vector<8x128xf32>
    %163 = arith.negf %162 : vector<8x128xf32>
    %164 = math.exp %163 : vector<8x128xf32>
    %cst_50 = arith.constant 1.000000e+00 : f32
    %165 = vector.broadcast %cst_50 : f32 to vector<8x128xf32>
    %166 = arith.addf %165, %164 : vector<8x128xf32>
    %167 = arith.divf %165, %166 : vector<8x128xf32>
    %168 = vector.extract_strided_slice %151 {offsets = [0, 256], sizes = [8, 128], strides = [1, 1]} : vector<8x384xf32> to vector<8x128xf32>
    %169 = vector.extract_strided_slice %148 {offsets = [0, 256], sizes = [8, 128], strides = [1, 1]} : vector<8x384xf32> to vector<8x128xf32>
    %170 = arith.mulf %159, %169 : vector<8x128xf32>
    %171 = arith.addf %168, %170 : vector<8x128xf32>
    %172 = math.tanh %171 : vector<8x128xf32>
    %cst_51 = arith.constant 1.000000e+00 : f32
    %173 = vector.broadcast %cst_51 : f32 to vector<8x128xf32>
    %174 = arith.subf %173, %167 : vector<8x128xf32>
    %175 = arith.mulf %174, %143 : vector<8x128xf32>
    %176 = arith.mulf %167, %172 : vector<8x128xf32>
    %177 = arith.addf %175, %176 : vector<8x128xf32>
    %178 = arith.index_cast %c4_i32 : i32 to index
    %c0_52 = arith.constant 0 : index
    %c0_53 = arith.constant 0 : index
    %179 = vector.load %arg22[%178, %c0_52, %c0_53] : memref<8x8x128xf32, #tpu.memory_space<vmem>>, vector<1x8x128xf32>
    %180 = vector.shape_cast %179 : vector<1x8x128xf32> to vector<8x128xf32>
    %181 = vector.shape_cast %177 : vector<8x128xf32> to vector<1x8x128xf32>
    tpu.vector_store %arg22[%178, %c0_52, %c0_53], %181 {strides = array<i32>} : memref<8x8x128xf32, #tpu.memory_space<vmem>>, vector<1x8x128xf32>,
    %c5_i32 = arith.constant 5 : i32
    %cst_54 = arith.constant dense<0.000000e+00> : vector<8x384xf32>
    %182 = tpu.matmul %177, %10, %cst_54 {dimension_numbers = #tpu.dot_dimension_numbers<[1], [0], [0], [1], [0, 0, 1, 1], [], []>} : vector<8x128xf32>, vector<128x384xf32>, vector<8x384xf32> -> vector<8x384xf32>
    %183 = arith.index_cast %c5_i32 : i32 to index
    %c0_55 = arith.constant 0 : index
    %c0_56 = arith.constant 0 : index
    %184 = vector.load %arg21[%183, %c0_55, %c0_56] : memref<8x8x384xf32, #tpu.memory_space<vmem>>, vector<1x8x384xf32>
    %185 = vector.shape_cast %184 : vector<1x8x384xf32> to vector<8x384xf32>
    %186 = vector.extract_strided_slice %185 {offsets = [0, 0], sizes = [8, 128], strides = [1, 1]} : vector<8x384xf32> to vector<8x128xf32>
    %187 = vector.extract_strided_slice %182 {offsets = [0, 0], sizes = [8, 128], strides = [1, 1]} : vector<8x384xf32> to vector<8x128xf32>
    %188 = arith.addf %186, %187 : vector<8x128xf32>
    %189 = arith.negf %188 : vector<8x128xf32>
    %190 = math.exp %189 : vector<8x128xf32>
    %cst_57 = arith.constant 1.000000e+00 : f32
    %191 = vector.broadcast %cst_57 : f32 to vector<8x128xf32>
    %192 = arith.addf %191, %190 : vector<8x128xf32>
    %193 = arith.divf %191, %192 : vector<8x128xf32>
    %194 = vector.extract_strided_slice %185 {offsets = [0, 128], sizes = [8, 128], strides = [1, 1]} : vector<8x384xf32> to vector<8x128xf32>
    %195 = vector.extract_strided_slice %182 {offsets = [0, 128], sizes = [8, 128], strides = [1, 1]} : vector<8x384xf32> to vector<8x128xf32>
    %196 = arith.addf %194, %195 : vector<8x128xf32>
    %197 = arith.negf %196 : vector<8x128xf32>
    %198 = math.exp %197 : vector<8x128xf32>
    %cst_58 = arith.constant 1.000000e+00 : f32
    %199 = vector.broadcast %cst_58 : f32 to vector<8x128xf32>
    %200 = arith.addf %199, %198 : vector<8x128xf32>
    %201 = arith.divf %199, %200 : vector<8x128xf32>
    %202 = vector.extract_strided_slice %185 {offsets = [0, 256], sizes = [8, 128], strides = [1, 1]} : vector<8x384xf32> to vector<8x128xf32>
    %203 = vector.extract_strided_slice %182 {offsets = [0, 256], sizes = [8, 128], strides = [1, 1]} : vector<8x384xf32> to vector<8x128xf32>
    %204 = arith.mulf %193, %203 : vector<8x128xf32>
    %205 = arith.addf %202, %204 : vector<8x128xf32>
    %206 = math.tanh %205 : vector<8x128xf32>
    %cst_59 = arith.constant 1.000000e+00 : f32
    %207 = vector.broadcast %cst_59 : f32 to vector<8x128xf32>
    %208 = arith.subf %207, %201 : vector<8x128xf32>
    %209 = arith.mulf %208, %177 : vector<8x128xf32>
    %210 = arith.mulf %201, %206 : vector<8x128xf32>
    %211 = arith.addf %209, %210 : vector<8x128xf32>
    %212 = arith.index_cast %c5_i32 : i32 to index
    %c0_60 = arith.constant 0 : index
    %c0_61 = arith.constant 0 : index
    %213 = vector.load %arg22[%212, %c0_60, %c0_61] : memref<8x8x128xf32, #tpu.memory_space<vmem>>, vector<1x8x128xf32>
    %214 = vector.shape_cast %213 : vector<1x8x128xf32> to vector<8x128xf32>
    %215 = vector.shape_cast %211 : vector<8x128xf32> to vector<1x8x128xf32>
    tpu.vector_store %arg22[%212, %c0_60, %c0_61], %215 {strides = array<i32>} : memref<8x8x128xf32, #tpu.memory_space<vmem>>, vector<1x8x128xf32>,
    %c6_i32 = arith.constant 6 : i32
    %cst_62 = arith.constant dense<0.000000e+00> : vector<8x384xf32>
    %216 = tpu.matmul %211, %10, %cst_62 {dimension_numbers = #tpu.dot_dimension_numbers<[1], [0], [0], [1], [0, 0, 1, 1], [], []>} : vector<8x128xf32>, vector<128x384xf32>, vector<8x384xf32> -> vector<8x384xf32>
    %217 = arith.index_cast %c6_i32 : i32 to index
    %c0_63 = arith.constant 0 : index
    %c0_64 = arith.constant 0 : index
    %218 = vector.load %arg21[%217, %c0_63, %c0_64] : memref<8x8x384xf32, #tpu.memory_space<vmem>>, vector<1x8x384xf32>
    %219 = vector.shape_cast %218 : vector<1x8x384xf32> to vector<8x384xf32>
    %220 = vector.extract_strided_slice %219 {offsets = [0, 0], sizes = [8, 128], strides = [1, 1]} : vector<8x384xf32> to vector<8x128xf32>
    %221 = vector.extract_strided_slice %216 {offsets = [0, 0], sizes = [8, 128], strides = [1, 1]} : vector<8x384xf32> to vector<8x128xf32>
    %222 = arith.addf %220, %221 : vector<8x128xf32>
    %223 = arith.negf %222 : vector<8x128xf32>
    %224 = math.exp %223 : vector<8x128xf32>
    %cst_65 = arith.constant 1.000000e+00 : f32
    %225 = vector.broadcast %cst_65 : f32 to vector<8x128xf32>
    %226 = arith.addf %225, %224 : vector<8x128xf32>
    %227 = arith.divf %225, %226 : vector<8x128xf32>
    %228 = vector.extract_strided_slice %219 {offsets = [0, 128], sizes = [8, 128], strides = [1, 1]} : vector<8x384xf32> to vector<8x128xf32>
    %229 = vector.extract_strided_slice %216 {offsets = [0, 128], sizes = [8, 128], strides = [1, 1]} : vector<8x384xf32> to vector<8x128xf32>
    %230 = arith.addf %228, %229 : vector<8x128xf32>
    %231 = arith.negf %230 : vector<8x128xf32>
    %232 = math.exp %231 : vector<8x128xf32>
    %cst_66 = arith.constant 1.000000e+00 : f32
    %233 = vector.broadcast %cst_66 : f32 to vector<8x128xf32>
    %234 = arith.addf %233, %232 : vector<8x128xf32>
    %235 = arith.divf %233, %234 : vector<8x128xf32>
    %236 = vector.extract_strided_slice %219 {offsets = [0, 256], sizes = [8, 128], strides = [1, 1]} : vector<8x384xf32> to vector<8x128xf32>
    %237 = vector.extract_strided_slice %216 {offsets = [0, 256], sizes = [8, 128], strides = [1, 1]} : vector<8x384xf32> to vector<8x128xf32>
    %238 = arith.mulf %227, %237 : vector<8x128xf32>
    %239 = arith.addf %236, %238 : vector<8x128xf32>
    %240 = math.tanh %239 : vector<8x128xf32>
    %cst_67 = arith.constant 1.000000e+00 : f32
    %241 = vector.broadcast %cst_67 : f32 to vector<8x128xf32>
    %242 = arith.subf %241, %235 : vector<8x128xf32>
    %243 = arith.mulf %242, %211 : vector<8x128xf32>
    %244 = arith.mulf %235, %240 : vector<8x128xf32>
    %245 = arith.addf %243, %244 : vector<8x128xf32>
    %246 = arith.index_cast %c6_i32 : i32 to index
    %c0_68 = arith.constant 0 : index
    %c0_69 = arith.constant 0 : index
    %247 = vector.load %arg22[%246, %c0_68, %c0_69] : memref<8x8x128xf32, #tpu.memory_space<vmem>>, vector<1x8x128xf32>
    %248 = vector.shape_cast %247 : vector<1x8x128xf32> to vector<8x128xf32>
    %249 = vector.shape_cast %245 : vector<8x128xf32> to vector<1x8x128xf32>
    tpu.vector_store %arg22[%246, %c0_68, %c0_69], %249 {strides = array<i32>} : memref<8x8x128xf32, #tpu.memory_space<vmem>>, vector<1x8x128xf32>,
    %c7_i32 = arith.constant 7 : i32
    %cst_70 = arith.constant dense<0.000000e+00> : vector<8x384xf32>
    %250 = tpu.matmul %245, %10, %cst_70 {dimension_numbers = #tpu.dot_dimension_numbers<[1], [0], [0], [1], [0, 0, 1, 1], [], []>} : vector<8x128xf32>, vector<128x384xf32>, vector<8x384xf32> -> vector<8x384xf32>
    %251 = arith.index_cast %c7_i32 : i32 to index
    %c0_71 = arith.constant 0 : index
    %c0_72 = arith.constant 0 : index
    %252 = vector.load %arg21[%251, %c0_71, %c0_72] : memref<8x8x384xf32, #tpu.memory_space<vmem>>, vector<1x8x384xf32>
    %253 = vector.shape_cast %252 : vector<1x8x384xf32> to vector<8x384xf32>
    %254 = vector.extract_strided_slice %253 {offsets = [0, 0], sizes = [8, 128], strides = [1, 1]} : vector<8x384xf32> to vector<8x128xf32>
    %255 = vector.extract_strided_slice %250 {offsets = [0, 0], sizes = [8, 128], strides = [1, 1]} : vector<8x384xf32> to vector<8x128xf32>
    %256 = arith.addf %254, %255 : vector<8x128xf32>
    %257 = arith.negf %256 : vector<8x128xf32>
    %258 = math.exp %257 : vector<8x128xf32>
    %cst_73 = arith.constant 1.000000e+00 : f32
    %259 = vector.broadcast %cst_73 : f32 to vector<8x128xf32>
    %260 = arith.addf %259, %258 : vector<8x128xf32>
    %261 = arith.divf %259, %260 : vector<8x128xf32>
    %262 = vector.extract_strided_slice %253 {offsets = [0, 128], sizes = [8, 128], strides = [1, 1]} : vector<8x384xf32> to vector<8x128xf32>
    %263 = vector.extract_strided_slice %250 {offsets = [0, 128], sizes = [8, 128], strides = [1, 1]} : vector<8x384xf32> to vector<8x128xf32>
    %264 = arith.addf %262, %263 : vector<8x128xf32>
    %265 = arith.negf %264 : vector<8x128xf32>
    %266 = math.exp %265 : vector<8x128xf32>
    %cst_74 = arith.constant 1.000000e+00 : f32
    %267 = vector.broadcast %cst_74 : f32 to vector<8x128xf32>
    %268 = arith.addf %267, %266 : vector<8x128xf32>
    %269 = arith.divf %267, %268 : vector<8x128xf32>
    %270 = vector.extract_strided_slice %253 {offsets = [0, 256], sizes = [8, 128], strides = [1, 1]} : vector<8x384xf32> to vector<8x128xf32>
    %271 = vector.extract_strided_slice %250 {offsets = [0, 256], sizes = [8, 128], strides = [1, 1]} : vector<8x384xf32> to vector<8x128xf32>
    %272 = arith.mulf %261, %271 : vector<8x128xf32>
    %273 = arith.addf %270, %272 : vector<8x128xf32>
    %274 = math.tanh %273 : vector<8x128xf32>
    %cst_75 = arith.constant 1.000000e+00 : f32
    %275 = vector.broadcast %cst_75 : f32 to vector<8x128xf32>
    %276 = arith.subf %275, %269 : vector<8x128xf32>
    %277 = arith.mulf %276, %245 : vector<8x128xf32>
    %278 = arith.mulf %269, %274 : vector<8x128xf32>
    %279 = arith.addf %277, %278 : vector<8x128xf32>
    %280 = arith.index_cast %c7_i32 : i32 to index
    %c0_76 = arith.constant 0 : index
    %c0_77 = arith.constant 0 : index
    %281 = vector.load %arg22[%280, %c0_76, %c0_77] : memref<8x8x128xf32, #tpu.memory_space<vmem>>, vector<1x8x128xf32>
    %282 = vector.shape_cast %281 : vector<1x8x128xf32> to vector<8x128xf32>
    %283 = vector.shape_cast %279 : vector<8x128xf32> to vector<1x8x128xf32>
    tpu.vector_store %arg22[%280, %c0_76, %c0_77], %283 {strides = array<i32>} : memref<8x8x128xf32, #tpu.memory_space<vmem>>, vector<1x8x128xf32>,
    %c8_i32 = arith.constant 8 : i32
    %c0_78 = arith.constant 0 : index
    %c0_79 = arith.constant 0 : index
    %c0_80 = arith.constant 0 : index
    %284 = vector.load %arg22[%c0_78, %c0_79, %c0_80] : memref<8x8x128xf32, #tpu.memory_space<vmem>>, vector<8x8x128xf32>
    %285 = vector.shape_cast %0 : vector<8x128xf32> to vector<1x8x128xf32>
    %286 = vector.broadcast %285 : vector<1x8x128xf32> to vector<8x8x128xf32>
    %287 = arith.mulf %284, %286 : vector<8x8x128xf32>
    %288 = vector.shape_cast %287 : vector<8x8x128xf32> to vector<64x128xf32>
    %c0_81 = arith.constant 0 : index
    %c0_82 = arith.constant 0 : index
    %289 = vector.load %arg10[%c0_81, %c0_82] : memref<128x4xf32, #tpu.memory_space<vmem>>, vector<128x4xf32>
    %cst_83 = arith.constant dense<0.000000e+00> : vector<64x4xf32>
    %290 = tpu.matmul %288, %289, %cst_83 {dimension_numbers = #tpu.dot_dimension_numbers<[1], [0], [0], [1], [0, 0, 1, 1], [], []>} : vector<64x128xf32>, vector<128x4xf32>, vector<64x4xf32> -> vector<64x4xf32>
    %291 = vector.shape_cast %290 : vector<64x4xf32> to vector<8x8x4xf32>
    %cst_84 = arith.constant dense<0xFF800000> : vector<8x4xf32>
    %292 = vector.multi_reduction <maximumf>, %291, %cst_84 [0] : vector<8x8x4xf32> to vector<8x4xf32>
    %293 = vector.shape_cast %292 : vector<8x4xf32> to vector<1x8x4xf32>
    %294 = vector.broadcast %293 : vector<1x8x4xf32> to vector<8x8x4xf32>
    %295 = arith.subf %291, %294 : vector<8x8x4xf32>
    %296 = math.exp %295 : vector<8x8x4xf32>
    %cst_85 = arith.constant dense<0.000000e+00> : vector<8x4xf32>
    %297 = vector.multi_reduction <add>, %296, %cst_85 [0] : vector<8x8x4xf32> to vector<8x4xf32>
    %298 = vector.shape_cast %297 : vector<8x4xf32> to vector<1x8x4xf32>
    %299 = vector.broadcast %298 : vector<1x8x4xf32> to vector<8x8x4xf32>
    %300 = arith.divf %296, %299 : vector<8x8x4xf32>
    %301 = vector.shape_cast %300 : vector<8x8x4xf32> to vector<64x4xf32>
    %c0_86 = arith.constant 0 : index
    %c0_87 = arith.constant 0 : index
    %302 = vector.load %arg11[%c0_86, %c0_87] : memref<4x128xf32, #tpu.memory_space<vmem>>, vector<4x128xf32>
    %cst_88 = arith.constant dense<0.000000e+00> : vector<64x128xf32>
    %303 = tpu.matmul %301, %302, %cst_88 {dimension_numbers = #tpu.dot_dimension_numbers<[1], [0], [0], [1], [0, 0, 1, 1], [], []>} : vector<64x4xf32>, vector<4x128xf32>, vector<64x128xf32> -> vector<64x128xf32>
    %304 = vector.shape_cast %303 : vector<64x128xf32> to vector<8x8x128xf32>
    %c0_89 = arith.constant 0 : index
    %c0_90 = arith.constant 0 : index
    %c0_91 = arith.constant 0 : index
    %305 = vector.load %arg23[%c0_89, %c0_90, %c0_91] : memref<8x8x128xf32, #tpu.memory_space<vmem>>, vector<8x8x128xf32>
    tpu.vector_store %arg23[%c0_89, %c0_90, %c0_91], %304 {strides = array<i32>} : memref<8x8x128xf32, #tpu.memory_space<vmem>>, vector<8x8x128xf32>,
    %306 = vector.shape_cast %284 : vector<8x8x128xf32> to vector<64x128xf32>
    %c0_92 = arith.constant 0 : index
    %c0_93 = arith.constant 0 : index
    %307 = vector.load %arg7[%c0_92, %c0_93] : memref<128x384xf32, #tpu.memory_space<vmem>>, vector<128x384xf32>
    %cst_94 = arith.constant dense<0.000000e+00> : vector<64x384xf32>
    %308 = tpu.matmul %306, %307, %cst_94 {dimension_numbers = #tpu.dot_dimension_numbers<[1], [0], [0], [1], [0, 0, 1, 1], [], []>} : vector<64x128xf32>, vector<128x384xf32>, vector<64x384xf32> -> vector<64x384xf32>
    %c0_95 = arith.constant 0 : index
    %c0_96 = arith.constant 0 : index
    %309 = vector.load %arg9[%c0_95, %c0_96] : memref<1x384xf32, #tpu.memory_space<vmem>>, vector<1x384xf32>
    %310 = vector.broadcast %309 : vector<1x384xf32> to vector<64x384xf32>
    %311 = arith.addf %308, %310 : vector<64x384xf32>
    %312 = vector.shape_cast %311 : vector<64x384xf32> to vector<8x8x384xf32>
    %c0_97 = arith.constant 0 : index
    %c0_98 = arith.constant 0 : index
    %c0_99 = arith.constant 0 : index
    %313 = vector.load %arg21[%c0_97, %c0_98, %c0_99] : memref<8x8x384xf32, #tpu.memory_space<vmem>>, vector<8x8x384xf32>
    tpu.vector_store %arg21[%c0_97, %c0_98, %c0_99], %312 {strides = array<i32>} : memref<8x8x384xf32, #tpu.memory_space<vmem>>, vector<8x8x384xf32>,
    %c0_100 = arith.constant 0 : index
    %c0_101 = arith.constant 0 : index
    %314 = vector.load %arg8[%c0_100, %c0_101] : memref<128x384xf32, #tpu.memory_space<vmem>>, vector<128x384xf32>
    %cst_102 = arith.constant 0.000000e+00 : f32
    %315 = vector.broadcast %cst_102 : f32 to vector<8x128xf32>
    %c0_i32_103 = arith.constant 0 : i32
    %cst_104 = arith.constant dense<0.000000e+00> : vector<8x384xf32>
    %316 = tpu.matmul %315, %314, %cst_104 {dimension_numbers = #tpu.dot_dimension_numbers<[1], [0], [0], [1], [0, 0, 1, 1], [], []>} : vector<8x128xf32>, vector<128x384xf32>, vector<8x384xf32> -> vector<8x384xf32>
    %317 = arith.index_cast %c0_i32_103 : i32 to index
    %c0_105 = arith.constant 0 : index
    %c0_106 = arith.constant 0 : index
    %318 = vector.load %arg21[%317, %c0_105, %c0_106] : memref<8x8x384xf32, #tpu.memory_space<vmem>>, vector<1x8x384xf32>
    %319 = vector.shape_cast %318 : vector<1x8x384xf32> to vector<8x384xf32>
    %320 = vector.extract_strided_slice %319 {offsets = [0, 0], sizes = [8, 128], strides = [1, 1]} : vector<8x384xf32> to vector<8x128xf32>
    %321 = vector.extract_strided_slice %316 {offsets = [0, 0], sizes = [8, 128], strides = [1, 1]} : vector<8x384xf32> to vector<8x128xf32>
    %322 = arith.addf %320, %321 : vector<8x128xf32>
    %323 = arith.negf %322 : vector<8x128xf32>
    %324 = math.exp %323 : vector<8x128xf32>
    %cst_107 = arith.constant 1.000000e+00 : f32
    %325 = vector.broadcast %cst_107 : f32 to vector<8x128xf32>
    %326 = arith.addf %325, %324 : vector<8x128xf32>
    %327 = arith.divf %325, %326 : vector<8x128xf32>
    %328 = vector.extract_strided_slice %319 {offsets = [0, 128], sizes = [8, 128], strides = [1, 1]} : vector<8x384xf32> to vector<8x128xf32>
    %329 = vector.extract_strided_slice %316 {offsets = [0, 128], sizes = [8, 128], strides = [1, 1]} : vector<8x384xf32> to vector<8x128xf32>
    %330 = arith.addf %328, %329 : vector<8x128xf32>
    %331 = arith.negf %330 : vector<8x128xf32>
    %332 = math.exp %331 : vector<8x128xf32>
    %cst_108 = arith.constant 1.000000e+00 : f32
    %333 = vector.broadcast %cst_108 : f32 to vector<8x128xf32>
    %334 = arith.addf %333, %332 : vector<8x128xf32>
    %335 = arith.divf %333, %334 : vector<8x128xf32>
    %336 = vector.extract_strided_slice %319 {offsets = [0, 256], sizes = [8, 128], strides = [1, 1]} : vector<8x384xf32> to vector<8x128xf32>
    %337 = vector.extract_strided_slice %316 {offsets = [0, 256], sizes = [8, 128], strides = [1, 1]} : vector<8x384xf32> to vector<8x128xf32>
    %338 = arith.mulf %327, %337 : vector<8x128xf32>
    %339 = arith.addf %336, %338 : vector<8x128xf32>
    %340 = math.tanh %339 : vector<8x128xf32>
    %341 = arith.index_cast %c0_i32_103 : i32 to index
    %c0_109 = arith.constant 0 : index
    %c0_110 = arith.constant 0 : index
    %342 = vector.load %arg23[%341, %c0_109, %c0_110] : memref<8x8x128xf32, #tpu.memory_space<vmem>>, vector<1x8x128xf32>
    %343 = vector.shape_cast %342 : vector<1x8x128xf32> to vector<8x128xf32>
    %344 = arith.mulf %343, %335 : vector<8x128xf32>
    %cst_111 = arith.constant 1.000000e+00 : f32
    %345 = vector.broadcast %cst_111 : f32 to vector<8x128xf32>
    %346 = arith.subf %345, %344 : vector<8x128xf32>
    %347 = arith.mulf %346, %315 : vector<8x128xf32>
    %348 = arith.mulf %344, %340 : vector<8x128xf32>
    %349 = arith.addf %347, %348 : vector<8x128xf32>
    %c1_i32_112 = arith.constant 1 : i32
    %cst_113 = arith.constant dense<0.000000e+00> : vector<8x384xf32>
    %350 = tpu.matmul %349, %314, %cst_113 {dimension_numbers = #tpu.dot_dimension_numbers<[1], [0], [0], [1], [0, 0, 1, 1], [], []>} : vector<8x128xf32>, vector<128x384xf32>, vector<8x384xf32> -> vector<8x384xf32>
    %351 = arith.index_cast %c1_i32_112 : i32 to index
    %c0_114 = arith.constant 0 : index
    %c0_115 = arith.constant 0 : index
    %352 = vector.load %arg21[%351, %c0_114, %c0_115] : memref<8x8x384xf32, #tpu.memory_space<vmem>>, vector<1x8x384xf32>
    %353 = vector.shape_cast %352 : vector<1x8x384xf32> to vector<8x384xf32>
    %354 = vector.extract_strided_slice %353 {offsets = [0, 0], sizes = [8, 128], strides = [1, 1]} : vector<8x384xf32> to vector<8x128xf32>
    %355 = vector.extract_strided_slice %350 {offsets = [0, 0], sizes = [8, 128], strides = [1, 1]} : vector<8x384xf32> to vector<8x128xf32>
    %356 = arith.addf %354, %355 : vector<8x128xf32>
    %357 = arith.negf %356 : vector<8x128xf32>
    %358 = math.exp %357 : vector<8x128xf32>
    %cst_116 = arith.constant 1.000000e+00 : f32
    %359 = vector.broadcast %cst_116 : f32 to vector<8x128xf32>
    %360 = arith.addf %359, %358 : vector<8x128xf32>
    %361 = arith.divf %359, %360 : vector<8x128xf32>
    %362 = vector.extract_strided_slice %353 {offsets = [0, 128], sizes = [8, 128], strides = [1, 1]} : vector<8x384xf32> to vector<8x128xf32>
    %363 = vector.extract_strided_slice %350 {offsets = [0, 128], sizes = [8, 128], strides = [1, 1]} : vector<8x384xf32> to vector<8x128xf32>
    %364 = arith.addf %362, %363 : vector<8x128xf32>
    %365 = arith.negf %364 : vector<8x128xf32>
    %366 = math.exp %365 : vector<8x128xf32>
    %cst_117 = arith.constant 1.000000e+00 : f32
    %367 = vector.broadcast %cst_117 : f32 to vector<8x128xf32>
    %368 = arith.addf %367, %366 : vector<8x128xf32>
    %369 = arith.divf %367, %368 : vector<8x128xf32>
    %370 = vector.extract_strided_slice %353 {offsets = [0, 256], sizes = [8, 128], strides = [1, 1]} : vector<8x384xf32> to vector<8x128xf32>
    %371 = vector.extract_strided_slice %350 {offsets = [0, 256], sizes = [8, 128], strides = [1, 1]} : vector<8x384xf32> to vector<8x128xf32>
    %372 = arith.mulf %361, %371 : vector<8x128xf32>
    %373 = arith.addf %370, %372 : vector<8x128xf32>
    %374 = math.tanh %373 : vector<8x128xf32>
    %375 = arith.index_cast %c1_i32_112 : i32 to index
    %c0_118 = arith.constant 0 : index
    %c0_119 = arith.constant 0 : index
    %376 = vector.load %arg23[%375, %c0_118, %c0_119] : memref<8x8x128xf32, #tpu.memory_space<vmem>>, vector<1x8x128xf32>
    %377 = vector.shape_cast %376 : vector<1x8x128xf32> to vector<8x128xf32>
    %378 = arith.mulf %377, %369 : vector<8x128xf32>
    %cst_120 = arith.constant 1.000000e+00 : f32
    %379 = vector.broadcast %cst_120 : f32 to vector<8x128xf32>
    %380 = arith.subf %379, %378 : vector<8x128xf32>
    %381 = arith.mulf %380, %349 : vector<8x128xf32>
    %382 = arith.mulf %378, %374 : vector<8x128xf32>
    %383 = arith.addf %381, %382 : vector<8x128xf32>
    %c2_i32_121 = arith.constant 2 : i32
    %cst_122 = arith.constant dense<0.000000e+00> : vector<8x384xf32>
    %384 = tpu.matmul %383, %314, %cst_122 {dimension_numbers = #tpu.dot_dimension_numbers<[1], [0], [0], [1], [0, 0, 1, 1], [], []>} : vector<8x128xf32>, vector<128x384xf32>, vector<8x384xf32> -> vector<8x384xf32>
    %385 = arith.index_cast %c2_i32_121 : i32 to index
    %c0_123 = arith.constant 0 : index
    %c0_124 = arith.constant 0 : index
    %386 = vector.load %arg21[%385, %c0_123, %c0_124] : memref<8x8x384xf32, #tpu.memory_space<vmem>>, vector<1x8x384xf32>
    %387 = vector.shape_cast %386 : vector<1x8x384xf32> to vector<8x384xf32>
    %388 = vector.extract_strided_slice %387 {offsets = [0, 0], sizes = [8, 128], strides = [1, 1]} : vector<8x384xf32> to vector<8x128xf32>
    %389 = vector.extract_strided_slice %384 {offsets = [0, 0], sizes = [8, 128], strides = [1, 1]} : vector<8x384xf32> to vector<8x128xf32>
    %390 = arith.addf %388, %389 : vector<8x128xf32>
    %391 = arith.negf %390 : vector<8x128xf32>
    %392 = math.exp %391 : vector<8x128xf32>
    %cst_125 = arith.constant 1.000000e+00 : f32
    %393 = vector.broadcast %cst_125 : f32 to vector<8x128xf32>
    %394 = arith.addf %393, %392 : vector<8x128xf32>
    %395 = arith.divf %393, %394 : vector<8x128xf32>
    %396 = vector.extract_strided_slice %387 {offsets = [0, 128], sizes = [8, 128], strides = [1, 1]} : vector<8x384xf32> to vector<8x128xf32>
    %397 = vector.extract_strided_slice %384 {offsets = [0, 128], sizes = [8, 128], strides = [1, 1]} : vector<8x384xf32> to vector<8x128xf32>
    %398 = arith.addf %396, %397 : vector<8x128xf32>
    %399 = arith.negf %398 : vector<8x128xf32>
    %400 = math.exp %399 : vector<8x128xf32>
    %cst_126 = arith.constant 1.000000e+00 : f32
    %401 = vector.broadcast %cst_126 : f32 to vector<8x128xf32>
    %402 = arith.addf %401, %400 : vector<8x128xf32>
    %403 = arith.divf %401, %402 : vector<8x128xf32>
    %404 = vector.extract_strided_slice %387 {offsets = [0, 256], sizes = [8, 128], strides = [1, 1]} : vector<8x384xf32> to vector<8x128xf32>
    %405 = vector.extract_strided_slice %384 {offsets = [0, 256], sizes = [8, 128], strides = [1, 1]} : vector<8x384xf32> to vector<8x128xf32>
    %406 = arith.mulf %395, %405 : vector<8x128xf32>
    %407 = arith.addf %404, %406 : vector<8x128xf32>
    %408 = math.tanh %407 : vector<8x128xf32>
    %409 = arith.index_cast %c2_i32_121 : i32 to index
    %c0_127 = arith.constant 0 : index
    %c0_128 = arith.constant 0 : index
    %410 = vector.load %arg23[%409, %c0_127, %c0_128] : memref<8x8x128xf32, #tpu.memory_space<vmem>>, vector<1x8x128xf32>
    %411 = vector.shape_cast %410 : vector<1x8x128xf32> to vector<8x128xf32>
    %412 = arith.mulf %411, %403 : vector<8x128xf32>
    %cst_129 = arith.constant 1.000000e+00 : f32
    %413 = vector.broadcast %cst_129 : f32 to vector<8x128xf32>
    %414 = arith.subf %413, %412 : vector<8x128xf32>
    %415 = arith.mulf %414, %383 : vector<8x128xf32>
    %416 = arith.mulf %412, %408 : vector<8x128xf32>
    %417 = arith.addf %415, %416 : vector<8x128xf32>
    %c3_i32_130 = arith.constant 3 : i32
    %cst_131 = arith.constant dense<0.000000e+00> : vector<8x384xf32>
    %418 = tpu.matmul %417, %314, %cst_131 {dimension_numbers = #tpu.dot_dimension_numbers<[1], [0], [0], [1], [0, 0, 1, 1], [], []>} : vector<8x128xf32>, vector<128x384xf32>, vector<8x384xf32> -> vector<8x384xf32>
    %419 = arith.index_cast %c3_i32_130 : i32 to index
    %c0_132 = arith.constant 0 : index
    %c0_133 = arith.constant 0 : index
    %420 = vector.load %arg21[%419, %c0_132, %c0_133] : memref<8x8x384xf32, #tpu.memory_space<vmem>>, vector<1x8x384xf32>
    %421 = vector.shape_cast %420 : vector<1x8x384xf32> to vector<8x384xf32>
    %422 = vector.extract_strided_slice %421 {offsets = [0, 0], sizes = [8, 128], strides = [1, 1]} : vector<8x384xf32> to vector<8x128xf32>
    %423 = vector.extract_strided_slice %418 {offsets = [0, 0], sizes = [8, 128], strides = [1, 1]} : vector<8x384xf32> to vector<8x128xf32>
    %424 = arith.addf %422, %423 : vector<8x128xf32>
    %425 = arith.negf %424 : vector<8x128xf32>
    %426 = math.exp %425 : vector<8x128xf32>
    %cst_134 = arith.constant 1.000000e+00 : f32
    %427 = vector.broadcast %cst_134 : f32 to vector<8x128xf32>
    %428 = arith.addf %427, %426 : vector<8x128xf32>
    %429 = arith.divf %427, %428 : vector<8x128xf32>
    %430 = vector.extract_strided_slice %421 {offsets = [0, 128], sizes = [8, 128], strides = [1, 1]} : vector<8x384xf32> to vector<8x128xf32>
    %431 = vector.extract_strided_slice %418 {offsets = [0, 128], sizes = [8, 128], strides = [1, 1]} : vector<8x384xf32> to vector<8x128xf32>
    %432 = arith.addf %430, %431 : vector<8x128xf32>
    %433 = arith.negf %432 : vector<8x128xf32>
    %434 = math.exp %433 : vector<8x128xf32>
    %cst_135 = arith.constant 1.000000e+00 : f32
    %435 = vector.broadcast %cst_135 : f32 to vector<8x128xf32>
    %436 = arith.addf %435, %434 : vector<8x128xf32>
    %437 = arith.divf %435, %436 : vector<8x128xf32>
    %438 = vector.extract_strided_slice %421 {offsets = [0, 256], sizes = [8, 128], strides = [1, 1]} : vector<8x384xf32> to vector<8x128xf32>
    %439 = vector.extract_strided_slice %418 {offsets = [0, 256], sizes = [8, 128], strides = [1, 1]} : vector<8x384xf32> to vector<8x128xf32>
    %440 = arith.mulf %429, %439 : vector<8x128xf32>
    %441 = arith.addf %438, %440 : vector<8x128xf32>
    %442 = math.tanh %441 : vector<8x128xf32>
    %443 = arith.index_cast %c3_i32_130 : i32 to index
    %c0_136 = arith.constant 0 : index
    %c0_137 = arith.constant 0 : index
    %444 = vector.load %arg23[%443, %c0_136, %c0_137] : memref<8x8x128xf32, #tpu.memory_space<vmem>>, vector<1x8x128xf32>
    %445 = vector.shape_cast %444 : vector<1x8x128xf32> to vector<8x128xf32>
    %446 = arith.mulf %445, %437 : vector<8x128xf32>
    %cst_138 = arith.constant 1.000000e+00 : f32
    %447 = vector.broadcast %cst_138 : f32 to vector<8x128xf32>
    %448 = arith.subf %447, %446 : vector<8x128xf32>
    %449 = arith.mulf %448, %417 : vector<8x128xf32>
    %450 = arith.mulf %446, %442 : vector<8x128xf32>
    %451 = arith.addf %449, %450 : vector<8x128xf32>
    %c4_i32_139 = arith.constant 4 : i32
    %cst_140 = arith.constant dense<0.000000e+00> : vector<8x384xf32>
    %452 = tpu.matmul %451, %314, %cst_140 {dimension_numbers = #tpu.dot_dimension_numbers<[1], [0], [0], [1], [0, 0, 1, 1], [], []>} : vector<8x128xf32>, vector<128x384xf32>, vector<8x384xf32> -> vector<8x384xf32>
    %453 = arith.index_cast %c4_i32_139 : i32 to index
    %c0_141 = arith.constant 0 : index
    %c0_142 = arith.constant 0 : index
    %454 = vector.load %arg21[%453, %c0_141, %c0_142] : memref<8x8x384xf32, #tpu.memory_space<vmem>>, vector<1x8x384xf32>
    %455 = vector.shape_cast %454 : vector<1x8x384xf32> to vector<8x384xf32>
    %456 = vector.extract_strided_slice %455 {offsets = [0, 0], sizes = [8, 128], strides = [1, 1]} : vector<8x384xf32> to vector<8x128xf32>
    %457 = vector.extract_strided_slice %452 {offsets = [0, 0], sizes = [8, 128], strides = [1, 1]} : vector<8x384xf32> to vector<8x128xf32>
    %458 = arith.addf %456, %457 : vector<8x128xf32>
    %459 = arith.negf %458 : vector<8x128xf32>
    %460 = math.exp %459 : vector<8x128xf32>
    %cst_143 = arith.constant 1.000000e+00 : f32
    %461 = vector.broadcast %cst_143 : f32 to vector<8x128xf32>
    %462 = arith.addf %461, %460 : vector<8x128xf32>
    %463 = arith.divf %461, %462 : vector<8x128xf32>
    %464 = vector.extract_strided_slice %455 {offsets = [0, 128], sizes = [8, 128], strides = [1, 1]} : vector<8x384xf32> to vector<8x128xf32>
    %465 = vector.extract_strided_slice %452 {offsets = [0, 128], sizes = [8, 128], strides = [1, 1]} : vector<8x384xf32> to vector<8x128xf32>
    %466 = arith.addf %464, %465 : vector<8x128xf32>
    %467 = arith.negf %466 : vector<8x128xf32>
    %468 = math.exp %467 : vector<8x128xf32>
    %cst_144 = arith.constant 1.000000e+00 : f32
    %469 = vector.broadcast %cst_144 : f32 to vector<8x128xf32>
    %470 = arith.addf %469, %468 : vector<8x128xf32>
    %471 = arith.divf %469, %470 : vector<8x128xf32>
    %472 = vector.extract_strided_slice %455 {offsets = [0, 256], sizes = [8, 128], strides = [1, 1]} : vector<8x384xf32> to vector<8x128xf32>
    %473 = vector.extract_strided_slice %452 {offsets = [0, 256], sizes = [8, 128], strides = [1, 1]} : vector<8x384xf32> to vector<8x128xf32>
    %474 = arith.mulf %463, %473 : vector<8x128xf32>
    %475 = arith.addf %472, %474 : vector<8x128xf32>
    %476 = math.tanh %475 : vector<8x128xf32>
    %477 = arith.index_cast %c4_i32_139 : i32 to index
    %c0_145 = arith.constant 0 : index
    %c0_146 = arith.constant 0 : index
    %478 = vector.load %arg23[%477, %c0_145, %c0_146] : memref<8x8x128xf32, #tpu.memory_space<vmem>>, vector<1x8x128xf32>
    %479 = vector.shape_cast %478 : vector<1x8x128xf32> to vector<8x128xf32>
    %480 = arith.mulf %479, %471 : vector<8x128xf32>
    %cst_147 = arith.constant 1.000000e+00 : f32
    %481 = vector.broadcast %cst_147 : f32 to vector<8x128xf32>
    %482 = arith.subf %481, %480 : vector<8x128xf32>
    %483 = arith.mulf %482, %451 : vector<8x128xf32>
    %484 = arith.mulf %480, %476 : vector<8x128xf32>
    %485 = arith.addf %483, %484 : vector<8x128xf32>
    %c5_i32_148 = arith.constant 5 : i32
    %cst_149 = arith.constant dense<0.000000e+00> : vector<8x384xf32>
    %486 = tpu.matmul %485, %314, %cst_149 {dimension_numbers = #tpu.dot_dimension_numbers<[1], [0], [0], [1], [0, 0, 1, 1], [], []>} : vector<8x128xf32>, vector<128x384xf32>, vector<8x384xf32> -> vector<8x384xf32>
    %487 = arith.index_cast %c5_i32_148 : i32 to index
    %c0_150 = arith.constant 0 : index
    %c0_151 = arith.constant 0 : index
    %488 = vector.load %arg21[%487, %c0_150, %c0_151] : memref<8x8x384xf32, #tpu.memory_space<vmem>>, vector<1x8x384xf32>
    %489 = vector.shape_cast %488 : vector<1x8x384xf32> to vector<8x384xf32>
    %490 = vector.extract_strided_slice %489 {offsets = [0, 0], sizes = [8, 128], strides = [1, 1]} : vector<8x384xf32> to vector<8x128xf32>
    %491 = vector.extract_strided_slice %486 {offsets = [0, 0], sizes = [8, 128], strides = [1, 1]} : vector<8x384xf32> to vector<8x128xf32>
    %492 = arith.addf %490, %491 : vector<8x128xf32>
    %493 = arith.negf %492 : vector<8x128xf32>
    %494 = math.exp %493 : vector<8x128xf32>
    %cst_152 = arith.constant 1.000000e+00 : f32
    %495 = vector.broadcast %cst_152 : f32 to vector<8x128xf32>
    %496 = arith.addf %495, %494 : vector<8x128xf32>
    %497 = arith.divf %495, %496 : vector<8x128xf32>
    %498 = vector.extract_strided_slice %489 {offsets = [0, 128], sizes = [8, 128], strides = [1, 1]} : vector<8x384xf32> to vector<8x128xf32>
    %499 = vector.extract_strided_slice %486 {offsets = [0, 128], sizes = [8, 128], strides = [1, 1]} : vector<8x384xf32> to vector<8x128xf32>
    %500 = arith.addf %498, %499 : vector<8x128xf32>
    %501 = arith.negf %500 : vector<8x128xf32>
    %502 = math.exp %501 : vector<8x128xf32>
    %cst_153 = arith.constant 1.000000e+00 : f32
    %503 = vector.broadcast %cst_153 : f32 to vector<8x128xf32>
    %504 = arith.addf %503, %502 : vector<8x128xf32>
    %505 = arith.divf %503, %504 : vector<8x128xf32>
    %506 = vector.extract_strided_slice %489 {offsets = [0, 256], sizes = [8, 128], strides = [1, 1]} : vector<8x384xf32> to vector<8x128xf32>
    %507 = vector.extract_strided_slice %486 {offsets = [0, 256], sizes = [8, 128], strides = [1, 1]} : vector<8x384xf32> to vector<8x128xf32>
    %508 = arith.mulf %497, %507 : vector<8x128xf32>
    %509 = arith.addf %506, %508 : vector<8x128xf32>
    %510 = math.tanh %509 : vector<8x128xf32>
    %511 = arith.index_cast %c5_i32_148 : i32 to index
    %c0_154 = arith.constant 0 : index
    %c0_155 = arith.constant 0 : index
    %512 = vector.load %arg23[%511, %c0_154, %c0_155] : memref<8x8x128xf32, #tpu.memory_space<vmem>>, vector<1x8x128xf32>
    %513 = vector.shape_cast %512 : vector<1x8x128xf32> to vector<8x128xf32>
    %514 = arith.mulf %513, %505 : vector<8x128xf32>
    %cst_156 = arith.constant 1.000000e+00 : f32
    %515 = vector.broadcast %cst_156 : f32 to vector<8x128xf32>
    %516 = arith.subf %515, %514 : vector<8x128xf32>
    %517 = arith.mulf %516, %485 : vector<8x128xf32>
    %518 = arith.mulf %514, %510 : vector<8x128xf32>
    %519 = arith.addf %517, %518 : vector<8x128xf32>
    %c6_i32_157 = arith.constant 6 : i32
    %cst_158 = arith.constant dense<0.000000e+00> : vector<8x384xf32>
    %520 = tpu.matmul %519, %314, %cst_158 {dimension_numbers = #tpu.dot_dimension_numbers<[1], [0], [0], [1], [0, 0, 1, 1], [], []>} : vector<8x128xf32>, vector<128x384xf32>, vector<8x384xf32> -> vector<8x384xf32>
    %521 = arith.index_cast %c6_i32_157 : i32 to index
    %c0_159 = arith.constant 0 : index
    %c0_160 = arith.constant 0 : index
    %522 = vector.load %arg21[%521, %c0_159, %c0_160] : memref<8x8x384xf32, #tpu.memory_space<vmem>>, vector<1x8x384xf32>
    %523 = vector.shape_cast %522 : vector<1x8x384xf32> to vector<8x384xf32>
    %524 = vector.extract_strided_slice %523 {offsets = [0, 0], sizes = [8, 128], strides = [1, 1]} : vector<8x384xf32> to vector<8x128xf32>
    %525 = vector.extract_strided_slice %520 {offsets = [0, 0], sizes = [8, 128], strides = [1, 1]} : vector<8x384xf32> to vector<8x128xf32>
    %526 = arith.addf %524, %525 : vector<8x128xf32>
    %527 = arith.negf %526 : vector<8x128xf32>
    %528 = math.exp %527 : vector<8x128xf32>
    %cst_161 = arith.constant 1.000000e+00 : f32
    %529 = vector.broadcast %cst_161 : f32 to vector<8x128xf32>
    %530 = arith.addf %529, %528 : vector<8x128xf32>
    %531 = arith.divf %529, %530 : vector<8x128xf32>
    %532 = vector.extract_strided_slice %523 {offsets = [0, 128], sizes = [8, 128], strides = [1, 1]} : vector<8x384xf32> to vector<8x128xf32>
    %533 = vector.extract_strided_slice %520 {offsets = [0, 128], sizes = [8, 128], strides = [1, 1]} : vector<8x384xf32> to vector<8x128xf32>
    %534 = arith.addf %532, %533 : vector<8x128xf32>
    %535 = arith.negf %534 : vector<8x128xf32>
    %536 = math.exp %535 : vector<8x128xf32>
    %cst_162 = arith.constant 1.000000e+00 : f32
    %537 = vector.broadcast %cst_162 : f32 to vector<8x128xf32>
    %538 = arith.addf %537, %536 : vector<8x128xf32>
    %539 = arith.divf %537, %538 : vector<8x128xf32>
    %540 = vector.extract_strided_slice %523 {offsets = [0, 256], sizes = [8, 128], strides = [1, 1]} : vector<8x384xf32> to vector<8x128xf32>
    %541 = vector.extract_strided_slice %520 {offsets = [0, 256], sizes = [8, 128], strides = [1, 1]} : vector<8x384xf32> to vector<8x128xf32>
    %542 = arith.mulf %531, %541 : vector<8x128xf32>
    %543 = arith.addf %540, %542 : vector<8x128xf32>
    %544 = math.tanh %543 : vector<8x128xf32>
    %545 = arith.index_cast %c6_i32_157 : i32 to index
    %c0_163 = arith.constant 0 : index
    %c0_164 = arith.constant 0 : index
    %546 = vector.load %arg23[%545, %c0_163, %c0_164] : memref<8x8x128xf32, #tpu.memory_space<vmem>>, vector<1x8x128xf32>
    %547 = vector.shape_cast %546 : vector<1x8x128xf32> to vector<8x128xf32>
    %548 = arith.mulf %547, %539 : vector<8x128xf32>
    %cst_165 = arith.constant 1.000000e+00 : f32
    %549 = vector.broadcast %cst_165 : f32 to vector<8x128xf32>
    %550 = arith.subf %549, %548 : vector<8x128xf32>
    %551 = arith.mulf %550, %519 : vector<8x128xf32>
    %552 = arith.mulf %548, %544 : vector<8x128xf32>
    %553 = arith.addf %551, %552 : vector<8x128xf32>
    %c7_i32_166 = arith.constant 7 : i32
    %cst_167 = arith.constant dense<0.000000e+00> : vector<8x384xf32>
    %554 = tpu.matmul %553, %314, %cst_167 {dimension_numbers = #tpu.dot_dimension_numbers<[1], [0], [0], [1], [0, 0, 1, 1], [], []>} : vector<8x128xf32>, vector<128x384xf32>, vector<8x384xf32> -> vector<8x384xf32>
    %555 = arith.index_cast %c7_i32_166 : i32 to index
    %c0_168 = arith.constant 0 : index
    %c0_169 = arith.constant 0 : index
    %556 = vector.load %arg21[%555, %c0_168, %c0_169] : memref<8x8x384xf32, #tpu.memory_space<vmem>>, vector<1x8x384xf32>
    %557 = vector.shape_cast %556 : vector<1x8x384xf32> to vector<8x384xf32>
    %558 = vector.extract_strided_slice %557 {offsets = [0, 0], sizes = [8, 128], strides = [1, 1]} : vector<8x384xf32> to vector<8x128xf32>
    %559 = vector.extract_strided_slice %554 {offsets = [0, 0], sizes = [8, 128], strides = [1, 1]} : vector<8x384xf32> to vector<8x128xf32>
    %560 = arith.addf %558, %559 : vector<8x128xf32>
    %561 = arith.negf %560 : vector<8x128xf32>
    %562 = math.exp %561 : vector<8x128xf32>
    %cst_170 = arith.constant 1.000000e+00 : f32
    %563 = vector.broadcast %cst_170 : f32 to vector<8x128xf32>
    %564 = arith.addf %563, %562 : vector<8x128xf32>
    %565 = arith.divf %563, %564 : vector<8x128xf32>
    %566 = vector.extract_strided_slice %557 {offsets = [0, 128], sizes = [8, 128], strides = [1, 1]} : vector<8x384xf32> to vector<8x128xf32>
    %567 = vector.extract_strided_slice %554 {offsets = [0, 128], sizes = [8, 128], strides = [1, 1]} : vector<8x384xf32> to vector<8x128xf32>
    %568 = arith.addf %566, %567 : vector<8x128xf32>
    %569 = arith.negf %568 : vector<8x128xf32>
    %570 = math.exp %569 : vector<8x128xf32>
    %cst_171 = arith.constant 1.000000e+00 : f32
    %571 = vector.broadcast %cst_171 : f32 to vector<8x128xf32>
    %572 = arith.addf %571, %570 : vector<8x128xf32>
    %573 = arith.divf %571, %572 : vector<8x128xf32>
    %574 = vector.extract_strided_slice %557 {offsets = [0, 256], sizes = [8, 128], strides = [1, 1]} : vector<8x384xf32> to vector<8x128xf32>
    %575 = vector.extract_strided_slice %554 {offsets = [0, 256], sizes = [8, 128], strides = [1, 1]} : vector<8x384xf32> to vector<8x128xf32>
    %576 = arith.mulf %565, %575 : vector<8x128xf32>
    %577 = arith.addf %574, %576 : vector<8x128xf32>
    %578 = math.tanh %577 : vector<8x128xf32>
    %579 = arith.index_cast %c7_i32_166 : i32 to index
    %c0_172 = arith.constant 0 : index
    %c0_173 = arith.constant 0 : index
    %580 = vector.load %arg23[%579, %c0_172, %c0_173] : memref<8x8x128xf32, #tpu.memory_space<vmem>>, vector<1x8x128xf32>
    %581 = vector.shape_cast %580 : vector<1x8x128xf32> to vector<8x128xf32>
    %582 = arith.mulf %581, %573 : vector<8x128xf32>
    %cst_174 = arith.constant 1.000000e+00 : f32
    %583 = vector.broadcast %cst_174 : f32 to vector<8x128xf32>
    %584 = arith.subf %583, %582 : vector<8x128xf32>
    %585 = arith.mulf %584, %553 : vector<8x128xf32>
    %586 = arith.mulf %582, %578 : vector<8x128xf32>
    %587 = arith.addf %585, %586 : vector<8x128xf32>
    %c8_i32_175 = arith.constant 8 : i32
    %c0_176 = arith.constant 0 : index
    %c0_177 = arith.constant 0 : index
    %588 = vector.load %arg12[%c0_176, %c0_177] : memref<128x192xf32, #tpu.memory_space<vmem>>, vector<128x192xf32>
    %cst_178 = arith.constant dense<0.000000e+00> : vector<8x192xf32>
    %589 = tpu.matmul %587, %588, %cst_178 {dimension_numbers = #tpu.dot_dimension_numbers<[1], [0], [0], [1], [0, 0, 1, 1], [], []>} : vector<8x128xf32>, vector<128x192xf32>, vector<8x192xf32> -> vector<8x192xf32>
    %c0_179 = arith.constant 0 : index
    %c0_180 = arith.constant 0 : index
    %590 = vector.load %arg13[%c0_179, %c0_180] : memref<128x192xf32, #tpu.memory_space<vmem>>, vector<128x192xf32>
    %cst_181 = arith.constant dense<0.000000e+00> : vector<8x192xf32>
    %591 = tpu.matmul %0, %590, %cst_181 {dimension_numbers = #tpu.dot_dimension_numbers<[1], [0], [0], [1], [0, 0, 1, 1], [], []>} : vector<8x128xf32>, vector<128x192xf32>, vector<8x192xf32> -> vector<8x192xf32>
    %592 = arith.addf %589, %591 : vector<8x192xf32>
    %c0_182 = arith.constant 0 : index
    %c0_183 = arith.constant 0 : index
    %593 = vector.load %arg3[%c0_182, %c0_183] : memref<8x128xf32, #tpu.memory_space<vmem>>, vector<8x128xf32>
    %c0_184 = arith.constant 0 : index
    %c0_185 = arith.constant 0 : index
    %594 = vector.load %arg14[%c0_184, %c0_185] : memref<128x192xf32, #tpu.memory_space<vmem>>, vector<128x192xf32>
    %cst_186 = arith.constant dense<0.000000e+00> : vector<8x192xf32>
    %595 = tpu.matmul %593, %594, %cst_186 {dimension_numbers = #tpu.dot_dimension_numbers<[1], [0], [0], [1], [0, 0, 1, 1], [], []>} : vector<8x128xf32>, vector<128x192xf32>, vector<8x192xf32> -> vector<8x192xf32>
    %596 = arith.addf %592, %595 : vector<8x192xf32>
    %c0_187 = arith.constant 0 : index
    %c0_188 = arith.constant 0 : index
    %597 = vector.load %arg15[%c0_187, %c0_188] : memref<1x192xf32, #tpu.memory_space<vmem>>, vector<1x192xf32>
    %598 = vector.broadcast %597 : vector<1x192xf32> to vector<8x192xf32>
    %599 = arith.addf %596, %598 : vector<8x192xf32>
    %cst_189 = arith.constant 0.000000e+00 : f32
    %600 = vector.broadcast %cst_189 : f32 to vector<8x192xf32>
    %601 = arith.maximumf %599, %600 : vector<8x192xf32>
    %c0_190 = arith.constant 0 : index
    %c0_191 = arith.constant 0 : index
    %602 = vector.load %arg16[%c0_190, %c0_191] : memref<192x128xf32, #tpu.memory_space<vmem>>, vector<192x128xf32>
    %cst_192 = arith.constant dense<0.000000e+00> : vector<8x128xf32>
    %603 = tpu.matmul %601, %602, %cst_192 {dimension_numbers = #tpu.dot_dimension_numbers<[1], [0], [0], [1], [0, 0, 1, 1], [], []>} : vector<8x192xf32>, vector<192x128xf32>, vector<8x128xf32> -> vector<8x128xf32>
    %c0_193 = arith.constant 0 : index
    %c0_194 = arith.constant 0 : index
    %604 = vector.load %arg17[%c0_193, %c0_194] : memref<1x128xf32, #tpu.memory_space<vmem>>, vector<1x128xf32>
    %605 = vector.broadcast %604 : vector<1x128xf32> to vector<8x128xf32>
    %606 = arith.addf %603, %605 : vector<8x128xf32>
    %cst_195 = arith.constant 0.000000e+00 : f32
    %607 = vector.broadcast %cst_195 : f32 to vector<8x128xf32>
    %608 = arith.maximumf %606, %607 : vector<8x128xf32>
    %c0_196 = arith.constant 0 : index
    %c0_197 = arith.constant 0 : index
    %609 = vector.load %arg18[%c0_196, %c0_197] : memref<128x4xf32, #tpu.memory_space<vmem>>, vector<128x4xf32>
    %cst_198 = arith.constant dense<0.000000e+00> : vector<8x4xf32>
    %610 = tpu.matmul %608, %609, %cst_198 {dimension_numbers = #tpu.dot_dimension_numbers<[1], [0], [0], [1], [0, 0, 1, 1], [], []>} : vector<8x128xf32>, vector<128x4xf32>, vector<8x4xf32> -> vector<8x4xf32>
    %c0_199 = arith.constant 0 : index
    %c0_200 = arith.constant 0 : index
    %611 = vector.load %arg19[%c0_199, %c0_200] : memref<1x4xf32, #tpu.memory_space<vmem>>, vector<1x4xf32>
    %612 = vector.broadcast %611 : vector<1x4xf32> to vector<8x4xf32>
    %613 = arith.addf %610, %612 : vector<8x4xf32>
    %614 = arith.negf %613 : vector<8x4xf32>
    %615 = math.exp %614 : vector<8x4xf32>
    %cst_201 = arith.constant 1.000000e+00 : f32
    %616 = vector.broadcast %cst_201 : f32 to vector<8x4xf32>
    %617 = arith.addf %616, %615 : vector<8x4xf32>
    %618 = arith.divf %616, %617 : vector<8x4xf32>
    %c0_202 = arith.constant 0 : index
    %c0_203 = arith.constant 0 : index
    %619 = vector.load %arg20[%c0_202, %c0_203] : memref<8x4xf32, #tpu.memory_space<vmem>>, vector<8x4xf32>
    tpu.vector_store %arg20[%c0_202, %c0_203], %618 {strides = array<i32>} : memref<8x4xf32, #tpu.memory_space<vmem>>, vector<8x4xf32>,
    return
  }
  func.func @transform_0(%arg0: i32) -> (i32, i32, i32) {
    %c0_i32 = arith.constant 0 : i32
    %c0_i32_0 = arith.constant 0 : i32
    %c0_i32_1 = arith.constant 0 : i32
    return %c0_i32, %arg0, %c0_i32_0 : i32, i32, i32
  }
  func.func @transform_1(%arg0: i32) -> (i32, i32) {
    %c0_i32 = arith.constant 0 : i32
    %c0_i32_0 = arith.constant 0 : i32
    return %arg0, %c0_i32 : i32, i32
  }
  func.func @transform_2(%arg0: i32) -> (i32, i32) {
    %c0_i32 = arith.constant 0 : i32
    %c0_i32_0 = arith.constant 0 : i32
    return %arg0, %c0_i32 : i32, i32
  }
  func.func @transform_3(%arg0: i32) -> (i32, i32) {
    %c0_i32 = arith.constant 0 : i32
    %c0_i32_0 = arith.constant 0 : i32
    %c0_i32_1 = arith.constant 0 : i32
    return %c0_i32, %c0_i32_0 : i32, i32
  }
  func.func @transform_4(%arg0: i32) -> (i32, i32) {
    %c0_i32 = arith.constant 0 : i32
    %c0_i32_0 = arith.constant 0 : i32
    %c0_i32_1 = arith.constant 0 : i32
    return %c0_i32, %c0_i32_0 : i32, i32
  }
  func.func @transform_5(%arg0: i32) -> (i32, i32) {
    %c0_i32 = arith.constant 0 : i32
    %c0_i32_0 = arith.constant 0 : i32
    %c0_i32_1 = arith.constant 0 : i32
    return %c0_i32, %c0_i32_0 : i32, i32
  }
  func.func @transform_6(%arg0: i32) -> (i32, i32) {
    %c0_i32 = arith.constant 0 : i32
    %c0_i32_0 = arith.constant 0 : i32
    %c0_i32_1 = arith.constant 0 : i32
    return %c0_i32, %c0_i32_0 : i32, i32
  }
  func.func @transform_7(%arg0: i32) -> (i32, i32) {
    %c0_i32 = arith.constant 0 : i32
    %c0_i32_0 = arith.constant 0 : i32
    %c0_i32_1 = arith.constant 0 : i32
    return %c0_i32, %c0_i32_0 : i32, i32
  }
  func.func @transform_8(%arg0: i32) -> (i32, i32) {
    %c0_i32 = arith.constant 0 : i32
    %c0_i32_0 = arith.constant 0 : i32
    %c0_i32_1 = arith.constant 0 : i32
    return %c0_i32, %c0_i32_0 : i32, i32
  }
  func.func @transform_9(%arg0: i32) -> (i32, i32) {
    %c0_i32 = arith.constant 0 : i32
    %c0_i32_0 = arith.constant 0 : i32
    %c0_i32_1 = arith.constant 0 : i32
    return %c0_i32, %c0_i32_0 : i32, i32
  }
  func.func @transform_10(%arg0: i32) -> (i32, i32) {
    %c0_i32 = arith.constant 0 : i32
    %c0_i32_0 = arith.constant 0 : i32
    %c0_i32_1 = arith.constant 0 : i32
    return %c0_i32, %c0_i32_0 : i32, i32
  }
  func.func @transform_11(%arg0: i32) -> (i32, i32) {
    %c0_i32 = arith.constant 0 : i32
    %c0_i32_0 = arith.constant 0 : i32
    %c0_i32_1 = arith.constant 0 : i32
    return %c0_i32, %c0_i32_0 : i32, i32
  }
  func.func @transform_12(%arg0: i32) -> (i32, i32) {
    %c0_i32 = arith.constant 0 : i32
    %c0_i32_0 = arith.constant 0 : i32
    %c0_i32_1 = arith.constant 0 : i32
    return %c0_i32, %c0_i32_0 : i32, i32
  }
  func.func @transform_13(%arg0: i32) -> (i32, i32) {
    %c0_i32 = arith.constant 0 : i32
    %c0_i32_0 = arith.constant 0 : i32
    %c0_i32_1 = arith.constant 0 : i32
    return %c0_i32, %c0_i32_0 : i32, i32
  }
  func.func @transform_14(%arg0: i32) -> (i32, i32) {
    %c0_i32 = arith.constant 0 : i32
    %c0_i32_0 = arith.constant 0 : i32
    %c0_i32_1 = arith.constant 0 : i32
    return %c0_i32, %c0_i32_0 : i32, i32
  }
  func.func @transform_15(%arg0: i32) -> (i32, i32) {
    %c0_i32 = arith.constant 0 : i32
    %c0_i32_0 = arith.constant 0 : i32
    %c0_i32_1 = arith.constant 0 : i32
    return %c0_i32, %c0_i32_0 : i32, i32
  }
  func.func @transform_16(%arg0: i32) -> (i32, i32) {
    %c0_i32 = arith.constant 0 : i32
    %c0_i32_0 = arith.constant 0 : i32
    %c0_i32_1 = arith.constant 0 : i32
    return %c0_i32, %c0_i32_0 : i32, i32
  }
  func.func @transform_17(%arg0: i32) -> (i32, i32) {
    %c0_i32 = arith.constant 0 : i32
    %c0_i32_0 = arith.constant 0 : i32
    %c0_i32_1 = arith.constant 0 : i32
    return %c0_i32, %c0_i32_0 : i32, i32
  }
  func.func @transform_18(%arg0: i32) -> (i32, i32) {
    %c0_i32 = arith.constant 0 : i32
    %c0_i32_0 = arith.constant 0 : i32
    %c0_i32_1 = arith.constant 0 : i32
    return %c0_i32, %c0_i32_0 : i32, i32
  }
  func.func @transform_19(%arg0: i32) -> (i32, i32) {
    %c0_i32 = arith.constant 0 : i32
    %c0_i32_0 = arith.constant 0 : i32
    return %arg0, %c0_i32 : i32, i32
  }
}

</mosaic_0001>

<bundles_post_ra>
// kernel: tpu_custom_call.1
= control target key start
LH: loop header
LB: loop body
LE: loop exit
PB: predicated region body
PF: predicated region fallthrough
CT: control target
= control target key end

     0   :  { %s9180_s0 = inlined_call_operand.vmem [shape: f32[8,8,128], index: 0, kind: input, shape index: {}]   ;;  %s9181_s1 = inlined_call_operand.vmem [shape: f32[8,128], index: 1, kind: input, shape index: {}]   ;;  %s9182_s2 = inlined_call_operand.hbm [shape: f32[8,128], index: 2, kind: input, shape index: {}]   ;;  %s9183_s3 = inlined_call_operand.vmem [shape: f32[128,384], index: 3, kind: input, shape index: {}]   ;;  %s9184_s4 = inlined_call_operand.vmem [shape: f32[128,384], index: 4, kind: input, shape index: {}]   ;;  %s9185_s5 = inlined_call_operand.vmem [shape: f32[1,384], index: 5, kind: input, shape index: {}]   ;;  %s9186_s6 = inlined_call_operand.vmem [shape: f32[128,384], index: 6, kind: input, shape index: {}]   ;;  %s9187_s7 = inlined_call_operand.vmem [shape: f32[128,384], index: 7, kind: input, shape index: {}]   ;;  %s9188_s8 = inlined_call_operand.vmem [shape: f32[1,384], index: 8, kind: input, shape index: {}]   ;;  %s9189_s9 = inlined_call_operand.vmem [shape: f32[128,4], index: 9, kind: input, shape index: {}]   ;;  %s9190_s10 = inlined_call_operand.vmem [shape: f32[4,128], index: 10, kind: input, shape index: {}]   ;;  %s9191_s11 = inlined_call_operand.vmem [shape: f32[128,192], index: 11, kind: input, shape index: {}]   ;;  %s9192_s12 = inlined_call_operand.vmem [shape: f32[128,192], index: 12, kind: input, shape index: {}]   ;;  %s9193_s13 = inlined_call_operand.vmem [shape: f32[128,192], index: 13, kind: input, shape index: {}]   ;;  %s9194_s14 = inlined_call_operand.vmem [shape: f32[1,192], index: 14, kind: input, shape index: {}]   ;;  %s9195_s15 = inlined_call_operand.hbm [shape: f32[192,128], index: 15, kind: input, shape index: {}]   ;;  %s9196_s16 = inlined_call_operand.vmem [shape: f32[1,128], index: 16, kind: input, shape index: {}]   ;;  %s9197_s17 = inlined_call_operand.vmem [shape: f32[128,4], index: 17, kind: input, shape index: {}]   ;;  %s9198_s18 = inlined_call_operand.vmem [shape: f32[1,4], index: 18, kind: input, shape index: {}]   ;;  %s9199_s19 = inlined_call_operand.vmem [shape: f32[8,4], index: 19, kind: output, shape index: {}]  }
   0x1   :  { %9204 = sst [smem:[#allocation11_spill]] %s9180_s0 }
   0x2   :  { %9205 = sst [smem:[#allocation12_spill]] %s9181_s1 }
   0x3   :  { %9206 = sst [smem:[#allocation13_spill]] %s9182_s2 }
   0x4   :  { %9207 = sst [smem:[#allocation14_spill]] %s9183_s3 }
   0x5   :  { %24 = vsyncpa [#allocation6], 0 }
   0x6   :  { %25 = vsyncpa [#allocation8], 0  ;;  %s7049_s0 = smov [#allocation5]   ;;  %s7050_s20 = smov [#allocation7]  }
   0x7   :  { %s36_s30 = sshll.u32 %s7049_s0, 4  ;;  %s69_s21 = sshll.u32 %s7050_s20, 4  ;;  %s37_s30 = int_to_ptr.vmem [resolvable:$true] %s36_s30  ;;  %s7156_s21 = int_to_ptr.vmem [resolvable:$true] %s69_s21 }
   0x8   :  { %s9208_s2 = sld [smem:[#allocation13_spill]] }
   0xe   :  { %s7001_s23 = scalar_lea.hbm %s9208_s2, 128 }
   0xf   :  { %p7002_p0 = scmp.ne.s32.totalorder %s9208_s2, %s7001_s23  ;;  %p7005_p1 = scmp.lt.u32.totalorder %s7001_s23, %s9208_s2 }
  0x11   :  { %p7007_p2 = pnand %p7005_p1, %p7002_p0 }
  0x13   :  { %7010 = shalt.err (!%p7007_p2)
}
  0x14   :  { %s7011_s27 = scalar_lea.vmem %s37_s30, 128  ;;  %p7016_p4 = scmp.lt.s32.totalorder %s37_s30, %s37_s30 }
  0x15   :  { %p7012_p3 = scmp.ne.s32.totalorder %s37_s30, %s7011_s27  ;;  %p7017_p5 = scmp.lt.s32.totalorder %s7011_s27, %s7011_s27 }
  0x17   :  { %p7018_p6 = por %p7017_p5, %p7016_p4 }
  0x19   :  { %p7019_p7 = pnand %p7018_p6, %p7012_p3 }
  0x1b   :  { %7022 = shalt.err (!%p7019_p7)
}
  0x1c   :  { %39 = dma.hbm_to_vmem [thread:$0]  %s9208_s2, 128, %s37_s30, [#allocation6]  }
  0x1d   :  { %s7023_s1 = scalar_lea.hbm %s9195_s15, 3072 }
  0x1e   :  { %p7024_p8 = scmp.ne.s32.totalorder %s9195_s15, %s7023_s1  ;;  %p7027_p9 = scmp.lt.u32.totalorder %s7023_s1, %s9195_s15 }
  0x20   :  { %p7029_p10 = pnand %p7027_p9, %p7024_p8 }
  0x22   :  { %7032 = shalt.err (!%p7029_p10)
}
  0x23   :  { %s7033_s3 = scalar_lea.vmem %s7156_s21, 3072  ;;  %p7038_p12 = scmp.lt.s32.totalorder %s7156_s21, %s7156_s21 }
  0x24   :  { %p7034_p11 = scmp.ne.s32.totalorder %s7156_s21, %s7033_s3  ;;  %p7039_p13 = scmp.lt.s32.totalorder %s7033_s3, %s7033_s3 }
  0x26   :  { %p7040_p0 = por %p7039_p13, %p7038_p12 }
  0x28   :  { %p7041_p1 = pnand %p7040_p0, %p7034_p11 }
  0x2a   :  { %7044 = shalt.err (!%p7041_p1)
}
  0x2b   :  { %s7051_s30 = smov 128   ;;  %s7052_s2 = smov 8  }
  0x2c   :  { %75 = dma.hbm_to_vmem [thread:$0]  %s9195_s15, 3072, %s7156_s21, [#allocation8], %s7051_s30, %s7051_s30, %s7052_s2  }
  0x2d   :  { %7045 = dma.done.wait [#allocation6], 128  }
  0x2e   :  { %7046 = vsyncadd [#allocation6], 4294967168 }
  0x2f   :  { %7047 = dma.done.wait [#allocation8], 3072  }
  0x30   :  { %7048 = vsyncadd [#allocation8], 4294964224  ;;  %v7053_v0 = vmov 0.0   ;;  %s9209_s0 = sld [smem:[#allocation14_spill]]  ;;  %s9210_s24 = sld [smem:[#allocation11_spill]]  ;;  %vm7055_vm0 = vmmov 0  }
  0x31   :  { %226 = vmatprep.mubr.f32.mxu0 %v7053_v0  ;;  %s9211_s30 = sld [smem:[#allocation12_spill]]  ;;  %vm1931_vm1 = vcmask 31744   ;;  %vm2020_vm2 = vcmask 1043456   ;;  %vm4194_vm3 = vcmask 523264  }
  0x36   :  { %v98_v1 = vld [vmem:[%s9209_s0 + $0x8] sm:$0xff]  ;;  %v101_v2 = vld [vmem:[%s9209_s0 + $0x20] sm:$0xff]  ;;  %v100_v5 = vld [vmem:[%s9209_s0 + $0x18] sm:$0xff] }
  0x37   :  { %v97_v3 = vld [vmem:[%s9209_s0] sm:$0xff]  ;;  %v5531_v4 = vpack.c.bf16 %v101_v2, %v98_v1  ;;  %v104_v6 = vld [vmem:[%s9209_s0 + $0x38] sm:$0xff]  ;;  %v107_v7 = vld [vmem:[%s9209_s0 + $0x50] sm:$0xff] }
  0x38   :  { %v5533_v8 = vpack.c.bf16 %v100_v5, %v97_v3  ;;  %v5535_v9 = vpack.c.bf16 %v107_v7, %v104_v6  ;;  %v103_v10 = vld [vmem:[%s9209_s0 + $0x30] sm:$0xff]  ;;  %v106_v11 = vld [vmem:[%s9209_s0 + $0x48] sm:$0xff]  ;;  %v113_v13 = vld [vmem:[%s9209_s0 + $0x80] sm:$0xff] }
  0x39   :  { %v110_v12 = vld [vmem:[%s9209_s0 + $0x68] sm:$0xff]  ;;  %5532 = vmatprep.subr.bf16.mxu0 %v5531_v4  ;;  %v5537_v14 = vpack.c.bf16 %v106_v11, %v103_v10  ;;  %v109_v16 = vld [vmem:[%s9209_s0 + $0x60] sm:$0xff]  ;;  %v112_v17 = vld [vmem:[%s9209_s0 + $0x78] sm:$0xff] }
  0x3a   :  { %5534 = vmatpush1.bf16.msra.mxu0 %v5533_v8  ;;  %v5539_v15 = vpack.c.bf16 %v113_v13, %v110_v12  ;;  %v116_v18 = vld [vmem:[%s9209_s0 + $0x98] sm:$0xff]  ;;  %v119_v19 = vld [vmem:[%s9209_s0 + $0xb0] sm:$0xff]  ;;  %v5541_v20 = vpack.c.bf16 %v112_v17, %v109_v16  ;;  %v118_v23 = vld [vmem:[%s9209_s0 + $0xa8] sm:$0xff] }
  0x3b   :  { %5536 = vmatprep.subr.bf16.mxu0 %v5535_v9  ;;  %v115_v21 = vld [vmem:[%s9209_s0 + $0x90] sm:$0xff]  ;;  %v5543_v22 = vpack.c.bf16 %v119_v19, %v116_v18  ;;  %v102_v25 = vld [vmem:[%s9209_s0 + $0x28] sm:$0xff]  ;;  %v125_v27 = vld [vmem:[%s9209_s0 + $0xe0] sm:$0xff] }
  0x3c   :  { %v99_v24 = vld [vmem:[%s9209_s0 + $0x10] sm:$0xff]  ;;  %v122_v26 = vld [vmem:[%s9209_s0 + $0xc8] sm:$0xff]  ;;  %v105_v29 = vld [vmem:[%s9209_s0 + $0x40] sm:$0xff]  ;;  %v5545_v31 = vpack.c.bf16 %v118_v23, %v115_v21 }
  0x3d   :  { %v5563_v28 = vpack.c.bf16 %v102_v25, %v99_v24  ;;  %v108_v30 = vld [vmem:[%s9209_s0 + $0x58] sm:$0xff]  ;;  %v121_v32 = vld [vmem:[%s9209_s0 + $0xc0] sm:$0xff]  ;;  %v5547_v34 = vpack.c.bf16 %v125_v27, %v122_v26  ;;  %v111_v37 = vld [vmem:[%s9209_s0 + $0x70] sm:$0xff] }
  0x3e   :  { %5538 = vmatpush1.bf16.msra.mxu0 %v5537_v14  ;;  %v5567_v33 = vpack.c.bf16 %v108_v30, %v105_v29  ;;  %v124_v35 = vld [vmem:[%s9209_s0 + $0xd8] sm:$0xff]  ;;  %v7263_v36 = vld [vmem:[%s9210_s24] sm:$0xff]  ;;  %v131_v39 = vld [vmem:[%s9209_s0 + $0x110] sm:$0xff] }
  0x3f   :  { %5540 = vmatprep.subr.bf16.mxu0 %v5539_v15  ;;  %5564 = vmatprep.subr.bf16.mxu1 %v5563_v28  ;;  %v128_v38 = vld [vmem:[%s9209_s0 + $0xf8] sm:$0xff]  ;;  %v114_v40 = vld [vmem:[%s9209_s0 + $0x88] sm:$0xff]  ;;  %v5549_v42 = vpack.c.bf16 %v124_v35, %v121_v32  ;;  %v117_v43 = vld [vmem:[%s9209_s0 + $0xa0] sm:$0xff] }
  0x40   :  { %5566 = vmatpush3.bf16.msra.mxu1 %v5563_v28  ;;  %4822 = vmatprep.mubr.f32.mxu1 %v7263_v36  ;;  %v5571_v41 = vpack.c.bf16 %v114_v40, %v111_v37  ;;  %v120_v44 = vld [vmem:[%s9209_s0 + $0xb8] sm:$0xff]  ;;  %v5551_v45 = vpack.c.bf16 %v131_v39, %v128_v38  ;;  %v127_v46 = vld [vmem:[%s9209_s0 + $0xf0] sm:$0xff]  ;;  %v130_v47 = vld [vmem:[%s9209_s0 + $0x108] sm:$0xff]  ;;  %v7054_v40 = vmov 0.0|0.0  }
  0x41   :  { %5568 = vmatprep.subr.bf16.mxu1 %v5567_v33  ;;  %v134_v48 = vld [vmem:[%s9209_s0 + $0x128] sm:$0xff]  ;;  %v137_v49 = vld [vmem:[%s9209_s0 + $0x140] sm:$0xff]  ;;  %v5575_v50 = vpack.c.bf16 %v120_v44, %v117_v43  ;;  %v123_v51 = vld [vmem:[%s9209_s0 + $0xd0] sm:$0xff]  ;;  %v5553_v53 = vpack.c.bf16 %v130_v47, %v127_v46 }
  0x42   :  { %5542 = vmatpush1.bf16.msra.mxu0 %v5541_v20  ;;  %v126_v52 = vld [vmem:[%s9209_s0 + $0xe8] sm:$0xff]  ;;  %v5555_v54 = vpack.c.bf16 %v137_v49, %v134_v48  ;;  %v133_v55 = vld [vmem:[%s9209_s0 + $0x120] sm:$0xff]  ;;  %v136_v56 = vld [vmem:[%s9209_s0 + $0x138] sm:$0xff] }
  0x43   :  { %5544 = vmatprep.subr.bf16.mxu0 %v5543_v22  ;;  %v140_v57 = vld [vmem:[%s9209_s0 + $0x158] sm:$0xff]  ;;  %v143_v58 = vld [vmem:[%s9209_s0 + $0x170] sm:$0xff]  ;;  %v5579_v59 = vpack.c.bf16 %v126_v52, %v123_v51  ;;  %v129_v60 = vld [vmem:[%s9209_s0 + $0x100] sm:$0xff]  ;;  %v5557_v62 = vpack.c.bf16 %v136_v56, %v133_v55 }
  0x44   :  { %5570 = vmatpush3.bf16.msra.mxu1 %v5567_v33  ;;  %v132_v61 = vld [vmem:[%s9209_s0 + $0x118] sm:$0xff]  ;;  %v5559_v63 = vpack.c.bf16 %v143_v58, %v140_v57  ;;  %v139_v1 = vld [vmem:[%s9209_s0 + $0x150] sm:$0xff]  ;;  %v142_v2 = vld [vmem:[%s9209_s0 + $0x168] sm:$0xff] }
  0x45   :  { %5572 = vmatprep.subr.bf16.mxu1 %v5571_v41  ;;  %v405_v3 = vld [vmem:[%s9184_s4 + $0x8] sm:$0xff]  ;;  %v408_v4 = vld [vmem:[%s9184_s4 + $0x20] sm:$0xff]  ;;  %v5583_v5 = vpack.c.bf16 %v132_v61, %v129_v60  ;;  %v135_v6 = vld [vmem:[%s9209_s0 + $0x130] sm:$0xff]  ;;  %v5561_v8 = vpack.c.bf16 %v142_v2, %v139_v1 }
  0x46   :  { %5546 = vmatpush1.bf16.msra.mxu0 %v5545_v31  ;;  %v138_v7 = vld [vmem:[%s9209_s0 + $0x148] sm:$0xff]  ;;  %v7338_v9 = vpack.c.bf16 %v408_v4, %v405_v3  ;;  %v404_v10 = vld [vmem:[%s9184_s4] sm:$0xff]  ;;  %v407_v11 = vld [vmem:[%s9184_s4 + $0x18] sm:$0xff] }
  0x47   :  { %5548 = vmatprep.subr.bf16.mxu0 %v5547_v34  ;;  %v411_v12 = vld [vmem:[%s9184_s4 + $0x38] sm:$0xff]  ;;  %v414_v13 = vld [vmem:[%s9184_s4 + $0x50] sm:$0xff]  ;;  %v5587_v14 = vpack.c.bf16 %v138_v7, %v135_v6  ;;  %v141_v15 = vld [vmem:[%s9209_s0 + $0x160] sm:$0xff]  ;;  %v7358_v17 = vpack.c.bf16 %v407_v11, %v404_v10 }
  0x48   :  { %5574 = vmatpush3.bf16.msra.mxu1 %v5571_v41  ;;  %v144_v16 = vld [vmem:[%s9209_s0 + $0x178] sm:$0xff]  ;;  %v7361_v18 = vpack.c.bf16 %v414_v13, %v411_v12  ;;  %v410_v19 = vld [vmem:[%s9184_s4 + $0x30] sm:$0xff]  ;;  %v413_v20 = vld [vmem:[%s9184_s4 + $0x48] sm:$0xff] }
  0x49   :  { %5576 = vmatprep.subr.bf16.mxu1 %v5575_v50  ;;  %v417_v21 = vld [vmem:[%s9184_s4 + $0x68] sm:$0xff]  ;;  %v420_v22 = vld [vmem:[%s9184_s4 + $0x80] sm:$0xff]  ;;  %v5591_v23 = vpack.c.bf16 %v144_v16, %v141_v15  ;;  %v7381_v25 = vpack.c.bf16 %v413_v20, %v410_v19  ;;  %v419_v28 = vld [vmem:[%s9184_s4 + $0x78] sm:$0xff] }
  0x4a   :  { %5550 = vmatpush1.bf16.msra.mxu0 %v5549_v42  ;;  %v90_v24 = vld [vmem:[%s9210_s24 + $0x8] sm:$0xff]  ;;  %v7384_v26 = vpack.c.bf16 %v420_v22, %v417_v21  ;;  %v416_v27 = vld [vmem:[%s9184_s4 + $0x60] sm:$0xff]  ;;  %v423_v29 = vld [vmem:[%s9184_s4 + $0x98] sm:$0xff] }
  0x4b   :  { %5552 = vmatprep.subr.bf16.mxu0 %v5551_v45  ;;  %v426_v30 = vld [vmem:[%s9184_s4 + $0xb0] sm:$0xff]  ;;  %v409_v32 = vld [vmem:[%s9184_s4 + $0x28] sm:$0xff]  ;;  %v7409_v34 = vpack.c.bf16 %v419_v28, %v416_v27  ;;  %v432_v39 = vld [vmem:[%s9184_s4 + $0xe0] sm:$0xff] }
  0x4c   :  { %5578 = vmatpush3.bf16.msra.mxu1 %v5575_v50  ;;  %v406_v31 = vld [vmem:[%s9184_s4 + $0x10] sm:$0xff]  ;;  %v7412_v35 = vpack.c.bf16 %v426_v30, %v423_v29  ;;  %v425_v37 = vld [vmem:[%s9184_s4 + $0xa8] sm:$0xff]  ;;  %v412_v42 = vld [vmem:[%s9184_s4 + $0x40] sm:$0xff] }
  0x4d   :  { %5580 = vmatprep.subr.bf16.mxu1 %v5579_v59  ;;  %v91_v33 = vld [vmem:[%s9210_s24 + $0x10] sm:$0xff]  ;;  %v429_v38 = vld [vmem:[%s9184_s4 + $0xc8] sm:$0xff]  ;;  %v7427_v41 = vpack.c.bf16 %v409_v32, %v406_v31  ;;  %v415_v43 = vld [vmem:[%s9184_s4 + $0x58] sm:$0xff] }
  0x4e   :  { %5554 = vmatpush1.bf16.msra.mxu0 %v5553_v53  ;;  %v92_v44 = vld [vmem:[%s9210_s24 + $0x18] sm:$0xff]  ;;  %v7443_v46 = vpack.c.bf16 %v432_v39, %v429_v38  ;;  %v428_v47 = vld [vmem:[%s9184_s4 + $0xc0] sm:$0xff]  ;;  %v438_v50 = vld [vmem:[%s9184_s4 + $0x110] sm:$0xff]  ;;  %v7458_v51 = vpack.c.bf16 %v415_v43, %v412_v42 }
  0x4f   :  { %5556 = vmatprep.subr.bf16.mxu0 %v5555_v54  ;;  %v431_v48 = vld [vmem:[%s9184_s4 + $0xd8] sm:$0xff]  ;;  %v418_v52 = vld [vmem:[%s9184_s4 + $0x70] sm:$0xff]  ;;  %v421_v53 = vld [vmem:[%s9184_s4 + $0x88] sm:$0xff] }
  0x50   :  { %5582 = vmatpush3.bf16.msra.mxu1 %v5579_v59  ;;  %v435_v49 = vld [vmem:[%s9184_s4 + $0xf8] sm:$0xff]  ;;  %v93_v54 = vld [vmem:[%s9210_s24 + $0x20] sm:$0xff]  ;;  %v7472_v55 = vpack.c.bf16 %v431_v48, %v428_v47  ;;  %v434_v57 = vld [vmem:[%s9184_s4 + $0xf0] sm:$0xff]  ;;  %v7490_v61 = vpack.c.bf16 %v421_v53, %v418_v52 }
  0x51   :  { %5584 = vmatprep.subr.bf16.mxu1 %v5583_v5  ;;  %v7475_v56 = vpack.c.bf16 %v438_v50, %v435_v49  ;;  %v437_v58 = vld [vmem:[%s9184_s4 + $0x108] sm:$0xff]  ;;  %v444_v60 = vld [vmem:[%s9184_s4 + $0x140] sm:$0xff]  ;;  %v95_v3 = vld [vmem:[%s9210_s24 + $0x30] sm:$0xff] }
  0x52   :  { %5558 = vmatpush1.bf16.msra.mxu0 %v5557_v62  ;;  %v441_v59 = vld [vmem:[%s9184_s4 + $0x128] sm:$0xff]  ;;  %v424_v62 = vld [vmem:[%s9184_s4 + $0xa0] sm:$0xff]  ;;  %v7504_v2 = vpack.c.bf16 %v437_v58, %v434_v57  ;;  %v443_v6 = vld [vmem:[%s9184_s4 + $0x138] sm:$0xff] }
  0x53   :  { %5560 = vmatprep.subr.bf16.mxu0 %v5559_v63  ;;  %v427_v63 = vld [vmem:[%s9184_s4 + $0xb8] sm:$0xff]  ;;  %v94_v1 = vld [vmem:[%s9210_s24 + $0x28] sm:$0xff]  ;;  %v7510_v4 = vpack.c.bf16 %v444_v60, %v441_v59  ;;  %v430_v11 = vld [vmem:[%s9184_s4 + $0xd0] sm:$0xff] }
  0x54   :  { %5586 = vmatpush3.bf16.msra.mxu1 %v5583_v5  ;;  %v440_v5 = vld [vmem:[%s9184_s4 + $0x120] sm:$0xff]  ;;  %v447_v7 = vld [vmem:[%s9184_s4 + $0x158] sm:$0xff]  ;;  %v7525_v10 = vpack.c.bf16 %v427_v63, %v424_v62  ;;  %v433_v12 = vld [vmem:[%s9184_s4 + $0xe8] sm:$0xff] }
  0x55   :  { %5588 = vmatprep.subr.bf16.mxu1 %v5587_v14  ;;  %v7536_v13 = vpack.c.bf16 %v443_v6, %v440_v5  ;;  %v446_v16 = vld [vmem:[%s9184_s4 + $0x150] sm:$0xff]  ;;  %v449_v19 = vld [vmem:[%s9184_s4 + $0x168] sm:$0xff]  ;;  %v7551_v20 = vpack.c.bf16 %v433_v12, %v430_v11  ;;  %v436_v21 = vld [vmem:[%s9184_s4 + $0x100] sm:$0xff] }
  0x56   :  { %5562 = vmatpush1.bf16.msra.mxu0 %v5561_v8  ;;  %v450_v8 = vld [vmem:[%s9184_s4 + $0x170] sm:$0xff]  ;;  %v439_v22 = vld [vmem:[%s9184_s4 + $0x118] sm:$0xff]  ;;  %v445_v28 = vld [vmem:[%s9184_s4 + $0x148] sm:$0xff] }
  0x57   :  { %5596 = vmatprep.subr.bf16.mxu0 %v7338_v9  ;;  %v7542_v15 = vpack.c.bf16 %v450_v8, %v447_v7  ;;  %v442_v27 = vld [vmem:[%s9184_s4 + $0x130] sm:$0xff]  ;;  %v448_v30 = vld [vmem:[%s9184_s4 + $0x160] sm:$0xff]  ;;  %v451_v31 = vld [vmem:[%s9184_s4 + $0x178] sm:$0xff] }
  0x58   :  { %5590 = vmatpush3.bf16.msra.mxu1 %v5587_v14  ;;  %v96_v14 = vld [vmem:[%s9210_s24 + $0x38] sm:$0xff]  ;;  %v7581_v29 = vpack.c.bf16 %v445_v28, %v442_v27  ;;  %v7595_v32 = vpack.c.bf16 %v451_v31, %v448_v30  ;;  %v145_v38 = vld [vmem:[%s9185_s5] sm:$0x7] }
  0x59   :  { %227 = vmatmul.mubr.f32.vlgmr.msra.gmra.mrb[0].mxu0 %v7263_v36  ;;  %5592 = vmatprep.subr.bf16.mxu1 %v5591_v23  ;;  %v422_v36 = vld [vmem:[%s9184_s4 + $0x90] sm:$0xff] }
  0x5a   :  { %5598 = vmatpush1.bf16.msra.mxu0 %v7358_v17  ;;  %232 = vmatprep.mubr.f32.mxu0 %v7053_v0  ;;  %v7440_v45 = vpack.c.bf16 %v425_v37, %v422_v36 }
  0x5b   :  { %5600 = vmatprep.subr.bf16.mxu0 %v7361_v18 }
  0x5c   :  { %5594 = vmatpush3.bf16.msra.mxu1 %v5591_v23  ;;  %v7564_v23 = vpack.c.bf16 %v449_v19, %v446_v16 }
  0x5d   :  { %233 = vmatmul.mubr.f32.gmra.mrb[2].mxu0 %v90_v24  ;;  %5627 = vmatprep.subr.bf16.mxu1 %v7054_v40 }
  0x5e   :  { %5602 = vmatpush1.bf16.msra.mxu0 %v7381_v25  ;;  %238 = vmatprep.mubr.f32.mxu0 %v7053_v0 }
  0x5f   :  { %5604 = vmatprep.subr.bf16.mxu0 %v7384_v26  ;;  %4823 = vmatmul.mubr.f32.vlgmr.msra.gmra.mrb[0].mxu1 %v90_v24  ;;  %v7568_v24 = vpack.c.bf16 %v439_v22, %v436_v21 }
  0x60   :  { %5629 = vmatpush3.bf16.msra.mxu1 %v7427_v41  ;;  %4825 = vmatprep.mubr.f32.mxu1 %v91_v33 }
  0x61   :  { %239 = vmatmul.mubr.f32.gmra.mrb[4].mxu0 %v91_v33  ;;  %5630 = vmatprep.subr.bf16.mxu1 %v7054_v40  ;;  %v147_v33 = vlaneseq }
  0x62   :  { %5606 = vmatpush1.bf16.msra.mxu0 %v7409_v34  ;;  %244 = vmatprep.mubr.f32.mxu0 %v7053_v0 }
  0x63   :  { %5608 = vmatprep.subr.bf16.mxu0 %v7412_v35  ;;  %4826 = vmatmul.mubr.f32.gmra.mrb[2].mxu1 %v92_v44  ;;  %v7633_v36 = vshrl.u32 %v147_v33, 7 }
  0x64   :  { %5632 = vmatpush3.bf16.msra.mxu1 %v7458_v51  ;;  %4828 = vmatprep.mubr.f32.mxu1 %v93_v54 }
  0x65   :  { %245 = vmatmul.mubr.f32.gmra.mrb[6].mxu0 %v92_v44  ;;  %5633 = vmatprep.subr.bf16.mxu1 %v7054_v40  ;;  %v157_v37 = vsub.s32 2, %v7633_v36  ;;  %v7656_v63 = vsub.s32 0, %v7633_v36 }
  0x66   :  { %5610 = vmatpush1.bf16.msra.mxu0 %v7440_v45  ;;  %250 = vmatprep.mubr.f32.mxu0 %v7053_v0 }
  0x67   :  { %5612 = vmatprep.subr.bf16.mxu0 %v7443_v46  ;;  %4829 = vmatmul.mubr.f32.gmra.mrb[4].mxu1 %v94_v1  ;;  %v158_v39 = vrot.slane %v145_v38, %v157_v37 }
  0x68   :  { %5635 = vmatpush3.bf16.msra.mxu1 %v7490_v61  ;;  %4831 = vmatprep.mubr.f32.mxu1 %v95_v3 }
  0x69   :  { %251 = vmatmul.mubr.f32.gmra.mrb[8].mxu0 %v93_v54  ;;  %5636 = vmatprep.subr.bf16.mxu1 %v7054_v40 }
  0x6a   :  { %5614 = vmatpush1.bf16.msra.mxu0 %v7472_v55  ;;  %256 = vmatprep.mubr.f32.mxu0 %v7053_v0 }
  0x6b   :  { %5616 = vmatprep.subr.bf16.mxu0 %v7475_v56  ;;  %4832 = vmatmul.mubr.f32.gmra.mrb[6].mxu1 %v96_v14 }
  0x6c   :  { %5638 = vmatpush3.bf16.msra.mxu1 %v7525_v10  ;;  %4866 = vmatprep.mubr.msk.f32.mxu1 %vm7055_vm0, %v7053_v0 }
  0x6d   :  { %257 = vmatmul.mubr.f32.gmra.mrb[10].mxu0 %v94_v1  ;;  %5639 = vmatprep.subr.bf16.mxu1 %v7054_v40  ;;  %v7659_v1 = vsub.s32 1, %v7633_v36  ;;  %v2476_v36 = vld [vmem:[%s9187_s7 + $0x100] sm:$0xff] }
  0x6e   :  { %5618 = vmatpush1.bf16.msra.mxu0 %v7504_v2  ;;  %262 = vmatprep.mubr.f32.mxu0 %v7053_v0 }
  0x6f   :  { %5620 = vmatprep.subr.bf16.mxu0 %v7510_v4  ;;  %v7665_v5 = vrot.slane %v145_v38, %v7659_v1 }
  0x70   :  { %5641 = vmatpush3.bf16.msra.mxu1 %v7551_v20 }
  0x71   :  { %263 = vmatmul.mubr.f32.gmra.mrb[12].mxu0 %v95_v3  ;;  %5642 = vmatprep.subr.bf16.mxu1 %v7054_v40  ;;  %v7662_v3 = vrot.slane %v145_v38, %v7656_v63 }
  0x72   :  { %5622 = vmatpush1.bf16.msra.mxu0 %v7536_v13  ;;  %268 = vmatprep.mubr.f32.mxu0 %v7053_v0 }
  0x73   :  { %5624 = vmatprep.subr.bf16.mxu0 %v7542_v15 }
  0x74   :  { %5644 = vmatpush3.bf16.msra.mxu1 %v7568_v24 }
  0x75   :  { %269 = vmatmul.mubr.f32.gmra.mrb[14].mxu0 %v96_v14  ;;  %5645 = vmatprep.subr.bf16.mxu1 %v7054_v40 }
  0x76   :  { %5626 = vmatpush1.bf16.msra.mxu0 %v7564_v23  ;;  %516 = vmatprep.mubr.f32.mxu0 %v7053_v0 }
  0x77   :  { %5652 = vmatprep.subr.bf16.mxu0 %v7338_v9 }
  0x78   :  { %5647 = vmatpush3.bf16.msra.mxu1 %v7581_v29 }
  0x79   :  { %517 = vmatmul.mubr.f32.vlgmr.msra.gmra.mrb[0].mxu0 %v7053_v0  ;;  %5648 = vmatprep.subr.bf16.mxu1 %v7054_v40 }
  0x7a   :  { %5654 = vmatpush1.bf16.msra.mxu0 %v7358_v17  ;;  %682 = vmatprep.mubr.f32.mxu0 %v7053_v0 }
  0x7b   :  { %5656 = vmatprep.subr.bf16.mxu0 %v7361_v18 }
  0x7c   :  { %5650 = vmatpush3.bf16.msra.mxu1 %v7595_v32 }
  0x7d   :  { %5683 = vmatprep.subr.bf16.mxu1 %v7054_v40 }
  0x7e   :  { %5658 = vmatpush1.bf16.msra.mxu0 %v7381_v25 }
  0x7f   :  { %5660 = vmatprep.subr.bf16.mxu0 %v7384_v26  ;;  %4867 = vmatmul.mubr.f32.vlgmr.msra.gmra.mrb[8].mxu1 %v7053_v0 }
  0x80   :  { %5685 = vmatpush3.bf16.msra.mxu1 %v7427_v41  ;;  %4901 = vmatprep.mubr.msk.f32.mxu1 %vm7055_vm0, %v7053_v0 }
  0x81   :  { %5686 = vmatprep.subr.bf16.mxu1 %v7054_v40 }
  0x82   :  { %5662 = vmatpush1.bf16.msra.mxu0 %v7409_v34 }
  0x83   :  { %5664 = vmatprep.subr.bf16.mxu0 %v7412_v35 }
  0x84   :  { %5688 = vmatpush3.bf16.msra.mxu1 %v7458_v51 }
  0x85   :  { %5689 = vmatprep.subr.bf16.mxu1 %v7054_v40 }
  0x86   :  { %5666 = vmatpush1.bf16.msra.mxu0 %v7440_v45 }
  0x87   :  { %5668 = vmatprep.subr.bf16.mxu0 %v7443_v46 }
  0x88   :  { %5691 = vmatpush3.bf16.msra.mxu1 %v7490_v61 }
  0x89   :  { %5692 = vmatprep.subr.bf16.mxu1 %v7054_v40 }
  0x8a   :  { %5670 = vmatpush1.bf16.msra.mxu0 %v7472_v55 }
  0x8b   :  { %5672 = vmatprep.subr.bf16.mxu0 %v7475_v56 }
  0x8c   :  { %5694 = vmatpush3.bf16.msra.mxu1 %v7525_v10 }
  0x8d   :  { %5695 = vmatprep.subr.bf16.mxu1 %v7054_v40 }
  0x8e   :  { %5674 = vmatpush1.bf16.msra.mxu0 %v7504_v2 }
  0x8f   :  { %5676 = vmatprep.subr.bf16.mxu0 %v7510_v4 }
  0x90   :  { %5697 = vmatpush3.bf16.msra.mxu1 %v7551_v20 }
  0x91   :  { %5698 = vmatprep.subr.bf16.mxu1 %v7054_v40 }
  0x92   :  { %5678 = vmatpush1.bf16.msra.mxu0 %v7536_v13 }
  0x93   :  { %5680 = vmatprep.subr.bf16.mxu0 %v7542_v15 }
  0x94   :  { %5700 = vmatpush3.bf16.msra.mxu1 %v7568_v24 }
  0x95   :  { %5701 = vmatprep.subr.bf16.mxu1 %v7054_v40 }
  0x96   :  { %5682 = vmatpush1.bf16.msra.mxu0 %v7564_v23 }
  0x97   :  { %5708 = vmatprep.subr.bf16.mxu0 %v7338_v9 }
  0x98   :  { %5703 = vmatpush3.bf16.msra.mxu1 %v7581_v29 }
  0x99   :  { %5704 = vmatprep.subr.bf16.mxu1 %v7054_v40 }
  0x9c   :  { %5706 = vmatpush3.bf16.msra.mxu1 %v7595_v32 }
  0x9d   :  { %5739 = vmatprep.subr.bf16.mxu1 %v7054_v40 }
 0x132   :  { %v4824_v42 = vpop.f32.mrb[0].mxu1 }
 0x133   :  { %v7641_v43 = vadd.f32 %v4824_v42, %v158_v39  ;;  %v341_v44 = vpop.f32.mrb[1].mxu1 }
 0x134   :  { %v342_v31 = vadd.f32 %v341_v44, %v158_v39 }
 0x136   :  { %v4827_v47 = vpop.f32.mrb[2].mxu1 }
 0x137   :  { %v7643_v48 = vadd.f32 %v4827_v47, %v158_v39  ;;  %v351_v49 = vpop.f32.mrb[3].mxu1 }
 0x138   :  { %v7645_v50 = vadd.f32 %v351_v49, %v158_v39 }
 0x13a   :  { %v4830_v52 = vpop.f32.mrb[4].mxu1 }
 0x13b   :  { %v7647_v53 = vadd.f32 %v4830_v52, %v158_v39  ;;  %v361_v54 = vpop.f32.mrb[5].mxu1 }
 0x13c   :  { %v7649_v57 = vadd.f32 %v361_v54, %v158_v39 }
 0x13e   :  { %v4833_v58 = vpop.f32.mrb[6].mxu1 }
 0x13f   :  { %v7651_v59 = vadd.f32 %v4833_v58, %v158_v39  ;;  %v371_v60 = vpop.f32.mrb[7].mxu1 }
 0x140   :  { %v7653_v62 = vadd.f32 %v371_v60, %v158_v39 }
 0x14c   :  { %v518_v6 = vpop.f32.mrb[0].mxu0 }
 0x14d   :  { %v6743_v7 = vadd.f32 %v518_v6, %v7662_v3  ;;  %v520_v8 = vpop.f32.mrb[1].mxu0 }
 0x14e   :  { %v6744_v11 = vadd.f32 %v520_v8, %v7665_v5 }
 0x14f   :  { %v4375_v12 = vmul.f32 -1.442695, %v6743_v7 }
 0x150   :  { %v4376_v14 = vmul.f32 -1.442695, %v6744_v11 }
 0x151   :  { %6818 = vpow2.f32 %v4375_v12 }
 0x152   :  { %6820 = vpow2.f32 %v4376_v14  ;;  %v589_v16 = vpop.f32.mrb[8].mxu1 }
 0x153   :  { %v4868_v19 = vpop.f32.mrb[9].mxu1 }
 0x15b   :  { %v6819_v21 = vpop.eup %6818 }
 0x15c   :  { %v600_v22 = vadd.f32 1.0, %v6819_v21  ;;  %v6821_v27 = vpop.eup %6820 }
 0x15d   :  { %v607_v28 = vadd.f32 1.0, %v6821_v27 }
 0x15e   :  { %6822 = vrcp.f32 %v600_v22 }
 0x15f   :  { %6824 = vrcp.f32 %v607_v28 }
 0x168   :  { %v6823_v30 = vpop.eup %6822 }
 0x169   :  { %v610_v33 = vmul.f32 %v6823_v30, %v589_v16  ;;  %v6825_v42 = vpop.eup %6824 }
 0x16a   :  { %v613_v47 = vsub.f32 1.0, %v6825_v42 }
 0x16b   :  { %v611_v38 = vadd.f32 %v610_v33, %v342_v31 }
 0x16c   :  { %v614_v52 = vmul.f32 0.0, %v613_v47 }
 0x16d   :  { %6826 = vtanh.f32 %v611_v38 }
 0x177   :  { %v6827_v49 = vpop.eup %6826 }
 0x178   :  { %v615_v54 = vmul.f32 %v6827_v49, %v6825_v42 }
 0x17a   :  { %v7669_v58 = vadd.f32 %v615_v54, %v614_v52 }
 0x17c   :  { %683 = vmatmul.mubr.f32.vlgmr.msra.gmra.mrb[2].mxu0 %v7669_v58  ;;  %4902 = vmatmul.mubr.f32.vlgmr.msra.gmra.mrb[10].mxu1 %v7669_v58 }
 0x17d   :  { %5710 = vmatpush1.bf16.msra.mxu0 %v7358_v17  ;;  %5741 = vmatpush3.bf16.msra.mxu1 %v7427_v41 }
 0x17e   :  { %5712 = vmatprep.subr.bf16.mxu0 %v7361_v18  ;;  %5742 = vmatprep.subr.bf16.mxu1 %v7054_v40 }
 0x17f   :  { %850 = vmatprep.mubr.f32.mxu0 %v7053_v0  ;;  %4936 = vmatprep.mubr.msk.f32.mxu1 %vm7055_vm0, %v7053_v0 }
 0x181   :  { %5714 = vmatpush1.bf16.msra.mxu0 %v7381_v25  ;;  %5744 = vmatpush3.bf16.msra.mxu1 %v7458_v51 }
 0x182   :  { %5716 = vmatprep.subr.bf16.mxu0 %v7384_v26  ;;  %5745 = vmatprep.subr.bf16.mxu1 %v7054_v40 }
 0x185   :  { %5718 = vmatpush1.bf16.msra.mxu0 %v7409_v34  ;;  %5747 = vmatpush3.bf16.msra.mxu1 %v7490_v61 }
 0x186   :  { %5720 = vmatprep.subr.bf16.mxu0 %v7412_v35  ;;  %5748 = vmatprep.subr.bf16.mxu1 %v7054_v40 }
 0x189   :  { %5722 = vmatpush1.bf16.msra.mxu0 %v7440_v45  ;;  %5750 = vmatpush3.bf16.msra.mxu1 %v7525_v10 }
 0x18a   :  { %5724 = vmatprep.subr.bf16.mxu0 %v7443_v46  ;;  %5751 = vmatprep.subr.bf16.mxu1 %v7054_v40 }
 0x18d   :  { %5726 = vmatpush1.bf16.msra.mxu0 %v7472_v55  ;;  %5753 = vmatpush3.bf16.msra.mxu1 %v7551_v20 }
 0x18e   :  { %5728 = vmatprep.subr.bf16.mxu0 %v7475_v56  ;;  %5754 = vmatprep.subr.bf16.mxu1 %v7054_v40 }
 0x191   :  { %5730 = vmatpush1.bf16.msra.mxu0 %v7504_v2  ;;  %5756 = vmatpush3.bf16.msra.mxu1 %v7568_v24 }
 0x192   :  { %5732 = vmatprep.subr.bf16.mxu0 %v7510_v4  ;;  %5757 = vmatprep.subr.bf16.mxu1 %v7054_v40 }
 0x195   :  { %5734 = vmatpush1.bf16.msra.mxu0 %v7536_v13  ;;  %5759 = vmatpush3.bf16.msra.mxu1 %v7581_v29 }
 0x196   :  { %5736 = vmatprep.subr.bf16.mxu0 %v7542_v15  ;;  %5760 = vmatprep.subr.bf16.mxu1 %v7054_v40 }
 0x199   :  { %5738 = vmatpush1.bf16.msra.mxu0 %v7564_v23  ;;  %5762 = vmatpush3.bf16.msra.mxu1 %v7595_v32 }
 0x19a   :  { %5764 = vmatprep.subr.bf16.mxu0 %v7338_v9  ;;  %5795 = vmatprep.subr.bf16.mxu1 %v7054_v40 }
 0x24f   :  { %v684_v39 = vpop.f32.mrb[2].mxu0  ;;  %v755_v44 = vpop.f32.mrb[10].mxu1 }
 0x250   :  { %v6745_v60 = vadd.f32 %v684_v39, %v7662_v3  ;;  %v686_v6 = vpop.f32.mrb[3].mxu0  ;;  %v4903_v7 = vpop.f32.mrb[11].mxu1 }
 0x251   :  { %v6746_v8 = vadd.f32 %v686_v6, %v7665_v5 }
 0x252   :  { %v4377_v11 = vmul.f32 -1.442695, %v6745_v60 }
 0x253   :  { %v4378_v12 = vmul.f32 -1.442695, %v6746_v8 }
 0x254   :  { %6828 = vpow2.f32 %v4377_v11 }
 0x255   :  { %6830 = vpow2.f32 %v4378_v12 }
 0x25e   :  { %v6829_v14 = vpop.eup %6828 }
 0x25f   :  { %v767_v16 = vadd.f32 1.0, %v6829_v14  ;;  %v6831_v19 = vpop.eup %6830 }
 0x260   :  { %v774_v21 = vadd.f32 1.0, %v6831_v19 }
 0x261   :  { %6832 = vrcp.f32 %v767_v16 }
 0x262   :  { %6834 = vrcp.f32 %v774_v21 }
 0x26b   :  { %v6833_v22 = vpop.eup %6832 }
 0x26c   :  { %v777_v27 = vmul.f32 %v6833_v22, %v755_v44  ;;  %v6835_v30 = vpop.eup %6834 }
 0x26d   :  { %v780_v31 = vsub.f32 1.0, %v6835_v30 }
 0x26e   :  { %v778_v28 = vadd.f32 %v777_v27, %v7641_v43 }
 0x26f   :  { %v781_v38 = vmul.f32 %v780_v31, %v7669_v58 }
 0x270   :  { %6836 = vtanh.f32 %v778_v28 }
 0x27a   :  { %v6837_v33 = vpop.eup %6836 }
 0x27b   :  { %v782_v42 = vmul.f32 %v6837_v33, %v6835_v30 }
 0x27d   :  { %v7712_v47 = vadd.f32 %v782_v42, %v781_v38 }
 0x27f   :  { %851 = vmatmul.mubr.f32.vlgmr.msra.gmra.mrb[4].mxu0 %v7712_v47  ;;  %4937 = vmatmul.mubr.f32.vlgmr.msra.gmra.mrb[12].mxu1 %v7712_v47 }
 0x280   :  { %5766 = vmatpush1.bf16.msra.mxu0 %v7358_v17  ;;  %5797 = vmatpush3.bf16.msra.mxu1 %v7427_v41 }
 0x281   :  { %5768 = vmatprep.subr.bf16.mxu0 %v7361_v18  ;;  %5798 = vmatprep.subr.bf16.mxu1 %v7054_v40 }
 0x282   :  { %1018 = vmatprep.mubr.f32.mxu0 %v7053_v0  ;;  %4971 = vmatprep.mubr.msk.f32.mxu1 %vm7055_vm0, %v7053_v0 }
 0x284   :  { %5770 = vmatpush1.bf16.msra.mxu0 %v7381_v25  ;;  %5800 = vmatpush3.bf16.msra.mxu1 %v7458_v51 }
 0x285   :  { %5772 = vmatprep.subr.bf16.mxu0 %v7384_v26  ;;  %5801 = vmatprep.subr.bf16.mxu1 %v7054_v40 }
 0x288   :  { %5774 = vmatpush1.bf16.msra.mxu0 %v7409_v34  ;;  %5803 = vmatpush3.bf16.msra.mxu1 %v7490_v61 }
 0x289   :  { %5776 = vmatprep.subr.bf16.mxu0 %v7412_v35  ;;  %5804 = vmatprep.subr.bf16.mxu1 %v7054_v40 }
 0x28c   :  { %5778 = vmatpush1.bf16.msra.mxu0 %v7440_v45  ;;  %5806 = vmatpush3.bf16.msra.mxu1 %v7525_v10 }
 0x28d   :  { %5780 = vmatprep.subr.bf16.mxu0 %v7443_v46  ;;  %5807 = vmatprep.subr.bf16.mxu1 %v7054_v40 }
 0x290   :  { %5782 = vmatpush1.bf16.msra.mxu0 %v7472_v55  ;;  %5809 = vmatpush3.bf16.msra.mxu1 %v7551_v20 }
 0x291   :  { %5784 = vmatprep.subr.bf16.mxu0 %v7475_v56  ;;  %5810 = vmatprep.subr.bf16.mxu1 %v7054_v40 }
 0x294   :  { %5786 = vmatpush1.bf16.msra.mxu0 %v7504_v2  ;;  %5812 = vmatpush3.bf16.msra.mxu1 %v7568_v24 }
 0x295   :  { %5788 = vmatprep.subr.bf16.mxu0 %v7510_v4  ;;  %5813 = vmatprep.subr.bf16.mxu1 %v7054_v40 }
 0x298   :  { %5790 = vmatpush1.bf16.msra.mxu0 %v7536_v13  ;;  %5815 = vmatpush3.bf16.msra.mxu1 %v7581_v29 }
 0x299   :  { %5792 = vmatprep.subr.bf16.mxu0 %v7542_v15  ;;  %5816 = vmatprep.subr.bf16.mxu1 %v7054_v40 }
 0x29c   :  { %5794 = vmatpush1.bf16.msra.mxu0 %v7564_v23  ;;  %5818 = vmatpush3.bf16.msra.mxu1 %v7595_v32 }
 0x29d   :  { %5820 = vmatprep.subr.bf16.mxu0 %v7338_v9  ;;  %5851 = vmatprep.subr.bf16.mxu1 %v7054_v40 }
 0x352   :  { %v852_v43 = vpop.f32.mrb[4].mxu0  ;;  %v923_v49 = vpop.f32.mrb[12].mxu1 }
 0x353   :  { %v6747_v52 = vadd.f32 %v852_v43, %v7662_v3  ;;  %v854_v54 = vpop.f32.mrb[5].mxu0  ;;  %v4938_v39 = vpop.f32.mrb[13].mxu1 }
 0x354   :  { %v6748_v44 = vadd.f32 %v854_v54, %v7665_v5 }
 0x355   :  { %v4379_v60 = vmul.f32 -1.442695, %v6747_v52 }
 0x356   :  { %v4380_v6 = vmul.f32 -1.442695, %v6748_v44 }
 0x357   :  { %6838 = vpow2.f32 %v4379_v60 }
 0x358   :  { %6840 = vpow2.f32 %v4380_v6 }
 0x361   :  { %v6839_v7 = vpop.eup %6838 }
 0x362   :  { %v935_v8 = vadd.f32 1.0, %v6839_v7  ;;  %v6841_v11 = vpop.eup %6840 }
 0x363   :  { %v942_v12 = vadd.f32 1.0, %v6841_v11 }
 0x364   :  { %6842 = vrcp.f32 %v935_v8 }
 0x365   :  { %6844 = vrcp.f32 %v942_v12 }
 0x36e   :  { %v6843_v14 = vpop.eup %6842 }
 0x36f   :  { %v945_v16 = vmul.f32 %v6843_v14, %v923_v49  ;;  %v6845_v21 = vpop.eup %6844 }
 0x370   :  { %v948_v22 = vsub.f32 1.0, %v6845_v21 }
 0x371   :  { %v946_v19 = vadd.f32 %v945_v16, %v7645_v50 }
 0x372   :  { %v949_v28 = vmul.f32 %v948_v22, %v7712_v47 }
 0x373   :  { %6846 = vtanh.f32 %v946_v19 }
 0x37d   :  { %v6847_v27 = vpop.eup %6846 }
 0x37e   :  { %v950_v30 = vmul.f32 %v6847_v27, %v6845_v21 }
 0x380   :  { %v7755_v31 = vadd.f32 %v950_v30, %v949_v28 }
 0x382   :  { %1019 = vmatmul.mubr.f32.vlgmr.msra.gmra.mrb[6].mxu0 %v7755_v31  ;;  %4972 = vmatmul.mubr.f32.vlgmr.msra.gmra.mrb[14].mxu1 %v7755_v31 }
 0x383   :  { %5822 = vmatpush1.bf16.msra.mxu0 %v7358_v17  ;;  %5853 = vmatpush3.bf16.msra.mxu1 %v7427_v41 }
 0x384   :  { %5824 = vmatprep.subr.bf16.mxu0 %v7361_v18  ;;  %5854 = vmatprep.subr.bf16.mxu1 %v7054_v40 }
 0x385   :  { %1186 = vmatprep.mubr.f32.mxu0 %v7053_v0  ;;  %5006 = vmatprep.mubr.msk.f32.mxu1 %vm7055_vm0, %v7053_v0 }
 0x387   :  { %5826 = vmatpush1.bf16.msra.mxu0 %v7381_v25  ;;  %5856 = vmatpush3.bf16.msra.mxu1 %v7458_v51 }
 0x388   :  { %5828 = vmatprep.subr.bf16.mxu0 %v7384_v26  ;;  %5857 = vmatprep.subr.bf16.mxu1 %v7054_v40 }
 0x38b   :  { %5830 = vmatpush1.bf16.msra.mxu0 %v7409_v34  ;;  %5859 = vmatpush3.bf16.msra.mxu1 %v7490_v61 }
 0x38c   :  { %5832 = vmatprep.subr.bf16.mxu0 %v7412_v35  ;;  %5860 = vmatprep.subr.bf16.mxu1 %v7054_v40 }
 0x38f   :  { %5834 = vmatpush1.bf16.msra.mxu0 %v7440_v45  ;;  %5862 = vmatpush3.bf16.msra.mxu1 %v7525_v10 }
 0x390   :  { %5836 = vmatprep.subr.bf16.mxu0 %v7443_v46  ;;  %5863 = vmatprep.subr.bf16.mxu1 %v7054_v40 }
 0x393   :  { %5838 = vmatpush1.bf16.msra.mxu0 %v7472_v55  ;;  %5865 = vmatpush3.bf16.msra.mxu1 %v7551_v20 }
 0x394   :  { %5840 = vmatprep.subr.bf16.mxu0 %v7475_v56  ;;  %5866 = vmatprep.subr.bf16.mxu1 %v7054_v40 }
 0x397   :  { %5842 = vmatpush1.bf16.msra.mxu0 %v7504_v2  ;;  %5868 = vmatpush3.bf16.msra.mxu1 %v7568_v24 }
 0x398   :  { %5844 = vmatprep.subr.bf16.mxu0 %v7510_v4  ;;  %5869 = vmatprep.subr.bf16.mxu1 %v7054_v40 }
 0x39b   :  { %5846 = vmatpush1.bf16.msra.mxu0 %v7536_v13  ;;  %5871 = vmatpush3.bf16.msra.mxu1 %v7581_v29 }
 0x39c   :  { %5848 = vmatprep.subr.bf16.mxu0 %v7542_v15  ;;  %5872 = vmatprep.subr.bf16.mxu1 %v7054_v40 }
 0x39f   :  { %5850 = vmatpush1.bf16.msra.mxu0 %v7564_v23  ;;  %5874 = vmatpush3.bf16.msra.mxu1 %v7595_v32 }
 0x3a0   :  { %5876 = vmatprep.subr.bf16.mxu0 %v7338_v9  ;;  %5907 = vmatprep.subr.bf16.mxu1 %v7054_v40 }
 0x455   :  { %v1020_v50 = vpop.f32.mrb[6].mxu0  ;;  %v1091_v33 = vpop.f32.mrb[14].mxu1 }
 0x456   :  { %v6749_v38 = vadd.f32 %v1020_v50, %v7662_v3  ;;  %v1022_v42 = vpop.f32.mrb[7].mxu0  ;;  %v4973_v43 = vpop.f32.mrb[15].mxu1 }
 0x457   :  { %v6750_v49 = vadd.f32 %v1022_v42, %v7665_v5 }
 0x458   :  { %v4381_v52 = vmul.f32 -1.442695, %v6749_v38 }
 0x459   :  { %v4382_v54 = vmul.f32 -1.442695, %v6750_v49 }
 0x45a   :  { %6848 = vpow2.f32 %v4381_v52 }
 0x45b   :  { %6850 = vpow2.f32 %v4382_v54 }
 0x464   :  { %v6849_v39 = vpop.eup %6848 }
 0x465   :  { %v1103_v44 = vadd.f32 1.0, %v6849_v39  ;;  %v6851_v60 = vpop.eup %6850 }
 0x466   :  { %v1110_v6 = vadd.f32 1.0, %v6851_v60 }
 0x467   :  { %6852 = vrcp.f32 %v1103_v44 }
 0x468   :  { %6854 = vrcp.f32 %v1110_v6 }
 0x471   :  { %v6853_v7 = vpop.eup %6852 }
 0x472   :  { %v1113_v8 = vmul.f32 %v6853_v7, %v1091_v33  ;;  %v6855_v12 = vpop.eup %6854 }
 0x473   :  { %v1116_v14 = vsub.f32 1.0, %v6855_v12 }
 0x474   :  { %v1114_v11 = vadd.f32 %v1113_v8, %v7643_v48 }
 0x475   :  { %v1117_v19 = vmul.f32 %v1116_v14, %v7755_v31 }
 0x476   :  { %6856 = vtanh.f32 %v1114_v11 }
 0x480   :  { %v6857_v16 = vpop.eup %6856 }
 0x481   :  { %v1118_v21 = vmul.f32 %v6857_v16, %v6855_v12 }
 0x483   :  { %v7798_v22 = vadd.f32 %v1118_v21, %v1117_v19 }
 0x485   :  { %1187 = vmatmul.mubr.f32.vlgmr.msra.gmra.mrb[8].mxu0 %v7798_v22  ;;  %5007 = vmatmul.mubr.f32.vlgmr.msra.gmra.mrb[16].mxu1 %v7798_v22 }
 0x486   :  { %5878 = vmatpush1.bf16.msra.mxu0 %v7358_v17  ;;  %5909 = vmatpush3.bf16.msra.mxu1 %v7427_v41 }
 0x487   :  { %5880 = vmatprep.subr.bf16.mxu0 %v7361_v18  ;;  %5910 = vmatprep.subr.bf16.mxu1 %v7054_v40 }
 0x488   :  { %1354 = vmatprep.mubr.f32.mxu0 %v7053_v0  ;;  %5041 = vmatprep.mubr.msk.f32.mxu1 %vm7055_vm0, %v7053_v0 }
 0x48a   :  { %5882 = vmatpush1.bf16.msra.mxu0 %v7381_v25  ;;  %5912 = vmatpush3.bf16.msra.mxu1 %v7458_v51 }
 0x48b   :  { %5884 = vmatprep.subr.bf16.mxu0 %v7384_v26  ;;  %5913 = vmatprep.subr.bf16.mxu1 %v7054_v40 }
 0x48e   :  { %5886 = vmatpush1.bf16.msra.mxu0 %v7409_v34  ;;  %5915 = vmatpush3.bf16.msra.mxu1 %v7490_v61 }
 0x48f   :  { %5888 = vmatprep.subr.bf16.mxu0 %v7412_v35  ;;  %5916 = vmatprep.subr.bf16.mxu1 %v7054_v40 }
 0x492   :  { %5890 = vmatpush1.bf16.msra.mxu0 %v7440_v45  ;;  %5918 = vmatpush3.bf16.msra.mxu1 %v7525_v10 }
 0x493   :  { %5892 = vmatprep.subr.bf16.mxu0 %v7443_v46  ;;  %5919 = vmatprep.subr.bf16.mxu1 %v7054_v40 }
 0x496   :  { %5894 = vmatpush1.bf16.msra.mxu0 %v7472_v55  ;;  %5921 = vmatpush3.bf16.msra.mxu1 %v7551_v20 }
 0x497   :  { %5896 = vmatprep.subr.bf16.mxu0 %v7475_v56  ;;  %5922 = vmatprep.subr.bf16.mxu1 %v7054_v40 }
 0x49a   :  { %5898 = vmatpush1.bf16.msra.mxu0 %v7504_v2  ;;  %5924 = vmatpush3.bf16.msra.mxu1 %v7568_v24 }
 0x49b   :  { %5900 = vmatprep.subr.bf16.mxu0 %v7510_v4  ;;  %5925 = vmatprep.subr.bf16.mxu1 %v7054_v40 }
 0x49e   :  { %5902 = vmatpush1.bf16.msra.mxu0 %v7536_v13  ;;  %5927 = vmatpush3.bf16.msra.mxu1 %v7581_v29 }
 0x49f   :  { %5904 = vmatprep.subr.bf16.mxu0 %v7542_v15  ;;  %5928 = vmatprep.subr.bf16.mxu1 %v7054_v40 }
 0x4a2   :  { %5906 = vmatpush1.bf16.msra.mxu0 %v7564_v23  ;;  %5930 = vmatpush3.bf16.msra.mxu1 %v7595_v32 }
 0x4a3   :  { %5932 = vmatprep.subr.bf16.mxu0 %v7338_v9  ;;  %5963 = vmatprep.subr.bf16.mxu1 %v7054_v40 }
 0x558   :  { %v1188_v48 = vpop.f32.mrb[8].mxu0  ;;  %v1259_v27 = vpop.f32.mrb[16].mxu1 }
 0x559   :  { %v6751_v28 = vadd.f32 %v1188_v48, %v7662_v3  ;;  %v1190_v30 = vpop.f32.mrb[9].mxu0  ;;  %v5008_v50 = vpop.f32.mrb[17].mxu1 }
 0x55a   :  { %v6752_v33 = vadd.f32 %v1190_v30, %v7665_v5 }
 0x55b   :  { %v4383_v38 = vmul.f32 -1.442695, %v6751_v28 }
 0x55c   :  { %v4384_v42 = vmul.f32 -1.442695, %v6752_v33 }
 0x55d   :  { %6858 = vpow2.f32 %v4383_v38 }
 0x55e   :  { %6860 = vpow2.f32 %v4384_v42 }
 0x567   :  { %v6859_v43 = vpop.eup %6858 }
 0x568   :  { %v1271_v49 = vadd.f32 1.0, %v6859_v43  ;;  %v6861_v52 = vpop.eup %6860 }
 0x569   :  { %v1278_v54 = vadd.f32 1.0, %v6861_v52 }
 0x56a   :  { %6862 = vrcp.f32 %v1271_v49 }
 0x56b   :  { %6864 = vrcp.f32 %v1278_v54 }
 0x574   :  { %v6863_v39 = vpop.eup %6862 }
 0x575   :  { %v1281_v44 = vmul.f32 %v6863_v39, %v1259_v27  ;;  %v6865_v6 = vpop.eup %6864 }
 0x576   :  { %v1284_v7 = vsub.f32 1.0, %v6865_v6 }
 0x577   :  { %v1282_v60 = vadd.f32 %v1281_v44, %v7649_v57 }
 0x578   :  { %v1285_v11 = vmul.f32 %v1284_v7, %v7798_v22 }
 0x579   :  { %6866 = vtanh.f32 %v1282_v60 }
 0x583   :  { %v6867_v8 = vpop.eup %6866 }
 0x584   :  { %v1286_v12 = vmul.f32 %v6867_v8, %v6865_v6  ;;  %v7940_v8 = vld [vmem:[%s9211_s30] sm:$0xff] }
 0x586   :  { %v7841_v14 = vadd.f32 %v1286_v12, %v1285_v11  ;;  %v1802_v12 = vmul.f32 %v7669_v58, %v7940_v8 }
 0x588   :  { %1355 = vmatmul.mubr.f32.vlgmr.msra.gmra.mrb[10].mxu0 %v7841_v14  ;;  %5042 = vmatmul.mubr.f32.vlgmr.msra.gmra.mrb[18].mxu1 %v7841_v14 }
 0x589   :  { %5934 = vmatpush1.bf16.msra.mxu0 %v7358_v17  ;;  %5965 = vmatpush3.bf16.msra.mxu1 %v7427_v41 }
 0x58a   :  { %5936 = vmatprep.subr.bf16.mxu0 %v7361_v18  ;;  %5966 = vmatprep.subr.bf16.mxu1 %v7054_v40 }
 0x58b   :  { %1522 = vmatprep.mubr.f32.mxu0 %v7053_v0  ;;  %5076 = vmatprep.mubr.msk.f32.mxu1 %vm7055_vm0, %v7053_v0 }
 0x58d   :  { %5938 = vmatpush1.bf16.msra.mxu0 %v7381_v25  ;;  %5968 = vmatpush3.bf16.msra.mxu1 %v7458_v51 }
 0x58e   :  { %5940 = vmatprep.subr.bf16.mxu0 %v7384_v26  ;;  %5969 = vmatprep.subr.bf16.mxu1 %v7054_v40 }
 0x591   :  { %5942 = vmatpush1.bf16.msra.mxu0 %v7409_v34  ;;  %5971 = vmatpush3.bf16.msra.mxu1 %v7490_v61 }
 0x592   :  { %5944 = vmatprep.subr.bf16.mxu0 %v7412_v35  ;;  %5972 = vmatprep.subr.bf16.mxu1 %v7054_v40 }
 0x595   :  { %5946 = vmatpush1.bf16.msra.mxu0 %v7440_v45  ;;  %5974 = vmatpush3.bf16.msra.mxu1 %v7525_v10 }
 0x596   :  { %5948 = vmatprep.subr.bf16.mxu0 %v7443_v46  ;;  %5975 = vmatprep.subr.bf16.mxu1 %v7054_v40 }
 0x599   :  { %5950 = vmatpush1.bf16.msra.mxu0 %v7472_v55  ;;  %5977 = vmatpush3.bf16.msra.mxu1 %v7551_v20 }
 0x59a   :  { %5952 = vmatprep.subr.bf16.mxu0 %v7475_v56  ;;  %5978 = vmatprep.subr.bf16.mxu1 %v7054_v40 }
 0x59d   :  { %5954 = vmatpush1.bf16.msra.mxu0 %v7504_v2  ;;  %5980 = vmatpush3.bf16.msra.mxu1 %v7568_v24 }
 0x59e   :  { %5956 = vmatprep.subr.bf16.mxu0 %v7510_v4  ;;  %5981 = vmatprep.subr.bf16.mxu1 %v7054_v40 }
 0x5a1   :  { %5958 = vmatpush1.bf16.msra.mxu0 %v7536_v13  ;;  %5983 = vmatpush3.bf16.msra.mxu1 %v7581_v29 }
 0x5a2   :  { %5960 = vmatprep.subr.bf16.mxu0 %v7542_v15  ;;  %5984 = vmatprep.subr.bf16.mxu1 %v7054_v40 }
 0x5a5   :  { %5962 = vmatpush1.bf16.msra.mxu0 %v7564_v23  ;;  %5986 = vmatpush3.bf16.msra.mxu1 %v7595_v32 }
 0x5a6   :  { %5988 = vmatprep.subr.bf16.mxu0 %v7338_v9  ;;  %6019 = vmatprep.subr.bf16.mxu1 %v7054_v40 }
 0x65b   :  { %v1356_v57 = vpop.f32.mrb[10].mxu0  ;;  %v1427_v16 = vpop.f32.mrb[18].mxu1 }
 0x65c   :  { %v6753_v19 = vadd.f32 %v1356_v57, %v7662_v3  ;;  %v1358_v21 = vpop.f32.mrb[11].mxu0  ;;  %v5043_v48 = vpop.f32.mrb[19].mxu1  ;;  %v1814_v57 = vld [vmem:[%s9189_s9 + $0x20] sm:$0xff] }
 0x65d   :  { %v6754_v27 = vadd.f32 %v1358_v21, %v7665_v5  ;;  %v1816_v21 = vld [vmem:[%s9189_s9 + $0x30] sm:$0xff]  ;;  %v1817_v48 = vld [vmem:[%s9189_s9 + $0x38] sm:$0xff] }
 0x65e   :  { %v4385_v28 = vmul.f32 -1.442695, %v6753_v19 }
 0x65f   :  { %v4386_v30 = vmul.f32 -1.442695, %v6754_v27  ;;  %v6055_v27 = vpack.c.bf16 %v1817_v48, %v1816_v21 }
 0x660   :  { %6868 = vpow2.f32 %v4385_v28  ;;  %v1818_v28 = vld [vmem:[%s9189_s9 + $0x40] sm:$0xff] }
 0x661   :  { %6870 = vpow2.f32 %v4386_v30  ;;  %v1819_v30 = vld [vmem:[%s9189_s9 + $0x48] sm:$0xff] }
 0x66a   :  { %v6869_v50 = vpop.eup %6868 }
 0x66b   :  { %v1439_v33 = vadd.f32 1.0, %v6869_v50  ;;  %v6871_v38 = vpop.eup %6870  ;;  %v6059_v50 = vpack.c.bf16 %v1819_v30, %v1818_v28 }
 0x66c   :  { %v1446_v42 = vadd.f32 1.0, %v6871_v38  ;;  %v1821_v38 = vld [vmem:[%s9189_s9 + $0x58] sm:$0xff] }
 0x66d   :  { %6872 = vrcp.f32 %v1439_v33  ;;  %v1820_v33 = vld [vmem:[%s9189_s9 + $0x50] sm:$0xff] }
 0x66e   :  { %6874 = vrcp.f32 %v1446_v42  ;;  %v6063_v42 = vpack.c.bf16 %v1821_v38, %v1820_v33 }
 0x677   :  { %v6873_v9 = vpop.eup %6872 }
 0x678   :  { %v1449_v43 = vmul.f32 %v6873_v9, %v1427_v16  ;;  %v6875_v52 = vpop.eup %6874  ;;  %v1815_v16 = vld [vmem:[%s9189_s9 + $0x28] sm:$0xff]  ;;  %v1822_v9 = vld [vmem:[%s9189_s9 + $0x60] sm:$0xff] }
 0x679   :  { %v1452_v54 = vsub.f32 1.0, %v6875_v52  ;;  %v6051_v19 = vpack.c.bf16 %v1815_v16, %v1814_v57 }
 0x67a   :  { %v1450_v49 = vadd.f32 %v1449_v43, %v7647_v53  ;;  %v1823_v43 = vld [vmem:[%s9189_s9 + $0x68] sm:$0xff] }
 0x67b   :  { %v1453_v44 = vmul.f32 %v1452_v54, %v7841_v14  ;;  %v1825_v54 = vld [vmem:[%s9189_s9 + $0x78] sm:$0xff] }
 0x67c   :  { %6876 = vtanh.f32 %v1450_v49  ;;  %v6067_v49 = vpack.c.bf16 %v1823_v43, %v1822_v9 }
 0x686   :  { %v6877_v39 = vpop.eup %6876 }
 0x687   :  { %v1454_v60 = vmul.f32 %v6877_v39, %v6875_v52  ;;  %v1824_v52 = vld [vmem:[%s9189_s9 + $0x70] sm:$0xff] }
 0x688   :  { %v6071_v39 = vpack.c.bf16 %v1825_v54, %v1824_v52 }
 0x689   :  { %v7884_v6 = vadd.f32 %v1454_v60, %v1453_v44  ;;  %v1803_v44 = vmul.f32 %v7712_v47, %v7940_v8  ;;  %v1804_v60 = vmul.f32 %v7755_v31, %v7940_v8 }
 0x68b   :  { %1523 = vmatmul.mubr.f32.vlgmr.msra.gmra.mrb[12].mxu0 %v7884_v6  ;;  %5077 = vmatmul.mubr.f32.vlgmr.msra.gmra.mrb[20].mxu1 %v7884_v6 }
 0x68c   :  { %5990 = vmatpush1.bf16.msra.mxu0 %v7358_v17  ;;  %6021 = vmatpush3.bf16.msra.mxu1 %v7427_v41  ;;  %v1810_v17 = vld [vmem:[%s9189_s9] sm:$0xff] }
 0x68d   :  { %5992 = vmatprep.subr.bf16.mxu0 %v7361_v18  ;;  %6022 = vmatprep.subr.bf16.mxu1 %v7054_v40  ;;  %v1811_v18 = vld [vmem:[%s9189_s9 + $0x8] sm:$0xff] }
 0x68e   :  { %1690 = vmatprep.mubr.f32.mxu0 %v7053_v0  ;;  %5111 = vmatprep.mubr.msk.f32.mxu1 %vm7055_vm0, %v7053_v0 }
 0x690   :  { %5994 = vmatpush1.bf16.msra.mxu0 %v7381_v25  ;;  %6024 = vmatpush3.bf16.msra.mxu1 %v7458_v51  ;;  %v6043_v25 = vpack.c.bf16 %v1811_v18, %v1810_v17  ;;  %v1805_v17 = vmul.f32 %v7798_v22, %v7940_v8  ;;  %v1806_v18 = vmul.f32 %v7841_v14, %v7940_v8 }
 0x691   :  { %5996 = vmatprep.subr.bf16.mxu0 %v7384_v26  ;;  %6025 = vmatprep.subr.bf16.mxu1 %v7054_v40 }
 0x694   :  { %5998 = vmatpush1.bf16.msra.mxu0 %v7409_v34  ;;  %6027 = vmatpush3.bf16.msra.mxu1 %v7490_v61 }
 0x695   :  { %6000 = vmatprep.subr.bf16.mxu0 %v7412_v35  ;;  %6028 = vmatprep.subr.bf16.mxu1 %v7054_v40 }
 0x698   :  { %6002 = vmatpush1.bf16.msra.mxu0 %v7440_v45  ;;  %6030 = vmatpush3.bf16.msra.mxu1 %v7525_v10 }
 0x699   :  { %6004 = vmatprep.subr.bf16.mxu0 %v7443_v46  ;;  %6031 = vmatprep.subr.bf16.mxu1 %v7054_v40 }
 0x69c   :  { %6006 = vmatpush1.bf16.msra.mxu0 %v7472_v55  ;;  %6033 = vmatpush3.bf16.msra.mxu1 %v7551_v20 }
 0x69d   :  { %6008 = vmatprep.subr.bf16.mxu0 %v7475_v56  ;;  %6034 = vmatprep.subr.bf16.mxu1 %v7054_v40 }
 0x6a0   :  { %6010 = vmatpush1.bf16.msra.mxu0 %v7504_v2  ;;  %6036 = vmatpush3.bf16.msra.mxu1 %v7568_v24 }
 0x6a1   :  { %6012 = vmatprep.subr.bf16.mxu0 %v7510_v4  ;;  %6037 = vmatprep.subr.bf16.mxu1 %v7054_v40 }
 0x6a4   :  { %6014 = vmatpush1.bf16.msra.mxu0 %v7536_v13  ;;  %6039 = vmatpush3.bf16.msra.mxu1 %v7581_v29  ;;  %v1812_v29 = vld [vmem:[%s9189_s9 + $0x10] sm:$0xff] }
 0x6a5   :  { %6016 = vmatprep.subr.bf16.mxu0 %v7542_v15  ;;  %6040 = vmatprep.subr.bf16.mxu1 %v7054_v40 }
 0x6a8   :  { %6018 = vmatpush1.bf16.msra.mxu0 %v7564_v23  ;;  %6042 = vmatpush3.bf16.msra.mxu1 %v7595_v32  ;;  %v1813_v32 = vld [vmem:[%s9189_s9 + $0x18] sm:$0xff] }
 0x6a9   :  { %6044 = vmatprep.subr.bf16.mxu0 %v6043_v25  ;;  %v6047_v11 = vpack.c.bf16 %v1813_v32, %v1812_v29  ;;  %v2175_v32 = vld [vmem:[%s9186_s6 + $0x130] sm:$0xff] }
 0x75e   :  { %v1524_v26 = vpop.f32.mrb[12].mxu0  ;;  %v1595_v34 = vpop.f32.mrb[20].mxu1 }
 0x75f   :  { %v6755_v35 = vadd.f32 %v1524_v26, %v7662_v3  ;;  %v1526_v41 = vpop.f32.mrb[13].mxu0  ;;  %v5078_v45 = vpop.f32.mrb[21].mxu1 }
 0x760   :  { %v6756_v46 = vadd.f32 %v1526_v41, %v7665_v5  ;;  %v2145_v45 = vld [vmem:[%s9186_s6 + $0x40] sm:$0xff] }
 0x761   :  { %v4387_v51 = vmul.f32 -1.442695, %v6755_v35  ;;  %v2142_v35 = vld [vmem:[%s9186_s6 + $0x28] sm:$0xff] }
 0x762   :  { %v4388_v55 = vmul.f32 -1.442695, %v6756_v46  ;;  %v2148_v46 = vld [vmem:[%s9186_s6 + $0x58] sm:$0xff] }
 0x763   :  { %6878 = vpow2.f32 %v4387_v51  ;;  %v6111_v51 = vpack.c.bf16 %v2148_v46, %v2145_v45 }
 0x764   :  { %6880 = vpow2.f32 %v4388_v55  ;;  %v2151_v55 = vld [vmem:[%s9186_s6 + $0x70] sm:$0xff] }
 0x76d   :  { %v6879_v56 = vpop.eup %6878 }
 0x76e   :  { %v1607_v61 = vadd.f32 1.0, %v6879_v56  ;;  %v6881_v2 = vpop.eup %6880  ;;  %v2154_v56 = vld [vmem:[%s9186_s6 + $0x88] sm:$0xff] }
 0x76f   :  { %v1614_v4 = vadd.f32 1.0, %v6881_v2  ;;  %v2157_v2 = vld [vmem:[%s9186_s6 + $0xa0] sm:$0xff] }
 0x770   :  { %6882 = vrcp.f32 %v1607_v61  ;;  %v6115_v61 = vpack.c.bf16 %v2154_v56, %v2151_v55 }
 0x771   :  { %6884 = vrcp.f32 %v1614_v4  ;;  %v2160_v4 = vld [vmem:[%s9186_s6 + $0xb8] sm:$0xff] }
 0x77a   :  { %v6883_v10 = vpop.eup %6882 }
 0x77b   :  { %v1617_v13 = vmul.f32 %v6883_v10, %v1595_v34  ;;  %v6885_v20 = vpop.eup %6884  ;;  %v2139_v34 = vld [vmem:[%s9186_s6 + $0x10] sm:$0xff]  ;;  %v6119_v10 = vpack.c.bf16 %v2160_v4, %v2157_v2  ;;  %v2138_v2 = vld [vmem:[%s9186_s6 + $0x8] sm:$0xff]  ;;  %v2141_v4 = vld [vmem:[%s9186_s6 + $0x20] sm:$0xff] }
 0x77c   :  { %v1620_v23 = vsub.f32 1.0, %v6885_v20  ;;  %v6107_v41 = vpack.c.bf16 %v2142_v35, %v2139_v34 }
 0x77d   :  { %v1618_v15 = vadd.f32 %v1617_v13, %v7653_v62  ;;  %v2163_v13 = vld [vmem:[%s9186_s6 + $0xd0] sm:$0xff] }
 0x77e   :  { %v1621_v53 = vmul.f32 %v1620_v23, %v7884_v6  ;;  %v2169_v23 = vld [vmem:[%s9186_s6 + $0x100] sm:$0xff] }
 0x77f   :  { %6886 = vtanh.f32 %v1618_v15  ;;  %v2166_v15 = vld [vmem:[%s9186_s6 + $0xe8] sm:$0xff] }
 0x789   :  { %v6887_v24 = vpop.eup %6886 }
 0x78a   :  { %v1622_v7 = vmul.f32 %v6887_v24, %v6885_v20  ;;  %v6123_v20 = vpack.c.bf16 %v2166_v15, %v2163_v13  ;;  %v2172_v24 = vld [vmem:[%s9186_s6 + $0x118] sm:$0xff]  ;;  %v2446_v13 = vld [vmem:[%s9187_s7 + $0x10] sm:$0xff]  ;;  %v2449_v15 = vld [vmem:[%s9187_s7 + $0x28] sm:$0xff] }
 0x78b   :  { %v6127_v29 = vpack.c.bf16 %v2172_v24, %v2169_v23  ;;  %v2452_v23 = vld [vmem:[%s9187_s7 + $0x40] sm:$0xff]  ;;  %v2455_v24 = vld [vmem:[%s9187_s7 + $0x58] sm:$0xff] }
 0x78c   :  { %v7942_v62 = vadd.f32 %v1622_v7, %v1621_v53  ;;  %v2178_v53 = vld [vmem:[%s9186_s6 + $0x148] sm:$0xff] }
 0x78d   :  { %v6131_v7 = vpack.c.bf16 %v2178_v53, %v2175_v32  ;;  %v2458_v32 = vld [vmem:[%s9187_s7 + $0x70] sm:$0xff]  ;;  %v2461_v53 = vld [vmem:[%s9187_s7 + $0x88] sm:$0xff] }
 0x78e   :  { %1691 = vmatmul.mubr.f32.vlgmr.msra.gmra.mrb[14].mxu0 %v7942_v62  ;;  %5112 = vmatmul.mubr.f32.vlgmr.msra.gmra.mrb[22].mxu1 %v7942_v62  ;;  %v1808_v26 = vmul.f32 %v7942_v62, %v7940_v8 }
 0x78f   :  { %6046 = vmatpush3.bf16.msra.mxu0 %v6043_v25  ;;  %5146 = vmatprep.mubr.f32.mxu0 %v1802_v12  ;;  %v1807_v25 = vmul.f32 %v7884_v6, %v7940_v8  ;;  %v2184_v12 = vld [vmem:[%s9186_s6 + $0x178] sm:$0xff] }
 0x790   :  { %6048 = vmatprep.subr.bf16.mxu0 %v6047_v11 }
 0x793   :  { %6050 = vmatpush3.bf16.msra.mxu0 %v6047_v11  ;;  %v2181_v11 = vld [vmem:[%s9186_s6 + $0x160] sm:$0xff] }
 0x794   :  { %6052 = vmatprep.subr.bf16.mxu0 %v6051_v19  ;;  %v6135_v57 = vpack.c.bf16 %v2184_v12, %v2181_v11  ;;  %v2464_v11 = vld [vmem:[%s9187_s7 + $0xa0] sm:$0xff]  ;;  %v2467_v12 = vld [vmem:[%s9187_s7 + $0xb8] sm:$0xff] }
 0x797   :  { %6054 = vmatpush3.bf16.msra.mxu0 %v6051_v19 }
 0x798   :  { %6056 = vmatprep.subr.bf16.mxu0 %v6055_v27 }
 0x79b   :  { %6058 = vmatpush3.bf16.msra.mxu0 %v6055_v27 }
 0x79c   :  { %6060 = vmatprep.subr.bf16.mxu0 %v6059_v50 }
 0x79f   :  { %6062 = vmatpush3.bf16.msra.mxu0 %v6059_v50 }
 0x7a0   :  { %6064 = vmatprep.subr.bf16.mxu0 %v6063_v42 }
 0x7a3   :  { %6066 = vmatpush3.bf16.msra.mxu0 %v6063_v42 }
 0x7a4   :  { %6068 = vmatprep.subr.bf16.mxu0 %v6067_v49 }
 0x7a7   :  { %6070 = vmatpush3.bf16.msra.mxu0 %v6067_v49 }
 0x7a8   :  { %6072 = vmatprep.subr.bf16.mxu0 %v6071_v39 }
 0x7ab   :  { %6074 = vmatpush3.bf16.msra.mxu0 %v6071_v39 }
 0x7ac   :  { %6108 = vmatprep.subr.bf16.mxu0 %v6107_v41 }
 0x7ae   :  { %5147 = vmatmul.mubr.f32.vlgmr.msra.gmra.mrb[16].mxu0 %v1803_v44 }
 0x7af   :  { %5149 = vmatprep.mubr.f32.mxu0 %v1804_v60  ;;  %6110 = vmatpush3.bf16.msra.mxu0 %v6107_v41 }
 0x7b0   :  { %6112 = vmatprep.subr.bf16.mxu0 %v6111_v51 }
 0x7b2   :  { %5150 = vmatmul.mubr.f32.gmra.mrb[18].mxu0 %v1805_v17 }
 0x7b3   :  { %5152 = vmatprep.mubr.f32.mxu0 %v1806_v18  ;;  %6114 = vmatpush3.bf16.msra.mxu0 %v6111_v51 }
 0x7b4   :  { %6116 = vmatprep.subr.bf16.mxu0 %v6115_v61 }
 0x7b6   :  { %5153 = vmatmul.mubr.f32.gmra.mrb[20].mxu0 %v1807_v25 }
 0x7b7   :  { %5155 = vmatprep.mubr.f32.mxu0 %v1808_v26  ;;  %6118 = vmatpush3.bf16.msra.mxu0 %v6115_v61 }
 0x7b8   :  { %6120 = vmatprep.subr.bf16.mxu0 %v6119_v10 }
 0x7bb   :  { %6122 = vmatpush3.bf16.msra.mxu0 %v6119_v10  ;;  %v6075_v10 = vpack.c.bf16 %v2141_v4, %v2138_v2 }
 0x7bc   :  { %6124 = vmatprep.subr.bf16.mxu0 %v6123_v20 }
 0x7bf   :  { %6126 = vmatpush3.bf16.msra.mxu0 %v6123_v20  ;;  %v8100_v20 = vpack.c.bf16 %v2449_v15, %v2446_v13 }
 0x7c0   :  { %6128 = vmatprep.subr.bf16.mxu0 %v6127_v29 }
 0x7c3   :  { %6130 = vmatpush3.bf16.msra.mxu0 %v6127_v29  ;;  %v8110_v29 = vpack.c.bf16 %v2455_v24, %v2452_v23 }
 0x7c4   :  { %6132 = vmatprep.subr.bf16.mxu0 %v6131_v7 }
 0x7c7   :  { %6134 = vmatpush3.bf16.msra.mxu0 %v6131_v7  ;;  %v8119_v7 = vpack.c.bf16 %v2461_v53, %v2458_v32 }
 0x7c8   :  { %6136 = vmatprep.subr.bf16.mxu0 %v6135_v57 }
 0x7cb   :  { %6138 = vmatpush3.bf16.msra.mxu0 %v6135_v57  ;;  %v8131_v57 = vld [vmem:[%s9188_s8] sm:$0x7] }
 0x7cc   :  { %6171 = vmatprep.subr.bf16.mxu0 %v7054_v40 }
 0x861   :  { %v1692_v16 = vpop.f32.mrb[14].mxu0  ;;  %v1763_v19 = vpop.f32.mrb[22].mxu1 }
 0x862   :  { %v6757_v21 = vadd.f32 %v1692_v16, %v7662_v3  ;;  %v1694_v48 = vpop.f32.mrb[15].mxu0  ;;  %v5113_v27 = vpop.f32.mrb[23].mxu1  ;;  %v8134_v16 = vpack.c.bf16 %v2467_v12, %v2464_v11 }
 0x863   :  { %v6758_v28 = vadd.f32 %v1694_v48, %v7665_v5 }
 0x864   :  { %v4389_v30 = vmul.f32 -1.442695, %v6757_v21  ;;  %v2473_v21 = vld [vmem:[%s9187_s7 + $0xe8] sm:$0xff] }
 0x865   :  { %v4390_v50 = vmul.f32 -1.442695, %v6758_v28 }
 0x866   :  { %6888 = vpow2.f32 %v4389_v30 }
 0x867   :  { %6890 = vpow2.f32 %v4390_v50  ;;  %v8152_v50 = vrot.slane %v8131_v57, %v157_v37  ;;  %v2479_v37 = vld [vmem:[%s9187_s7 + $0x118] sm:$0xff] }
 0x870   :  { %v6889_v33 = vpop.eup %6888 }
 0x871   :  { %v1775_v38 = vadd.f32 1.0, %v6889_v33  ;;  %v6891_v42 = vpop.eup %6890 }
 0x872   :  { %v1782_v9 = vadd.f32 1.0, %v6891_v42 }
 0x873   :  { %6892 = vrcp.f32 %v1775_v38 }
 0x874   :  { %6894 = vrcp.f32 %v1782_v9 }
 0x87d   :  { %v6893_v43 = vpop.eup %6892 }
 0x87e   :  { %v1785_v49 = vmul.f32 %v6893_v43, %v1763_v19  ;;  %v6895_v39 = vpop.eup %6894  ;;  %v2470_v19 = vld [vmem:[%s9187_s7 + $0xd0] sm:$0xff] }
 0x87f   :  { %v1788_v17 = vsub.f32 1.0, %v6895_v39  ;;  %v8158_v9 = vpack.c.bf16 %v2473_v21, %v2470_v19 }
 0x880   :  { %v1786_v52 = vadd.f32 %v1785_v49, %v7651_v59 }
 0x881   :  { %v8048_v54 = vpop.f32.mrb[16].mxu0  ;;  %v1789_v46 = vmul.f32 %v1788_v17, %v7942_v62 }
 0x882   :  { %6896 = vtanh.f32 %v1786_v52  ;;  %v8050_v3 = vpop.f32.mrb[17].mxu0  ;;  %v1933_v18 = vsel %vm1931_vm1, %v8048_v54, -inf }
 0x883   :  { %v1932_v26 = vsel %vm1931_vm1, %v8050_v3, -inf }
 0x885   :  { %v8052_v5 = vpop.f32.mrb[18].mxu0 }
 0x886   :  { %v8054_v44 = vpop.f32.mrb[19].mxu0  ;;  %v1935_v27 = vsel %vm1931_vm1, %v8052_v5, -inf }
 0x887   :  { %v1934_v33 = vsel %vm1931_vm1, %v8054_v44, -inf }
 0x889   :  { %v8056_v60 = vpop.f32.mrb[20].mxu0 }
 0x88a   :  { %v1938_v59 = vsel %vm1931_vm1, %v8056_v60, -inf  ;;  %v8062_v25 = vpop.f32.mrb[21].mxu0 }
 0x88b   :  { %v1939_v34 = vmax.f32 %v1933_v18, %v1938_v59  ;;  %v1936_v35 = vsel %vm1931_vm1, %v8062_v25, -inf  ;;  %v2482_v18 = vld [vmem:[%s9187_s7 + $0x130] sm:$0xff]  ;;  %v2485_v59 = vld [vmem:[%s9187_s7 + $0x148] sm:$0xff] }
 0x88c   :  { %v6897_v41 = vpop.eup %6896  ;;  %v1937_v45 = vmax.f32 %v1932_v26, %v1936_v35  ;;  %v8179_v26 = vpack.c.bf16 %v2479_v37, %v2476_v36 }
 0x88d   :  { %v1790_v51 = vmul.f32 %v6897_v41, %v6895_v39  ;;  %v8183_v41 = vpack.c.bf16 %v2485_v59, %v2482_v18 }
 0x88e   :  { %v8069_v55 = vmax.f32 %v1937_v45, %v1939_v34 }
 0x88f   :  { %v8071_v56 = vadd.f32 %v1790_v51, %v1789_v46 }
 0x891   :  { %v1809_v61 = vmul.f32 %v8071_v56, %v7940_v8  ;;  %v1995_v8 = vld [vmem:[%s9190_s10] sm:$0xf] }
 0x892   :  { %5158 = vmatprep.subr.msk.mxu1 %vm2020_vm2, %v1995_v8 }
 0x893   :  { %5156 = vmatmul.mubr.f32.gmra.mrb[22].mxu0 %v1809_v61  ;;  %5159 = vmatpush3.msk.msra.mxu1 %vm2020_vm2, %v1995_v8 }
 0x894   :  { %5204 = vmatprep.mubr.f32.mxu0 %v7669_v58  ;;  %6076 = vmatprep.subr.bf16.mxu1 %v6075_v10 }
 0x897   :  { %5205 = vmatmul.mubr.f32.vlgmr.msra.gmra.mrb[24].mxu0 %v7712_v47 }
 0x898   :  { %5207 = vmatprep.mubr.f32.mxu0 %v7755_v31  ;;  %6173 = vmatpush3.bf16.msra.mxu0 %v8100_v20 }
 0x899   :  { %6174 = vmatprep.subr.bf16.mxu0 %v7054_v40 }
 0x89b   :  { %5208 = vmatmul.mubr.f32.gmra.mrb[26].mxu0 %v7798_v22 }
 0x89c   :  { %5210 = vmatprep.mubr.f32.mxu0 %v7841_v14  ;;  %6176 = vmatpush3.bf16.msra.mxu0 %v8110_v29 }
 0x89d   :  { %6177 = vmatprep.subr.bf16.mxu0 %v7054_v40 }
 0x89f   :  { %5211 = vmatmul.mubr.f32.gmra.mrb[28].mxu0 %v7884_v6 }
 0x8a0   :  { %5213 = vmatprep.mubr.f32.mxu0 %v7942_v62  ;;  %6179 = vmatpush3.bf16.msra.mxu0 %v8119_v7 }
 0x8a1   :  { %6180 = vmatprep.subr.bf16.mxu0 %v7054_v40 }
 0x8a3   :  { %5214 = vmatmul.mubr.f32.gmra.mrb[30].mxu0 %v8071_v56 }
 0x8a4   :  { %5248 = vmatprep.mubr.msk.f32.mxu0 %vm7055_vm0, %v7053_v0  ;;  %6182 = vmatpush3.bf16.msra.mxu0 %v8134_v16 }
 0x8a5   :  { %6183 = vmatprep.subr.bf16.mxu0 %v7054_v40 }
 0x8a8   :  { %6185 = vmatpush3.bf16.msra.mxu0 %v8158_v9 }
 0x8a9   :  { %6186 = vmatprep.subr.bf16.mxu0 %v7054_v40 }
 0x8ac   :  { %6188 = vmatpush3.bf16.msra.mxu0 %v8179_v26 }
 0x8ad   :  { %6189 = vmatprep.subr.bf16.mxu0 %v7054_v40 }
 0x8b0   :  { %6191 = vmatpush3.bf16.msra.mxu0 %v8183_v41 }
 0x8b1   :  { %6192 = vmatprep.subr.bf16.mxu0 %v7054_v40 }
 0x966   :  { %v8143_v48 = vpop.f32.mrb[22].mxu0 }
 0x967   :  { %v1942_v28 = vsel %vm1931_vm1, %v8143_v48, -inf  ;;  %v1922_v30 = vpop.f32.mrb[23].mxu0 }
 0x968   :  { %v1943_v38 = vmax.f32 %v1935_v27, %v1942_v28  ;;  %v1940_v42 = vsel %vm1931_vm1, %v1922_v30, -inf }
 0x969   :  { %v1941_v43 = vmax.f32 %v1934_v33, %v1940_v42 }
 0x96a   :  { %v5206_v49 = vpop.f32.mrb[24].mxu0 }
 0x96b   :  { %v1945_v52 = vmax.f32 %v1941_v43, %v1943_v38  ;;  %v8168_v39 = vadd.f32 %v5206_v49, %v8152_v50  ;;  %v8170_v17 = vpop.f32.mrb[25].mxu0 }
 0x96d   :  { %v1946_v34 = vmax.f32 %v8069_v55, %v1945_v52 }
 0x96e   :  { %v5209_v35 = vpop.f32.mrb[26].mxu0 }
 0x96f   :  { %v1947_v45 = vsub.f32 %v8050_v3, %v1946_v34  ;;  %v1948_v46 = vsub.f32 %v8048_v54, %v1946_v34  ;;  %v1949_v51 = vsub.f32 %v8054_v44, %v1946_v34  ;;  %v1950_v61 = vsub.f32 %v8052_v5, %v1946_v34  ;;  %v2391_v8 = vpop.f32.mrb[27].mxu0  ;;  %v2488_v3 = vld [vmem:[%s9187_s7 + $0x160] sm:$0xff]  ;;  %v2491_v54 = vld [vmem:[%s9187_s7 + $0x178] sm:$0xff] }
 0x970   :  { %v1951_v2 = vsub.f32 %v8062_v25, %v1946_v34  ;;  %v1952_v4 = vsub.f32 %v8056_v60, %v1946_v34  ;;  %v1953_v10 = vsub.f32 %v1922_v30, %v1946_v34  ;;  %v1954_v55 = vsub.f32 %v8143_v48, %v1946_v34 }
 0x971   :  { %v1955_v44 = vmul.f32 1.442695, %v1947_v45  ;;  %v1957_v5 = vmul.f32 1.442695, %v1948_v46  ;;  %v1959_v13 = vmul.f32 1.442695, %v1949_v51  ;;  %v8200_v25 = vadd.f32 %v5209_v35, %v8152_v50 }
 0x972   :  { %v1961_v60 = vmul.f32 1.442695, %v1950_v61  ;;  %v8204_v15 = vadd.f32 %v2391_v8, %v8152_v50  ;;  %v5212_v23 = vpop.f32.mrb[28].mxu0  ;;  %v1963_v24 = vmul.f32 1.442695, %v1951_v2  ;;  %v8210_v11 = vpack.c.bf16 %v2491_v54, %v2488_v3 }
 0x973   :  { %6898 = vpow2.f32 %v1955_v44  ;;  %v8207_v32 = vadd.f32 %v5212_v23, %v8152_v50  ;;  %v2401_v53 = vpop.f32.mrb[29].mxu0  ;;  %v1965_v19 = vmul.f32 1.442695, %v1952_v4  ;;  %v1967_v28 = vmul.f32 1.442695, %v1953_v10  ;;  %v2147_v23 = vld [vmem:[%s9186_s6 + $0x50] sm:$0xff] }
 0x974   :  { %6900 = vpow2.f32 %v1957_v5  ;;  %v8213_v12 = vadd.f32 %v2401_v53, %v8152_v50  ;;  %6194 = vmatpush3.bf16.msra.mxu0 %v8210_v11  ;;  %v1969_v33 = vmul.f32 1.442695, %v1954_v55  ;;  %v2137_v5 = vld [vmem:[%s9186_s6] sm:$0xff] }
 0x975   :  { %6902 = vpow2.f32 %v1959_v13  ;;  %6227 = vmatprep.subr.bf16.mxu0 %v7054_v40  ;;  %v2140_v13 = vld [vmem:[%s9186_s6 + $0x18] sm:$0xff] }
 0x976   :  { %6904 = vpow2.f32 %v1961_v60  ;;  %v5215_v21 = vpop.f32.mrb[30].mxu0  ;;  %v2144_v60 = vld [vmem:[%s9186_s6 + $0x38] sm:$0xff]  ;;  %v6077_v53 = vpack.c.bf16 %v2140_v13, %v2137_v5 }
 0x977   :  { %v8217_v48 = vadd.f32 %v5215_v21, %v8152_v50  ;;  %v2411_v27 = vpop.f32.mrb[31].mxu0  ;;  %6906 = vpow2.f32 %v1963_v24  ;;  %5249 = vmatmul.mubr.f32.vlgmr.msra.gmra.mrb[32].mxu0 %v7053_v0  ;;  %v2164_v5 = vld [vmem:[%s9186_s6 + $0xd8] sm:$0xff] }
 0x978   :  { %v8220_v30 = vadd.f32 %v2411_v27, %v8152_v50  ;;  %6908 = vpow2.f32 %v1965_v19  ;;  %6229 = vmatpush3.bf16.msra.mxu0 %v8100_v20  ;;  %5283 = vmatprep.mubr.msk.f32.mxu0 %vm7055_vm0, %v7053_v0  ;;  %v6079_v19 = vpack.c.bf16 %v2147_v23, %v2144_v60  ;;  %v2168_v13 = vld [vmem:[%s9186_s6 + $0xf8] sm:$0xff]  ;;  %v2171_v60 = vld [vmem:[%s9186_s6 + $0x110] sm:$0xff] }
 0x979   :  { %6910 = vpow2.f32 %v1967_v28  ;;  %6230 = vmatprep.subr.bf16.mxu0 %v7054_v40 }
 0x97a   :  { %6912 = vpow2.f32 %v1969_v33 }
 0x97c   :  { %6232 = vmatpush3.bf16.msra.mxu0 %v8110_v29 }
 0x97d   :  { %v6899_v38 = vpop.eup %6898  ;;  %6233 = vmatprep.subr.bf16.mxu0 %v7054_v40 }
 0x97e   :  { %v6901_v42 = vpop.eup %6900  ;;  %v1971_v43 = vsel %vm1931_vm1, %v6899_v38, 0.0 }
 0x97f   :  { %v6903_v36 = vpop.eup %6902  ;;  %v1972_v37 = vsel %vm1931_vm1, %v6901_v42, 0.0 }
 0x980   :  { %v6905_v49 = vpop.eup %6904  ;;  %v1973_v52 = vadd.f32 %v1972_v37, %v1971_v43  ;;  %v1974_v18 = vsel %vm1931_vm1, %v6903_v36, 0.0  ;;  %6235 = vmatpush3.bf16.msra.mxu0 %v8119_v7  ;;  %v2143_v43 = vld [vmem:[%s9186_s6 + $0x30] sm:$0xff]  ;;  %v2146_v37 = vld [vmem:[%s9186_s6 + $0x48] sm:$0xff] }
 0x981   :  { %v6907_v59 = vpop.eup %6906  ;;  %v1976_v35 = vsel %vm1931_vm1, %v6905_v49, 0.0  ;;  %6236 = vmatprep.subr.bf16.mxu0 %v7054_v40 }
 0x982   :  { %v1975_v34 = vadd.f32 %v1974_v18, %v1973_v52  ;;  %v6909_v45 = vpop.eup %6908  ;;  %v1978_v51 = vsel %vm1931_vm1, %v6907_v59, 0.0 }
 0x983   :  { %v6911_v61 = vpop.eup %6910  ;;  %v1980_v2 = vsel %vm1931_vm1, %v6909_v45, 0.0 }
 0x984   :  { %v1977_v46 = vadd.f32 %v1976_v35, %v1975_v34  ;;  %v6913_v4 = vpop.eup %6912  ;;  %6238 = vmatpush3.bf16.msra.mxu0 %v8134_v16  ;;  %v1982_v55 = vsel %vm1931_vm1, %v6911_v61, 0.0 }
 0x985   :  { %6239 = vmatprep.subr.bf16.mxu0 %v7054_v40  ;;  %v1984_v54 = vsel %vm1931_vm1, %v6913_v4, 0.0 }
 0x986   :  { %v1979_v8 = vadd.f32 %v1978_v51, %v1977_v46  ;;  %v2156_v46 = vld [vmem:[%s9186_s6 + $0x98] sm:$0xff]  ;;  %v2159_v51 = vld [vmem:[%s9186_s6 + $0xb0] sm:$0xff] }
 0x988   :  { %v1981_v10 = vadd.f32 %v1980_v2, %v1979_v8  ;;  %6241 = vmatpush3.bf16.msra.mxu0 %v8158_v9  ;;  %v6087_v8 = vpack.c.bf16 %v2159_v51, %v2156_v46  ;;  %v2155_v2 = vld [vmem:[%s9186_s6 + $0x90] sm:$0xff]  ;;  %v2444_v46 = vld [vmem:[%s9187_s7] sm:$0xff]  ;;  %v2447_v51 = vld [vmem:[%s9187_s7 + $0x18] sm:$0xff] }
 0x989   :  { %6242 = vmatprep.subr.bf16.mxu0 %v7054_v40 }
 0x98a   :  { %v1983_v3 = vadd.f32 %v1982_v55, %v1981_v10  ;;  %v2162_v10 = vld [vmem:[%s9186_s6 + $0xc8] sm:$0xff]  ;;  %v2165_v55 = vld [vmem:[%s9186_s6 + $0xe0] sm:$0xff] }
 0x98c   :  { %v1985_v44 = vadd.f32 %v1984_v54, %v1983_v3  ;;  %6244 = vmatpush3.bf16.msra.mxu0 %v8179_v26  ;;  %v6091_v54 = vpack.c.bf16 %v2165_v55, %v2162_v10  ;;  %v2450_v10 = vld [vmem:[%s9187_s7 + $0x30] sm:$0xff]  ;;  %v2453_v55 = vld [vmem:[%s9187_s7 + $0x48] sm:$0xff] }
 0x98d   :  { %6245 = vmatprep.subr.bf16.mxu0 %v7054_v40 }
 0x98e   :  { %6914 = vrcp.f32 %v1985_v44  ;;  %v2161_v44 = vld [vmem:[%s9186_s6 + $0xc0] sm:$0xff] }
 0x98f   :  { %v6093_v23 = vpack.c.bf16 %v2164_v5, %v2161_v44  ;;  %v8390_v44 = vpack.c.bf16 %v2453_v55, %v2450_v10  ;;  %v2486_v10 = vld [vmem:[%s9187_s7 + $0x150] sm:$0xff]  ;;  %v2489_v55 = vld [vmem:[%s9187_s7 + $0x168] sm:$0xff] }
 0x990   :  { %6247 = vmatpush3.bf16.msra.mxu0 %v8183_v41 }
 0x991   :  { %6248 = vmatprep.subr.bf16.mxu0 %v7054_v40 }
 0x994   :  { %6250 = vmatpush3.bf16.msra.mxu0 %v8210_v11 }
 0x995   :  { %6283 = vmatprep.subr.bf16.mxu0 %v7054_v40 }
 0x998   :  { %v6915_v24 = vpop.eup %6914 }
 0x999   :  { %v1987_v21 = vmul.f32 %v6915_v24, %v6899_v38  ;;  %v1988_v27 = vmul.f32 %v6915_v24, %v6901_v42  ;;  %v1989_v28 = vmul.f32 %v6915_v24, %v6903_v36  ;;  %v1990_v33 = vmul.f32 %v6915_v24, %v6905_v49  ;;  %v2150_v38 = vld [vmem:[%s9186_s6 + $0x68] sm:$0xff]  ;;  %v2153_v42 = vld [vmem:[%s9186_s6 + $0x80] sm:$0xff] }
 0x99a   :  { %v1991_v52 = vmul.f32 %v6915_v24, %v6907_v59  ;;  %v1992_v18 = vmul.f32 %v6915_v24, %v6909_v45  ;;  %v1993_v34 = vmul.f32 %v6915_v24, %v6911_v61  ;;  %v1994_v35 = vmul.f32 %v6915_v24, %v6913_v4  ;;  %v2149_v59 = vld [vmem:[%s9186_s6 + $0x60] sm:$0xff]  ;;  %v2152_v45 = vld [vmem:[%s9186_s6 + $0x78] sm:$0xff]  ;;  %v2158_v4 = vld [vmem:[%s9186_s6 + $0xa8] sm:$0xff] }
 0x99b   :  { %5160 = vmatprep.mubr.msk.f32.mxu1 %vm1931_vm1, %v1987_v21  ;;  %v6081_v36 = vpack.c.bf16 %v2146_v37, %v2143_v43  ;;  %v6083_v49 = vpack.c.bf16 %v2153_v42, %v2150_v38  ;;  %v6085_v61 = vpack.c.bf16 %v2152_v45, %v2149_v59  ;;  %v6089_v3 = vpack.c.bf16 %v2158_v4, %v2155_v2  ;;  %v2174_v21 = vld [vmem:[%s9186_s6 + $0x128] sm:$0xff]  ;;  %v2173_v43 = vld [vmem:[%s9186_s6 + $0x120] sm:$0xff]  ;;  %v2176_v37 = vld [vmem:[%s9186_s6 + $0x138] sm:$0xff] }
 0x99c   :  { %5161 = vmatmul.mubr.msk.f32.vlgmr.msra.gmra.mrb[24].mxu1 %vm1931_vm1, %v1988_v27  ;;  %v6095_v24 = vpack.c.bf16 %v2171_v60, %v2168_v13  ;;  %v2177_v27 = vld [vmem:[%s9186_s6 + $0x140] sm:$0xff]  ;;  %v2179_v38 = vld [vmem:[%s9186_s6 + $0x150] sm:$0xff]  ;;  %v2182_v42 = vld [vmem:[%s9186_s6 + $0x168] sm:$0xff]  ;;  %v8370_v2 = vpack.c.bf16 %v2447_v51, %v2444_v46 }
 0x99d   :  { %6078 = vmatpush1.bf16.msra.mxu1 %v6077_v53  ;;  %5163 = vmatprep.mubr.msk.f32.mxu1 %vm1931_vm1, %v1989_v28  ;;  %v2167_v53 = vld [vmem:[%s9186_s6 + $0xf0] sm:$0xff]  ;;  %v6105_v59 = vpack.c.bf16 %v2182_v42, %v2179_v38  ;;  %v2456_v13 = vld [vmem:[%s9187_s7 + $0x60] sm:$0xff]  ;;  %v2459_v60 = vld [vmem:[%s9187_s7 + $0x78] sm:$0xff] }
 0x99e   :  { %6080 = vmatprep.subr.bf16.mxu1 %v6079_v19  ;;  %v2170_v19 = vld [vmem:[%s9186_s6 + $0x108] sm:$0xff]  ;;  %v2484_v42 = vld [vmem:[%s9187_s7 + $0x140] sm:$0xff]  ;;  %v2483_v46 = vld [vmem:[%s9187_s7 + $0x138] sm:$0xff] }
 0x99f   :  { %v6097_v28 = vpack.c.bf16 %v2170_v19, %v2167_v53  ;;  %v2462_v19 = vld [vmem:[%s9187_s7 + $0x90] sm:$0xff]  ;;  %v2477_v38 = vld [vmem:[%s9187_s7 + $0x108] sm:$0xff] }
 0x9a0   :  { %5164 = vmatmul.mubr.msk.f32.gmra.mrb[26].mxu1 %vm1931_vm1, %v1990_v33  ;;  %v6099_v33 = vpack.c.bf16 %v2177_v27, %v2174_v21  ;;  %v2465_v21 = vld [vmem:[%s9187_s7 + $0xa8] sm:$0xff]  ;;  %v2472_v27 = vld [vmem:[%s9187_s7 + $0xe0] sm:$0xff]  ;;  %v2490_v51 = vld [vmem:[%s9187_s7 + $0x170] sm:$0xff] }
 0x9a1   :  { %6082 = vmatpush1.bf16.msra.mxu1 %v6081_v36  ;;  %5166 = vmatprep.mubr.msk.f32.mxu1 %vm1931_vm1, %v1991_v52  ;;  %v2180_v52 = vld [vmem:[%s9186_s6 + $0x158] sm:$0xff]  ;;  %v2445_v36 = vld [vmem:[%s9187_s7 + $0x8] sm:$0xff] }
 0x9a2   :  { %6084 = vmatprep.subr.bf16.mxu1 %v6083_v49  ;;  %v2448_v49 = vld [vmem:[%s9187_s7 + $0x20] sm:$0xff] }
 0x9a3   :  { %v8356_v45 = vpack.c.bf16 %v2448_v49, %v2445_v36 }
 0x9a4   :  { %5167 = vmatmul.mubr.msk.f32.gmra.mrb[28].mxu1 %vm1931_vm1, %v1992_v18  ;;  %v2183_v18 = vld [vmem:[%s9186_s6 + $0x170] sm:$0xff] }
 0x9a5   :  { %6086 = vmatpush1.bf16.msra.mxu1 %v6085_v61  ;;  %5169 = vmatprep.mubr.msk.f32.mxu1 %vm1931_vm1, %v1993_v34  ;;  %v6101_v34 = vpack.c.bf16 %v2176_v37, %v2173_v43  ;;  %v2451_v61 = vld [vmem:[%s9187_s7 + $0x38] sm:$0xff]  ;;  %v2468_v43 = vld [vmem:[%s9187_s7 + $0xc0] sm:$0xff] }
 0x9a6   :  { %6088 = vmatprep.subr.bf16.mxu1 %v6087_v8  ;;  %v2454_v8 = vld [vmem:[%s9187_s7 + $0x50] sm:$0xff]  ;;  %v2471_v37 = vld [vmem:[%s9187_s7 + $0xd8] sm:$0xff] }
 0x9a7   :  { %v8373_v4 = vpack.c.bf16 %v2454_v8, %v2451_v61 }
 0x9a8   :  { %5170 = vmatmul.mubr.msk.f32.gmra.mrb[30].mxu1 %vm1931_vm1, %v1994_v35  ;;  %v6103_v35 = vpack.c.bf16 %v2183_v18, %v2180_v52  ;;  %v2478_v52 = vld [vmem:[%s9187_s7 + $0x110] sm:$0xff]  ;;  %v8450_v18 = vpack.c.bf16 %v2471_v37, %v2468_v43 }
 0x9a9   :  { %6090 = vmatpush1.bf16.msra.mxu1 %v6089_v3  ;;  %2266 = vmatprep.mubr.f32.mxu1 %v7053_v0  ;;  %v2457_v3 = vld [vmem:[%s9187_s7 + $0x68] sm:$0xff] }
 0x9aa   :  { %6092 = vmatprep.subr.bf16.mxu1 %v6091_v54  ;;  %v2460_v54 = vld [vmem:[%s9187_s7 + $0x80] sm:$0xff] }
 0x9ab   :  { %v8393_v5 = vpack.c.bf16 %v2460_v54, %v2457_v3 }
 0x9ad   :  { %6094 = vmatpush1.bf16.msra.mxu1 %v6093_v23  ;;  %v2466_v23 = vld [vmem:[%s9187_s7 + $0xb0] sm:$0xff] }
 0x9ae   :  { %6096 = vmatprep.subr.bf16.mxu1 %v6095_v24  ;;  %v8410_v24 = vpack.c.bf16 %v2459_v60, %v2456_v13 }
 0x9b1   :  { %6098 = vmatpush1.bf16.msra.mxu1 %v6097_v28  ;;  %v8430_v28 = vpack.c.bf16 %v2465_v21, %v2462_v19 }
 0x9b2   :  { %6100 = vmatprep.subr.bf16.mxu1 %v6099_v33 }
 0x9b5   :  { %6102 = vmatpush1.bf16.msra.mxu1 %v6101_v34 }
 0x9b6   :  { %6104 = vmatprep.subr.bf16.mxu1 %v6103_v35  ;;  %v2474_v35 = vld [vmem:[%s9187_s7 + $0xf0] sm:$0xff] }
 0x9b7   :  { %v8470_v36 = vpack.c.bf16 %v2477_v38, %v2474_v35 }
 0x9b9   :  { %6106 = vmatpush1.bf16.msra.mxu1 %v6105_v59  ;;  %v2480_v59 = vld [vmem:[%s9187_s7 + $0x120] sm:$0xff] }
 0x9ba   :  { %6140 = vmatprep.subr.bf16.mxu1 %v8356_v45  ;;  %v8490_v61 = vpack.c.bf16 %v2483_v46, %v2480_v59 }
 0x9bc   :  { %2267 = vmatmul.mubr.f32.vlgmr.msra.gmra.mrb[32].mxu1 %v7669_v58  ;;  %v2463_v58 = vld [vmem:[%s9187_s7 + $0x98] sm:$0xff] }
 0x9bd   :  { %6142 = vmatpush1.bf16.msra.mxu1 %v8370_v2  ;;  %2272 = vmatprep.mubr.f32.mxu1 %v7053_v0  ;;  %v8413_v53 = vpack.c.bf16 %v2466_v23, %v2463_v58 }
 0x9be   :  { %6144 = vmatprep.subr.bf16.mxu1 %v8373_v4 }
 0x9c0   :  { %2273 = vmatmul.mubr.f32.gmra.mrb[34].mxu1 %v7712_v47  ;;  %v2469_v47 = vld [vmem:[%s9187_s7 + $0xc8] sm:$0xff] }
 0x9c1   :  { %6146 = vmatpush1.bf16.msra.mxu1 %v8390_v44  ;;  %2278 = vmatprep.mubr.f32.mxu1 %v7053_v0  ;;  %v8433_v33 = vpack.c.bf16 %v2472_v27, %v2469_v47  ;;  %v8545_v47 = vrot.slane %v8131_v57, %v7656_v63  ;;  %v8549_v27 = vrot.slane %v8131_v57, %v7659_v1 }
 0x9c2   :  { %6148 = vmatprep.subr.bf16.mxu1 %v8393_v5  ;;  %v2382_v57 = vadd.f32 %v8170_v17, %v8152_v50 }
 0x9c4   :  { %2279 = vmatmul.mubr.f32.gmra.mrb[36].mxu1 %v7755_v31  ;;  %v2475_v31 = vld [vmem:[%s9187_s7 + $0xf8] sm:$0xff] }
 0x9c5   :  { %6150 = vmatpush1.bf16.msra.mxu1 %v8410_v24  ;;  %2284 = vmatprep.mubr.f32.mxu1 %v7053_v0  ;;  %v8453_v34 = vpack.c.bf16 %v2478_v52, %v2475_v31 }
 0x9c6   :  { %6152 = vmatprep.subr.bf16.mxu1 %v8413_v53 }
 0x9c8   :  { %2285 = vmatmul.mubr.f32.gmra.mrb[38].mxu1 %v7798_v22  ;;  %v2481_v22 = vld [vmem:[%s9187_s7 + $0x128] sm:$0xff] }
 0x9c9   :  { %6154 = vmatpush1.bf16.msra.mxu1 %v8430_v28  ;;  %2290 = vmatprep.mubr.f32.mxu1 %v7053_v0  ;;  %v8473_v49 = vpack.c.bf16 %v2484_v42, %v2481_v22 }
 0x9ca   :  { %6156 = vmatprep.subr.bf16.mxu1 %v8433_v33 }
 0x9cc   :  { %2291 = vmatmul.mubr.f32.gmra.mrb[40].mxu1 %v7841_v14  ;;  %v2487_v14 = vld [vmem:[%s9187_s7 + $0x158] sm:$0xff] }
 0x9cd   :  { %6158 = vmatpush1.bf16.msra.mxu1 %v8450_v18  ;;  %2296 = vmatprep.mubr.f32.mxu1 %v7053_v0  ;;  %v8493_v8 = vpack.c.bf16 %v2490_v51, %v2487_v14 }
 0x9ce   :  { %6160 = vmatprep.subr.bf16.mxu1 %v8453_v34 }
 0x9d0   :  { %2297 = vmatmul.mubr.f32.gmra.mrb[42].mxu1 %v7884_v6  ;;  %v8504_v6 = vpack.c.bf16 %v2489_v55, %v2486_v10 }
 0x9d1   :  { %6162 = vmatpush1.bf16.msra.mxu1 %v8470_v36  ;;  %2302 = vmatprep.mubr.f32.mxu1 %v7053_v0 }
 0x9d2   :  { %6164 = vmatprep.subr.bf16.mxu1 %v8473_v49 }
 0x9d4   :  { %2303 = vmatmul.mubr.f32.gmra.mrb[44].mxu1 %v7942_v62 }
 0x9d5   :  { %6166 = vmatpush1.bf16.msra.mxu1 %v8490_v61  ;;  %2308 = vmatprep.mubr.f32.mxu1 %v7053_v0 }
 0x9d6   :  { %6168 = vmatprep.subr.bf16.mxu1 %v8493_v8 }
 0x9d8   :  { %2309 = vmatmul.mubr.f32.gmra.mrb[46].mxu1 %v8071_v56 }
 0x9d9   :  { %6170 = vmatpush1.bf16.msra.mxu1 %v8504_v6  ;;  %2556 = vmatprep.mubr.f32.mxu1 %v7053_v0 }
 0x9da   :  { %6196 = vmatprep.subr.bf16.mxu1 %v8356_v45 }
 0x9dc   :  { %2557 = vmatmul.mubr.f32.vlgmr.msra.gmra.mrb[32].mxu1 %v7053_v0 }
 0x9dd   :  { %6198 = vmatpush1.bf16.msra.mxu1 %v8370_v2  ;;  %2723 = vmatprep.mubr.f32.mxu1 %v7053_v0 }
 0x9de   :  { %6200 = vmatprep.subr.bf16.mxu1 %v8373_v4 }
 0x9e1   :  { %6202 = vmatpush1.bf16.msra.mxu1 %v8390_v44 }
 0x9e2   :  { %6204 = vmatprep.subr.bf16.mxu1 %v8393_v5 }
 0x9e5   :  { %6206 = vmatpush1.bf16.msra.mxu1 %v8410_v24 }
 0x9e6   :  { %6208 = vmatprep.subr.bf16.mxu1 %v8413_v53 }
 0x9e9   :  { %6210 = vmatpush1.bf16.msra.mxu1 %v8430_v28 }
 0x9ea   :  { %6212 = vmatprep.subr.bf16.mxu1 %v8433_v33 }
 0x9ed   :  { %6214 = vmatpush1.bf16.msra.mxu1 %v8450_v18 }
 0x9ee   :  { %6216 = vmatprep.subr.bf16.mxu1 %v8453_v34 }
 0x9f1   :  { %6218 = vmatpush1.bf16.msra.mxu1 %v8470_v36 }
 0x9f2   :  { %6220 = vmatprep.subr.bf16.mxu1 %v8473_v49 }
 0x9f5   :  { %6222 = vmatpush1.bf16.msra.mxu1 %v8490_v61 }
 0x9f6   :  { %6224 = vmatprep.subr.bf16.mxu1 %v8493_v8 }
 0x9f9   :  { %6226 = vmatpush1.bf16.msra.mxu1 %v8504_v6 }
 0x9fa   :  { %6252 = vmatprep.subr.bf16.mxu1 %v8356_v45 }
 0xa4a   :  { %v2629_v62 = vpop.f32.mrb[32].mxu0 }
 0xa4b   :  { %v5250_v56 = vpop.f32.mrb[33].mxu0 }
 0xa6f   :  { %v8529_v3 = vpop.f32.mrb[24].mxu1 }
 0xa70   :  { %v2090_v54 = vpop.f32.mrb[25].mxu1 }
 0xa73   :  { %v8531_v13 = vpop.f32.mrb[26].mxu1 }
 0xa74   :  { %v8533_v60 = vpop.f32.mrb[27].mxu1 }
 0xa77   :  { %v8535_v58 = vpop.f32.mrb[28].mxu1 }
 0xa78   :  { %v8537_v23 = vpop.f32.mrb[29].mxu1 }
 0xa7b   :  { %v8539_v19 = vpop.f32.mrb[30].mxu1 }
 0xa7c   :  { %v8541_v21 = vpop.f32.mrb[31].mxu1 }
 0xaaf   :  { %v2558_v43 = vpop.f32.mrb[32].mxu1 }
 0xab0   :  { %v6759_v37 = vadd.f32 %v2558_v43, %v8545_v47  ;;  %v2560_v31 = vpop.f32.mrb[33].mxu1 }
 0xab1   :  { %v6760_v52 = vadd.f32 %v2560_v31, %v8549_v27 }
 0xab2   :  { %v4400_v35 = vmul.f32 -1.442695, %v6759_v37 }
 0xab3   :  { %v4401_v38 = vmul.f32 -1.442695, %v6760_v52 }
 0xab4   :  { %6916 = vpow2.f32 %v4400_v35 }
 0xab5   :  { %6918 = vpow2.f32 %v4401_v38 }
 0xabe   :  { %v6917_v22 = vpop.eup %6916 }
 0xabf   :  { %v6919_v42 = vpop.eup %6918  ;;  %v2640_v59 = vadd.f32 1.0, %v6917_v22 }
 0xac0   :  { %v2647_v46 = vadd.f32 1.0, %v6919_v42 }
 0xac1   :  { %6920 = vrcp.f32 %v2640_v59 }
 0xac2   :  { %6922 = vrcp.f32 %v2647_v46 }
 0xacb   :  { %v6921_v14 = vpop.eup %6920 }
 0xacc   :  { %v6923_v51 = vpop.eup %6922  ;;  %v2650_v10 = vmul.f32 %v6921_v14, %v2629_v62 }
 0xacd   :  { %v2654_v55 = vmul.f32 %v6923_v51, %v2090_v54 }
 0xace   :  { %v2651_v56 = vadd.f32 %v2650_v10, %v2382_v57 }
 0xacf   :  { %v2655_v43 = vsub.f32 1.0, %v2654_v55 }
 0xad0   :  { %6924 = vtanh.f32 %v2651_v56 }
 0xad1   :  { %v2656_v31 = vmul.f32 0.0, %v2655_v43 }
 0xada   :  { %v6925_v37 = vpop.eup %6924 }
 0xadb   :  { %v2657_v52 = vmul.f32 %v6925_v37, %v2654_v55 }
 0xadd   :  { %v2658_v35 = vadd.f32 %v2657_v52, %v2656_v31 }
 0xadf   :  { %2724 = vmatmul.mubr.f32.vlgmr.msra.gmra.mrb[34].mxu1 %v2658_v35  ;;  %5284 = vmatmul.mubr.f32.vlgmr.msra.gmra.mrb[34].mxu0 %v2658_v35 }
 0xae0   :  { %6254 = vmatpush1.bf16.msra.mxu1 %v8370_v2  ;;  %6285 = vmatpush3.bf16.msra.mxu0 %v8100_v20 }
 0xae1   :  { %6256 = vmatprep.subr.bf16.mxu1 %v8373_v4  ;;  %6286 = vmatprep.subr.bf16.mxu0 %v7054_v40 }
 0xae2   :  { %2891 = vmatprep.mubr.f32.mxu1 %v7053_v0  ;;  %5318 = vmatprep.mubr.msk.f32.mxu0 %vm7055_vm0, %v7053_v0 }
 0xae4   :  { %6258 = vmatpush1.bf16.msra.mxu1 %v8390_v44  ;;  %6288 = vmatpush3.bf16.msra.mxu0 %v8110_v29 }
 0xae5   :  { %6260 = vmatprep.subr.bf16.mxu1 %v8393_v5  ;;  %6289 = vmatprep.subr.bf16.mxu0 %v7054_v40 }
 0xae8   :  { %6262 = vmatpush1.bf16.msra.mxu1 %v8410_v24  ;;  %6291 = vmatpush3.bf16.msra.mxu0 %v8119_v7 }
 0xae9   :  { %6264 = vmatprep.subr.bf16.mxu1 %v8413_v53  ;;  %6292 = vmatprep.subr.bf16.mxu0 %v7054_v40 }
 0xaec   :  { %6266 = vmatpush1.bf16.msra.mxu1 %v8430_v28  ;;  %6294 = vmatpush3.bf16.msra.mxu0 %v8134_v16 }
 0xaed   :  { %6268 = vmatprep.subr.bf16.mxu1 %v8433_v33  ;;  %6295 = vmatprep.subr.bf16.mxu0 %v7054_v40 }
 0xaf0   :  { %6270 = vmatpush1.bf16.msra.mxu1 %v8450_v18  ;;  %6297 = vmatpush3.bf16.msra.mxu0 %v8158_v9 }
 0xaf1   :  { %6272 = vmatprep.subr.bf16.mxu1 %v8453_v34  ;;  %6298 = vmatprep.subr.bf16.mxu0 %v7054_v40 }
 0xaf4   :  { %6274 = vmatpush1.bf16.msra.mxu1 %v8470_v36  ;;  %6300 = vmatpush3.bf16.msra.mxu0 %v8179_v26 }
 0xaf5   :  { %6276 = vmatprep.subr.bf16.mxu1 %v8473_v49  ;;  %6301 = vmatprep.subr.bf16.mxu0 %v7054_v40 }
 0xaf8   :  { %6278 = vmatpush1.bf16.msra.mxu1 %v8490_v61  ;;  %6303 = vmatpush3.bf16.msra.mxu0 %v8183_v41 }
 0xaf9   :  { %6280 = vmatprep.subr.bf16.mxu1 %v8493_v8  ;;  %6304 = vmatprep.subr.bf16.mxu0 %v7054_v40 }
 0xafc   :  { %6282 = vmatpush1.bf16.msra.mxu1 %v8504_v6  ;;  %6306 = vmatpush3.bf16.msra.mxu0 %v8210_v11 }
 0xafd   :  { %6308 = vmatprep.subr.bf16.mxu1 %v8356_v45  ;;  %6339 = vmatprep.subr.bf16.mxu0 %v7054_v40 }
 0xbb2   :  { %v2725_v50 = vpop.f32.mrb[34].mxu1  ;;  %v2796_v17 = vpop.f32.mrb[34].mxu0 }
 0xbb3   :  { %v6761_v62 = vadd.f32 %v2725_v50, %v8545_v47  ;;  %v2727_v54 = vpop.f32.mrb[35].mxu1  ;;  %v5285_v38 = vpop.f32.mrb[35].mxu0 }
 0xbb4   :  { %v6762_v22 = vadd.f32 %v2727_v54, %v8549_v27 }
 0xbb5   :  { %v4402_v42 = vmul.f32 -1.442695, %v6761_v62 }
 0xbb6   :  { %v4403_v59 = vmul.f32 -1.442695, %v6762_v22 }
 0xbb7   :  { %6926 = vpow2.f32 %v4402_v42 }
 0xbb8   :  { %6928 = vpow2.f32 %v4403_v59 }
 0xbc1   :  { %v6927_v46 = vpop.eup %6926 }
 0xbc2   :  { %v6929_v14 = vpop.eup %6928  ;;  %v2807_v51 = vadd.f32 1.0, %v6927_v46 }
 0xbc3   :  { %v2814_v57 = vadd.f32 1.0, %v6929_v14 }
 0xbc4   :  { %6930 = vrcp.f32 %v2807_v51 }
 0xbc5   :  { %6932 = vrcp.f32 %v2814_v57 }
 0xbce   :  { %v6931_v10 = vpop.eup %6930 }
 0xbcf   :  { %v6933_v55 = vpop.eup %6932  ;;  %v2817_v56 = vmul.f32 %v6931_v10, %v2796_v17 }
 0xbd0   :  { %v2822_v43 = vmul.f32 %v6933_v55, %v8529_v3 }
 0xbd1   :  { %v2818_v37 = vadd.f32 %v2817_v56, %v8168_v39 }
 0xbd2   :  { %v2823_v31 = vsub.f32 1.0, %v2822_v43 }
 0xbd3   :  { %6934 = vtanh.f32 %v2818_v37 }
 0xbd4   :  { %v2824_v50 = vmul.f32 %v2823_v31, %v2658_v35 }
 0xbdd   :  { %v6935_v52 = vpop.eup %6934 }
 0xbde   :  { %v2825_v62 = vmul.f32 %v6935_v52, %v2822_v43 }
 0xbe0   :  { %v2826_v54 = vadd.f32 %v2825_v62, %v2824_v50 }
 0xbe2   :  { %2892 = vmatmul.mubr.f32.vlgmr.msra.gmra.mrb[36].mxu1 %v2826_v54  ;;  %5319 = vmatmul.mubr.f32.vlgmr.msra.gmra.mrb[36].mxu0 %v2826_v54 }
 0xbe3   :  { %6310 = vmatpush1.bf16.msra.mxu1 %v8370_v2  ;;  %6341 = vmatpush3.bf16.msra.mxu0 %v8100_v20 }
 0xbe4   :  { %6312 = vmatprep.subr.bf16.mxu1 %v8373_v4  ;;  %6342 = vmatprep.subr.bf16.mxu0 %v7054_v40 }
 0xbe5   :  { %3059 = vmatprep.mubr.f32.mxu1 %v7053_v0  ;;  %5353 = vmatprep.mubr.msk.f32.mxu0 %vm7055_vm0, %v7053_v0 }
 0xbe7   :  { %6314 = vmatpush1.bf16.msra.mxu1 %v8390_v44  ;;  %6344 = vmatpush3.bf16.msra.mxu0 %v8110_v29 }
 0xbe8   :  { %6316 = vmatprep.subr.bf16.mxu1 %v8393_v5  ;;  %6345 = vmatprep.subr.bf16.mxu0 %v7054_v40 }
 0xbeb   :  { %6318 = vmatpush1.bf16.msra.mxu1 %v8410_v24  ;;  %6347 = vmatpush3.bf16.msra.mxu0 %v8119_v7 }
 0xbec   :  { %6320 = vmatprep.subr.bf16.mxu1 %v8413_v53  ;;  %6348 = vmatprep.subr.bf16.mxu0 %v7054_v40 }
 0xbef   :  { %6322 = vmatpush1.bf16.msra.mxu1 %v8430_v28  ;;  %6350 = vmatpush3.bf16.msra.mxu0 %v8134_v16 }
 0xbf0   :  { %6324 = vmatprep.subr.bf16.mxu1 %v8433_v33  ;;  %6351 = vmatprep.subr.bf16.mxu0 %v7054_v40 }
 0xbf3   :  { %6326 = vmatpush1.bf16.msra.mxu1 %v8450_v18  ;;  %6353 = vmatpush3.bf16.msra.mxu0 %v8158_v9 }
 0xbf4   :  { %6328 = vmatprep.subr.bf16.mxu1 %v8453_v34  ;;  %6354 = vmatprep.subr.bf16.mxu0 %v7054_v40 }
 0xbf7   :  { %6330 = vmatpush1.bf16.msra.mxu1 %v8470_v36  ;;  %6356 = vmatpush3.bf16.msra.mxu0 %v8179_v26 }
 0xbf8   :  { %6332 = vmatprep.subr.bf16.mxu1 %v8473_v49  ;;  %6357 = vmatprep.subr.bf16.mxu0 %v7054_v40 }
 0xbfb   :  { %6334 = vmatpush1.bf16.msra.mxu1 %v8490_v61  ;;  %6359 = vmatpush3.bf16.msra.mxu0 %v8183_v41 }
 0xbfc   :  { %6336 = vmatprep.subr.bf16.mxu1 %v8493_v8  ;;  %6360 = vmatprep.subr.bf16.mxu0 %v7054_v40 }
 0xbff   :  { %6338 = vmatpush1.bf16.msra.mxu1 %v8504_v6  ;;  %6362 = vmatpush3.bf16.msra.mxu0 %v8210_v11 }
 0xc00   :  { %6364 = vmatprep.subr.bf16.mxu1 %v8356_v45  ;;  %6395 = vmatprep.subr.bf16.mxu0 %v7054_v40 }
 0xcb5   :  { %v2893_v39 = vpop.f32.mrb[36].mxu1  ;;  %v2964_v3 = vpop.f32.mrb[36].mxu0 }
 0xcb6   :  { %v6763_v35 = vadd.f32 %v2893_v39, %v8545_v47  ;;  %v2895_v17 = vpop.f32.mrb[37].mxu1  ;;  %v5320_v38 = vpop.f32.mrb[37].mxu0 }
 0xcb7   :  { %v6764_v22 = vadd.f32 %v2895_v17, %v8549_v27 }
 0xcb8   :  { %v4404_v42 = vmul.f32 -1.442695, %v6763_v35 }
 0xcb9   :  { %v4405_v59 = vmul.f32 -1.442695, %v6764_v22 }
 0xcba   :  { %6936 = vpow2.f32 %v4404_v42 }
 0xcbb   :  { %6938 = vpow2.f32 %v4405_v59 }
 0xcc4   :  { %v6937_v46 = vpop.eup %6936 }
 0xcc5   :  { %v6939_v14 = vpop.eup %6938  ;;  %v2975_v51 = vadd.f32 1.0, %v6937_v46 }
 0xcc6   :  { %v2982_v57 = vadd.f32 1.0, %v6939_v14 }
 0xcc7   :  { %6940 = vrcp.f32 %v2975_v51 }
 0xcc8   :  { %6942 = vrcp.f32 %v2982_v57 }
 0xcd1   :  { %v6941_v10 = vpop.eup %6940 }
 0xcd2   :  { %v6943_v55 = vpop.eup %6942  ;;  %v2985_v56 = vmul.f32 %v6941_v10, %v2964_v3 }
 0xcd3   :  { %v2990_v43 = vmul.f32 %v6943_v55, %v8533_v60 }
 0xcd4   :  { %v2986_v37 = vadd.f32 %v2985_v56, %v8204_v15 }
 0xcd5   :  { %v2991_v31 = vsub.f32 1.0, %v2990_v43 }
 0xcd6   :  { %6944 = vtanh.f32 %v2986_v37 }
 0xcd7   :  { %v2992_v50 = vmul.f32 %v2991_v31, %v2826_v54 }
 0xce0   :  { %v6945_v52 = vpop.eup %6944 }
 0xce1   :  { %v2993_v62 = vmul.f32 %v6945_v52, %v2990_v43 }
 0xce3   :  { %v2994_v39 = vadd.f32 %v2993_v62, %v2992_v50 }
 0xce5   :  { %3060 = vmatmul.mubr.f32.vlgmr.msra.gmra.mrb[38].mxu1 %v2994_v39  ;;  %5354 = vmatmul.mubr.f32.vlgmr.msra.gmra.mrb[38].mxu0 %v2994_v39 }
 0xce6   :  { %6366 = vmatpush1.bf16.msra.mxu1 %v8370_v2  ;;  %6397 = vmatpush3.bf16.msra.mxu0 %v8100_v20 }
 0xce7   :  { %6368 = vmatprep.subr.bf16.mxu1 %v8373_v4  ;;  %6398 = vmatprep.subr.bf16.mxu0 %v7054_v40 }
 0xce8   :  { %3227 = vmatprep.mubr.f32.mxu1 %v7053_v0  ;;  %5388 = vmatprep.mubr.msk.f32.mxu0 %vm7055_vm0, %v7053_v0 }
 0xcea   :  { %6370 = vmatpush1.bf16.msra.mxu1 %v8390_v44  ;;  %6400 = vmatpush3.bf16.msra.mxu0 %v8110_v29 }
 0xceb   :  { %6372 = vmatprep.subr.bf16.mxu1 %v8393_v5  ;;  %6401 = vmatprep.subr.bf16.mxu0 %v7054_v40 }
 0xcee   :  { %6374 = vmatpush1.bf16.msra.mxu1 %v8410_v24  ;;  %6403 = vmatpush3.bf16.msra.mxu0 %v8119_v7 }
 0xcef   :  { %6376 = vmatprep.subr.bf16.mxu1 %v8413_v53  ;;  %6404 = vmatprep.subr.bf16.mxu0 %v7054_v40 }
 0xcf2   :  { %6378 = vmatpush1.bf16.msra.mxu1 %v8430_v28  ;;  %6406 = vmatpush3.bf16.msra.mxu0 %v8134_v16 }
 0xcf3   :  { %6380 = vmatprep.subr.bf16.mxu1 %v8433_v33  ;;  %6407 = vmatprep.subr.bf16.mxu0 %v7054_v40 }
 0xcf6   :  { %6382 = vmatpush1.bf16.msra.mxu1 %v8450_v18  ;;  %6409 = vmatpush3.bf16.msra.mxu0 %v8158_v9 }
 0xcf7   :  { %6384 = vmatprep.subr.bf16.mxu1 %v8453_v34  ;;  %6410 = vmatprep.subr.bf16.mxu0 %v7054_v40 }
 0xcfa   :  { %6386 = vmatpush1.bf16.msra.mxu1 %v8470_v36  ;;  %6412 = vmatpush3.bf16.msra.mxu0 %v8179_v26 }
 0xcfb   :  { %6388 = vmatprep.subr.bf16.mxu1 %v8473_v49  ;;  %6413 = vmatprep.subr.bf16.mxu0 %v7054_v40 }
 0xcfe   :  { %6390 = vmatpush1.bf16.msra.mxu1 %v8490_v61  ;;  %6415 = vmatpush3.bf16.msra.mxu0 %v8183_v41 }
 0xcff   :  { %6392 = vmatprep.subr.bf16.mxu1 %v8493_v8  ;;  %6416 = vmatprep.subr.bf16.mxu0 %v7054_v40 }
 0xd02   :  { %6394 = vmatpush1.bf16.msra.mxu1 %v8504_v6  ;;  %6418 = vmatpush3.bf16.msra.mxu0 %v8210_v11 }
 0xd03   :  { %6420 = vmatprep.subr.bf16.mxu1 %v8356_v45  ;;  %6451 = vmatprep.subr.bf16.mxu0 %v7054_v40 }
 0xdb8   :  { %v3061_v15 = vpop.f32.mrb[38].mxu1  ;;  %v3132_v60 = vpop.f32.mrb[38].mxu0 }
 0xdb9   :  { %v6765_v54 = vadd.f32 %v3061_v15, %v8545_v47  ;;  %v3063_v3 = vpop.f32.mrb[39].mxu1  ;;  %v5355_v35 = vpop.f32.mrb[39].mxu0 }
 0xdba   :  { %v6766_v17 = vadd.f32 %v3063_v3, %v8549_v27 }
 0xdbb   :  { %v4406_v38 = vmul.f32 -1.442695, %v6765_v54 }
 0xdbc   :  { %v4407_v22 = vmul.f32 -1.442695, %v6766_v17 }
 0xdbd   :  { %6946 = vpow2.f32 %v4406_v38 }
 0xdbe   :  { %6948 = vpow2.f32 %v4407_v22 }
 0xdc7   :  { %v6947_v42 = vpop.eup %6946 }
 0xdc8   :  { %v6949_v59 = vpop.eup %6948  ;;  %v3143_v46 = vadd.f32 1.0, %v6947_v42 }
 0xdc9   :  { %v3150_v14 = vadd.f32 1.0, %v6949_v59 }
 0xdca   :  { %6950 = vrcp.f32 %v3143_v46 }
 0xdcb   :  { %6952 = vrcp.f32 %v3150_v14 }
 0xdd4   :  { %v6951_v51 = vpop.eup %6950 }
 0xdd5   :  { %v6953_v57 = vpop.eup %6952  ;;  %v3153_v10 = vmul.f32 %v6951_v51, %v3132_v60 }
 0xdd6   :  { %v3158_v55 = vmul.f32 %v6953_v57, %v8531_v13 }
 0xdd7   :  { %v3154_v56 = vadd.f32 %v3153_v10, %v8200_v25 }
 0xdd8   :  { %v3159_v43 = vsub.f32 1.0, %v3158_v55 }
 0xdd9   :  { %6954 = vtanh.f32 %v3154_v56 }
 0xdda   :  { %v3160_v31 = vmul.f32 %v3159_v43, %v2994_v39 }
 0xde3   :  { %v6955_v37 = vpop.eup %6954 }
 0xde4   :  { %v3161_v52 = vmul.f32 %v6955_v37, %v3158_v55 }
 0xde6   :  { %v3162_v50 = vadd.f32 %v3161_v52, %v3160_v31 }
 0xde8   :  { %3228 = vmatmul.mubr.f32.vlgmr.msra.gmra.mrb[40].mxu1 %v3162_v50  ;;  %5389 = vmatmul.mubr.f32.vlgmr.msra.gmra.mrb[40].mxu0 %v3162_v50 }
 0xde9   :  { %6422 = vmatpush1.bf16.msra.mxu1 %v8370_v2  ;;  %6453 = vmatpush3.bf16.msra.mxu0 %v8100_v20 }
 0xdea   :  { %6424 = vmatprep.subr.bf16.mxu1 %v8373_v4  ;;  %6454 = vmatprep.subr.bf16.mxu0 %v7054_v40 }
 0xdeb   :  { %3395 = vmatprep.mubr.f32.mxu1 %v7053_v0  ;;  %5423 = vmatprep.mubr.msk.f32.mxu0 %vm7055_vm0, %v7053_v0 }
 0xded   :  { %6426 = vmatpush1.bf16.msra.mxu1 %v8390_v44  ;;  %6456 = vmatpush3.bf16.msra.mxu0 %v8110_v29 }
 0xdee   :  { %6428 = vmatprep.subr.bf16.mxu1 %v8393_v5  ;;  %6457 = vmatprep.subr.bf16.mxu0 %v7054_v40 }
 0xdf1   :  { %6430 = vmatpush1.bf16.msra.mxu1 %v8410_v24  ;;  %6459 = vmatpush3.bf16.msra.mxu0 %v8119_v7 }
 0xdf2   :  { %6432 = vmatprep.subr.bf16.mxu1 %v8413_v53  ;;  %6460 = vmatprep.subr.bf16.mxu0 %v7054_v40 }
 0xdf5   :  { %6434 = vmatpush1.bf16.msra.mxu1 %v8430_v28  ;;  %6462 = vmatpush3.bf16.msra.mxu0 %v8134_v16 }
 0xdf6   :  { %6436 = vmatprep.subr.bf16.mxu1 %v8433_v33  ;;  %6463 = vmatprep.subr.bf16.mxu0 %v7054_v40 }
 0xdf9   :  { %6438 = vmatpush1.bf16.msra.mxu1 %v8450_v18  ;;  %6465 = vmatpush3.bf16.msra.mxu0 %v8158_v9 }
 0xdfa   :  { %6440 = vmatprep.subr.bf16.mxu1 %v8453_v34  ;;  %6466 = vmatprep.subr.bf16.mxu0 %v7054_v40 }
 0xdfd   :  { %6442 = vmatpush1.bf16.msra.mxu1 %v8470_v36  ;;  %6468 = vmatpush3.bf16.msra.mxu0 %v8179_v26 }
 0xdfe   :  { %6444 = vmatprep.subr.bf16.mxu1 %v8473_v49  ;;  %6469 = vmatprep.subr.bf16.mxu0 %v7054_v40 }
 0xe01   :  { %6446 = vmatpush1.bf16.msra.mxu1 %v8490_v61  ;;  %6471 = vmatpush3.bf16.msra.mxu0 %v8183_v41 }
 0xe02   :  { %6448 = vmatprep.subr.bf16.mxu1 %v8493_v8  ;;  %6472 = vmatprep.subr.bf16.mxu0 %v7054_v40 }
 0xe05   :  { %6450 = vmatpush1.bf16.msra.mxu1 %v8504_v6  ;;  %6474 = vmatpush3.bf16.msra.mxu0 %v8210_v11 }
 0xe06   :  { %6476 = vmatprep.subr.bf16.mxu1 %v8356_v45  ;;  %6507 = vmatprep.subr.bf16.mxu0 %v7054_v40 }
 0xebb   :  { %v3229_v25 = vpop.f32.mrb[40].mxu1  ;;  %v3300_v13 = vpop.f32.mrb[40].mxu0 }
 0xebc   :  { %v6767_v62 = vadd.f32 %v3229_v25, %v8545_v47  ;;  %v3231_v39 = vpop.f32.mrb[41].mxu1  ;;  %v5390_v15 = vpop.f32.mrb[41].mxu0 }
 0xebd   :  { %v6768_v60 = vadd.f32 %v3231_v39, %v8549_v27 }
 0xebe   :  { %v4408_v54 = vmul.f32 -1.442695, %v6767_v62 }
 0xebf   :  { %v4409_v3 = vmul.f32 -1.442695, %v6768_v60 }
 0xec0   :  { %6956 = vpow2.f32 %v4408_v54 }
 0xec1   :  { %6958 = vpow2.f32 %v4409_v3 }
 0xeca   :  { %v6957_v35 = vpop.eup %6956 }
 0xecb   :  { %v6959_v17 = vpop.eup %6958  ;;  %v3311_v38 = vadd.f32 1.0, %v6957_v35 }
 0xecc   :  { %v3318_v22 = vadd.f32 1.0, %v6959_v17 }
 0xecd   :  { %6960 = vrcp.f32 %v3311_v38 }
 0xece   :  { %6962 = vrcp.f32 %v3318_v22 }
 0xed7   :  { %v6961_v42 = vpop.eup %6960 }
 0xed8   :  { %v6963_v59 = vpop.eup %6962  ;;  %v3321_v46 = vmul.f32 %v6961_v42, %v3300_v13 }
 0xed9   :  { %v3326_v14 = vmul.f32 %v6963_v59, %v8537_v23 }
 0xeda   :  { %v3322_v51 = vadd.f32 %v3321_v46, %v8213_v12 }
 0xedb   :  { %v3327_v57 = vsub.f32 1.0, %v3326_v14 }
 0xedc   :  { %6964 = vtanh.f32 %v3322_v51 }
 0xedd   :  { %v3328_v55 = vmul.f32 %v3327_v57, %v3162_v50 }
 0xee6   :  { %v6965_v10 = vpop.eup %6964 }
 0xee7   :  { %v3329_v56 = vmul.f32 %v6965_v10, %v3326_v14 }
 0xee9   :  { %v3330_v43 = vadd.f32 %v3329_v56, %v3328_v55  ;;  %v3871_v55 = vld [vmem:[%s9192_s12 + $0x20] sm:$0xff]  ;;  %v3873_v56 = vld [vmem:[%s9192_s12 + $0x30] sm:$0xff] }
 0xeeb   :  { %3396 = vmatmul.mubr.f32.vlgmr.msra.gmra.mrb[42].mxu1 %v3330_v43  ;;  %5424 = vmatmul.mubr.f32.vlgmr.msra.gmra.mrb[42].mxu0 %v3330_v43 }
 0xeec   :  { %6478 = vmatpush1.bf16.msra.mxu1 %v8370_v2  ;;  %6509 = vmatpush3.bf16.msra.mxu0 %v8100_v20 }
 0xeed   :  { %6480 = vmatprep.subr.bf16.mxu1 %v8373_v4  ;;  %6510 = vmatprep.subr.bf16.mxu0 %v7054_v40 }
 0xeee   :  { %3563 = vmatprep.mubr.f32.mxu1 %v7053_v0  ;;  %5458 = vmatprep.mubr.msk.f32.mxu0 %vm7055_vm0, %v7053_v0 }
 0xef0   :  { %6482 = vmatpush1.bf16.msra.mxu1 %v8390_v44  ;;  %6512 = vmatpush3.bf16.msra.mxu0 %v8110_v29 }
 0xef1   :  { %6484 = vmatprep.subr.bf16.mxu1 %v8393_v5  ;;  %6513 = vmatprep.subr.bf16.mxu0 %v7054_v40 }
 0xef4   :  { %6486 = vmatpush1.bf16.msra.mxu1 %v8410_v24  ;;  %6515 = vmatpush3.bf16.msra.mxu0 %v8119_v7 }
 0xef5   :  { %6488 = vmatprep.subr.bf16.mxu1 %v8413_v53  ;;  %6516 = vmatprep.subr.bf16.mxu0 %v7054_v40 }
 0xef8   :  { %6490 = vmatpush1.bf16.msra.mxu1 %v8430_v28  ;;  %6518 = vmatpush3.bf16.msra.mxu0 %v8134_v16 }
 0xef9   :  { %6492 = vmatprep.subr.bf16.mxu1 %v8433_v33  ;;  %6519 = vmatprep.subr.bf16.mxu0 %v7054_v40 }
 0xefc   :  { %6494 = vmatpush1.bf16.msra.mxu1 %v8450_v18  ;;  %6521 = vmatpush3.bf16.msra.mxu0 %v8158_v9 }
 0xefd   :  { %6496 = vmatprep.subr.bf16.mxu1 %v8453_v34  ;;  %6522 = vmatprep.subr.bf16.mxu0 %v7054_v40 }
 0xf00   :  { %6498 = vmatpush1.bf16.msra.mxu1 %v8470_v36  ;;  %6524 = vmatpush3.bf16.msra.mxu0 %v8179_v26 }
 0xf01   :  { %6500 = vmatprep.subr.bf16.mxu1 %v8473_v49  ;;  %6525 = vmatprep.subr.bf16.mxu0 %v7054_v40 }
 0xf04   :  { %6502 = vmatpush1.bf16.msra.mxu1 %v8490_v61  ;;  %6527 = vmatpush3.bf16.msra.mxu0 %v8183_v41 }
 0xf05   :  { %6504 = vmatprep.subr.bf16.mxu1 %v8493_v8  ;;  %6528 = vmatprep.subr.bf16.mxu0 %v7054_v40 }
 0xf08   :  { %6506 = vmatpush1.bf16.msra.mxu1 %v8504_v6  ;;  %6530 = vmatpush3.bf16.msra.mxu0 %v8210_v11 }
 0xf09   :  { %6532 = vmatprep.subr.bf16.mxu1 %v8356_v45  ;;  %6563 = vmatprep.subr.bf16.mxu0 %v7054_v40 }
 0xfbe   :  { %v3397_v12 = vpop.f32.mrb[42].mxu1  ;;  %v3468_v23 = vpop.f32.mrb[42].mxu0 }
 0xfbf   :  { %v6769_v37 = vadd.f32 %v3397_v12, %v8545_v47  ;;  %v3399_v31 = vpop.f32.mrb[43].mxu1  ;;  %v5425_v52 = vpop.f32.mrb[43].mxu0  ;;  %v3878_v12 = vld [vmem:[%s9192_s12 + $0x58] sm:$0xff] }
 0xfc0   :  { %v6770_v50 = vadd.f32 %v3399_v31, %v8549_v27  ;;  %v3875_v31 = vld [vmem:[%s9192_s12 + $0x40] sm:$0xff]  ;;  %v3877_v52 = vld [vmem:[%s9192_s12 + $0x50] sm:$0xff] }
 0xfc1   :  { %v4410_v25 = vmul.f32 -1.442695, %v6769_v37 }
 0xfc2   :  { %v4411_v13 = vmul.f32 -1.442695, %v6770_v50  ;;  %v3880_v50 = vld [vmem:[%s9192_s12 + $0x68] sm:$0xff] }
 0xfc3   :  { %6966 = vpow2.f32 %v4410_v25  ;;  %v3882_v25 = vld [vmem:[%s9192_s12 + $0x78] sm:$0xff] }
 0xfc4   :  { %6968 = vpow2.f32 %v4411_v13  ;;  %v6597_v13 = vpack.c.bf16 %v3877_v52, %v3875_v31  ;;  %v3847_v31 = vld [vmem:[%s9191_s11 + $0x60] sm:$0xff]  ;;  %v3849_v52 = vld [vmem:[%s9191_s11 + $0x70] sm:$0xff] }
 0xfcd   :  { %v6967_v62 = vpop.eup %6966 }
 0xfce   :  { %v6969_v39 = vpop.eup %6968  ;;  %v3479_v15 = vadd.f32 1.0, %v6967_v62  ;;  %v6599_v62 = vpack.c.bf16 %v3882_v25, %v3880_v50  ;;  %v6633_v50 = vpack.c.bf16 %v3849_v52, %v3847_v31  ;;  %v3852_v25 = vld [vmem:[%s9191_s11 + $0x88] sm:$0xff]  ;;  %v4180_v31 = vld [vmem:[#allocation7 + $0x88] sm:$0xff] }
 0xfcf   :  { %v3486_v60 = vadd.f32 1.0, %v6969_v39  ;;  %v3879_v39 = vld [vmem:[%s9192_s12 + $0x60] sm:$0xff] }
 0xfd0   :  { %6970 = vrcp.f32 %v3479_v15  ;;  %v3881_v15 = vld [vmem:[%s9192_s12 + $0x70] sm:$0xff] }
 0xfd1   :  { %6972 = vrcp.f32 %v3486_v60  ;;  %v3884_v60 = vld [vmem:[%s9192_s12 + $0x88] sm:$0xff] }
 0xfda   :  { %v6971_v45 = vpop.eup %6970 }
 0xfdb   :  { %v6973_v54 = vpop.eup %6972  ;;  %v3489_v3 = vmul.f32 %v6971_v45, %v3468_v23  ;;  %v6593_v23 = vpack.c.bf16 %v3873_v56, %v3871_v55  ;;  %v3886_v45 = vld [vmem:[%s9192_s12 + $0x98] sm:$0xff]  ;;  %v3843_v55 = vld [vmem:[%s9191_s11 + $0x40] sm:$0xff]  ;;  %v3845_v56 = vld [vmem:[%s9191_s11 + $0x50] sm:$0xff] }
 0xfdc   :  { %v3494_v35 = vmul.f32 %v6973_v54, %v8535_v58  ;;  %v3872_v58 = vld [vmem:[%s9192_s12 + $0x28] sm:$0xff]  ;;  %v6601_v54 = vpack.c.bf16 %v3881_v15, %v3879_v39  ;;  %v3853_v15 = vld [vmem:[%s9191_s11 + $0x90] sm:$0xff] }
 0xfdd   :  { %v3490_v17 = vadd.f32 %v3489_v3, %v8207_v32  ;;  %v6603_v3 = vpack.c.bf16 %v3886_v45, %v3884_v60  ;;  %v3856_v60 = vld [vmem:[%s9191_s11 + $0xa8] sm:$0xff]  ;;  %v3858_v45 = vld [vmem:[%s9191_s11 + $0xb8] sm:$0xff] }
 0xfde   :  { %v3495_v38 = vsub.f32 1.0, %v3494_v35 }
 0xfdf   :  { %6974 = vtanh.f32 %v3490_v17  ;;  %v3885_v17 = vld [vmem:[%s9192_s12 + $0x90] sm:$0xff] }
 0xfe0   :  { %v3496_v42 = vmul.f32 %v3495_v38, %v3330_v43  ;;  %v3876_v43 = vld [vmem:[%s9192_s12 + $0x48] sm:$0xff] }
 0xfe1   :  { %v6595_v37 = vpack.c.bf16 %v3878_v12, %v3876_v43  ;;  %v6629_v43 = vpack.c.bf16 %v3845_v56, %v3843_v55  ;;  %v3848_v12 = vld [vmem:[%s9191_s11 + $0x68] sm:$0xff]  ;;  %v4176_v55 = vld [vmem:[#allocation7 + $0x68] sm:$0xff] }
 0xfe9   :  { %v6975_v22 = vpop.eup %6974 }
 0xfea   :  { %v3497_v59 = vmul.f32 %v6975_v22, %v3494_v35  ;;  %v3883_v35 = vld [vmem:[%s9192_s12 + $0x80] sm:$0xff]  ;;  %v3888_v22 = vld [vmem:[%s9192_s12 + $0xa8] sm:$0xff] }
 0xfeb   :  { %v6605_v38 = vpack.c.bf16 %v3885_v17, %v3883_v35  ;;  %v3855_v35 = vld [vmem:[%s9191_s11 + $0xa0] sm:$0xff]  ;;  %v3857_v17 = vld [vmem:[%s9191_s11 + $0xb0] sm:$0xff] }
 0xfec   :  { %v8750_v46 = vadd.f32 %v3497_v59, %v3496_v42  ;;  %v3890_v42 = vld [vmem:[%s9192_s12 + $0xb8] sm:$0xff] }
 0xfed   :  { %v6607_v59 = vpack.c.bf16 %v3890_v42, %v3888_v22  ;;  %v3862_v22 = vld [vmem:[%s9191_s11 + $0xd8] sm:$0xff]  ;;  %v6641_v42 = vpack.c.bf16 %v3857_v17, %v3855_v35 }
 0xfee   :  { %3564 = vmatmul.mubr.f32.vlgmr.msra.gmra.mrb[44].mxu1 %v8750_v46  ;;  %5459 = vmatmul.mubr.f32.vlgmr.msra.gmra.mrb[44].mxu0 %v8750_v46 }
 0xfef   :  { %6534 = vmatpush1.bf16.msra.mxu1 %v8370_v2  ;;  %6565 = vmatpush3.bf16.msra.mxu0 %v8100_v20  ;;  %v3868_v20 = vld [vmem:[%s9192_s12 + $0x8] sm:$0xff] }
 0xff0   :  { %6536 = vmatprep.subr.bf16.mxu1 %v8373_v4  ;;  %6566 = vmatprep.subr.bf16.mxu0 %v7054_v40 }
 0xff1   :  { %3731 = vmatprep.mubr.f32.mxu1 %v7053_v0  ;;  %5493 = vmatprep.mubr.msk.f32.mxu0 %vm7055_vm0, %v7053_v0 }
 0xff3   :  { %6538 = vmatpush1.bf16.msra.mxu1 %v8390_v44  ;;  %6568 = vmatpush3.bf16.msra.mxu0 %v8110_v29  ;;  %v3870_v29 = vld [vmem:[%s9192_s12 + $0x18] sm:$0xff] }
 0xff4   :  { %6540 = vmatprep.subr.bf16.mxu1 %v8393_v5  ;;  %6569 = vmatprep.subr.bf16.mxu0 %v7054_v40 }
 0xff7   :  { %6542 = vmatpush1.bf16.msra.mxu1 %v8410_v24  ;;  %6571 = vmatpush3.bf16.msra.mxu0 %v8119_v7  ;;  %v6587_v7 = vpack.c.bf16 %v3870_v29, %v3868_v20  ;;  %v3889_v20 = vld [vmem:[%s9192_s12 + $0xb0] sm:$0xff] }
 0xff8   :  { %6544 = vmatprep.subr.bf16.mxu1 %v8413_v53  ;;  %6572 = vmatprep.subr.bf16.mxu0 %v7054_v40 }
 0xffb   :  { %6546 = vmatpush1.bf16.msra.mxu1 %v8430_v28  ;;  %6574 = vmatpush3.bf16.msra.mxu0 %v8134_v16 }
 0xffc   :  { %6548 = vmatprep.subr.bf16.mxu1 %v8433_v33  ;;  %6575 = vmatprep.subr.bf16.mxu0 %v7054_v40 }
 0xfff   :  { %6550 = vmatpush1.bf16.msra.mxu1 %v8450_v18  ;;  %6577 = vmatpush3.bf16.msra.mxu0 %v8158_v9 }
0x1000   :  { %6552 = vmatprep.subr.bf16.mxu1 %v8453_v34  ;;  %6578 = vmatprep.subr.bf16.mxu0 %v7054_v40 }
0x1003   :  { %6554 = vmatpush1.bf16.msra.mxu1 %v8470_v36  ;;  %6580 = vmatpush3.bf16.msra.mxu0 %v8179_v26 }
0x1004   :  { %6556 = vmatprep.subr.bf16.mxu1 %v8473_v49  ;;  %6581 = vmatprep.subr.bf16.mxu0 %v7054_v40 }
0x1007   :  { %6558 = vmatpush1.bf16.msra.mxu1 %v8490_v61  ;;  %6583 = vmatpush3.bf16.msra.mxu0 %v8183_v41  ;;  %v3867_v61 = vld [vmem:[%s9192_s12] sm:$0xff] }
0x1008   :  { %6560 = vmatprep.subr.bf16.mxu1 %v8493_v8  ;;  %6584 = vmatprep.subr.bf16.mxu0 %v7054_v40  ;;  %v3869_v8 = vld [vmem:[%s9192_s12 + $0x10] sm:$0xff] }
0x1009   :  { %v6589_v51 = vpack.c.bf16 %v3869_v8, %v3867_v61  ;;  %v3840_v61 = vld [vmem:[%s9191_s11 + $0x28] sm:$0xff]  ;;  %v3842_v8 = vld [vmem:[%s9191_s11 + $0x38] sm:$0xff] }
0x100b   :  { %6562 = vmatpush1.bf16.msra.mxu1 %v8504_v6  ;;  %6586 = vmatpush3.bf16.msra.mxu0 %v8210_v11 }
0x100c   :  { %6683 = vmatprep.subr.bf16.mxu0 %v7054_v40  ;;  %6588 = vmatprep.subr.bf16.mxu1 %v6587_v7  ;;  %v3892_v7 = vld [vmem:[%s9192_s12 + $0xc8] sm:$0xff] }
0x10c1   :  { %v3565_v16 = vpop.f32.mrb[44].mxu1  ;;  %v3636_v9 = vpop.f32.mrb[44].mxu0 }
0x10c2   :  { %v6771_v26 = vadd.f32 %v3565_v16, %v8545_v47  ;;  %v3567_v41 = vpop.f32.mrb[45].mxu1  ;;  %v5460_v32 = vpop.f32.mrb[45].mxu0  ;;  %v3894_v16 = vld [vmem:[%s9192_s12 + $0xd8] sm:$0xff] }
0x10c3   :  { %v6772_v11 = vadd.f32 %v3567_v41, %v8549_v27  ;;  %v3893_v41 = vld [vmem:[%s9192_s12 + $0xd0] sm:$0xff] }
0x10c4   :  { %v4412_v2 = vmul.f32 -1.442695, %v6771_v26  ;;  %v3891_v26 = vld [vmem:[%s9192_s12 + $0xc0] sm:$0xff] }
0x10c5   :  { %v4413_v4 = vmul.f32 -1.442695, %v6772_v11  ;;  %v6613_v32 = vpack.c.bf16 %v3893_v41, %v3891_v26  ;;  %v3896_v11 = vld [vmem:[%s9192_s12 + $0xe8] sm:$0xff]  ;;  %v3863_v26 = vld [vmem:[%s9191_s11 + $0xe0] sm:$0xff]  ;;  %v3865_v41 = vld [vmem:[%s9191_s11 + $0xf0] sm:$0xff] }
0x10c6   :  { %6976 = vpow2.f32 %v4412_v2  ;;  %v3898_v2 = vld [vmem:[%s9192_s12 + $0xf8] sm:$0xff] }
0x10c7   :  { %6978 = vpow2.f32 %v4413_v4  ;;  %v6615_v4 = vpack.c.bf16 %v3898_v2, %v3896_v11  ;;  %v4045_v11 = vld [vmem:[%s9193_s13 + $0x18] sm:$0xff]  ;;  %v6649_v2 = vpack.c.bf16 %v3865_v41, %v3863_v26  ;;  %v4047_v26 = vld [vmem:[%s9193_s13 + $0x28] sm:$0xff] }
0x10d0   :  { %v6977_v44 = vpop.eup %6976 }
0x10d1   :  { %v6979_v5 = vpop.eup %6978  ;;  %v3647_v24 = vadd.f32 1.0, %v6977_v44  ;;  %v3895_v44 = vld [vmem:[%s9192_s12 + $0xe0] sm:$0xff] }
0x10d2   :  { %v3654_v53 = vadd.f32 1.0, %v6979_v5  ;;  %v3897_v5 = vld [vmem:[%s9192_s12 + $0xf0] sm:$0xff] }
0x10d3   :  { %6980 = vrcp.f32 %v3647_v24  ;;  %v6617_v24 = vpack.c.bf16 %v3897_v5, %v3895_v44  ;;  %v4163_v44 = vld [vmem:[#allocation7] sm:$0xff]  ;;  %v4164_v5 = vld [vmem:[#allocation7 + $0x8] sm:$0xff] }
0x10d4   :  { %6982 = vrcp.f32 %v3654_v53  ;;  %v3836_v53 = vld [vmem:[%s9191_s11 + $0x8] sm:$0xff] }
0x10dd   :  { %v6981_v28 = vpop.eup %6980 }
0x10de   :  { %v6983_v33 = vpop.eup %6982  ;;  %v3657_v18 = vmul.f32 %v6981_v28, %v3636_v9  ;;  %v6611_v9 = vpack.c.bf16 %v3894_v16, %v3892_v7  ;;  %v3838_v28 = vld [vmem:[%s9191_s11 + $0x18] sm:$0xff] }
0x10df   :  { %v3662_v34 = vmul.f32 %v6983_v33, %v8541_v21  ;;  %v3874_v21 = vld [vmem:[%s9192_s12 + $0x38] sm:$0xff]  ;;  %v6619_v33 = vpack.c.bf16 %v3838_v28, %v3836_v53  ;;  %v6684_v53 = vpack.c.bf16 %v4164_v5, %v4163_v44  ;;  %v4166_v28 = vld [vmem:[#allocation7 + $0x18] sm:$0xff]  ;;  %v4048_v44 = vld [vmem:[%s9193_s13 + $0x30] sm:$0xff] }
0x10e0   :  { %v3658_v36 = vadd.f32 %v3657_v18, %v8220_v30  ;;  %v6591_v10 = vpack.c.bf16 %v3874_v21, %v3872_v58  ;;  %v3835_v18 = vld [vmem:[%s9191_s11] sm:$0xff]  ;;  %v3841_v21 = vld [vmem:[%s9191_s11 + $0x30] sm:$0xff]  ;;  %v3866_v7 = vld [vmem:[%s9191_s11 + $0xf8] sm:$0xff] }
0x10e1   :  { %v3663_v49 = vsub.f32 1.0, %v3662_v34  ;;  %v3839_v58 = vld [vmem:[%s9191_s11 + $0x20] sm:$0xff]  ;;  %v4051_v5 = vld [vmem:[%s9193_s13 + $0x48] sm:$0xff] }
0x10e2   :  { %6984 = vtanh.f32 %v3658_v36 }
0x10e3   :  { %v3664_v30 = vmul.f32 %v3663_v49, %v8750_v46  ;;  %v3887_v46 = vld [vmem:[%s9192_s12 + $0xa0] sm:$0xff] }
0x10e4   :  { %v6609_v29 = vpack.c.bf16 %v3889_v20, %v3887_v46  ;;  %v7000_v49 = vld [vmem:[%s9211_s30] sm:$0xff]  ;;  %v3861_v20 = vld [vmem:[%s9191_s11 + $0xd0] sm:$0xff] }
0x10e5   :  { %v3859_v46 = vld [vmem:[%s9191_s11 + $0xc0] sm:$0xff] }
0x10e6   :  { %v6645_v16 = vpack.c.bf16 %v3861_v20, %v3859_v46 }
0x10ec   :  { %v6985_v6 = vpop.eup %6984 }
0x10ed   :  { %v3665_v14 = vmul.f32 %v6985_v6, %v3662_v34  ;;  %v3837_v34 = vld [vmem:[%s9191_s11 + $0x10] sm:$0xff]  ;;  %v6623_v6 = vpack.c.bf16 %v3842_v8, %v3840_v61  ;;  %v4170_v61 = vld [vmem:[#allocation7 + $0x38] sm:$0xff] }
0x10ee   :  { %v6621_v36 = vpack.c.bf16 %v3837_v34, %v3835_v18  ;;  %v4167_v18 = vld [vmem:[#allocation7 + $0x20] sm:$0xff]  ;;  %v4168_v34 = vld [vmem:[#allocation7 + $0x28] sm:$0xff] }
0x10ef   :  { %v8811_v57 = vadd.f32 %v3665_v14, %v3664_v30  ;;  %v6625_v30 = vpack.c.bf16 %v3841_v21, %v3839_v58  ;;  %v3844_v14 = vld [vmem:[%s9191_s11 + $0x48] sm:$0xff]  ;;  %v4172_v58 = vld [vmem:[#allocation7 + $0x48] sm:$0xff] }
0x10f1   :  { %3732 = vmatmul.mubr.f32.vlgmr.msra.gmra.mrb[46].mxu1 %v8811_v57  ;;  %5494 = vmatmul.mubr.f32.vlgmr.msra.gmra.mrb[46].mxu0 %v8811_v57 }
0x10f2   :  { %6590 = vmatpush1.bf16.msra.mxu1 %v6589_v51  ;;  %3963 = vmatprep.mubr.f32.mxu1 %v7053_v0  ;;  %v3846_v51 = vld [vmem:[%s9191_s11 + $0x58] sm:$0xff] }
0x10f3   :  { %6592 = vmatprep.subr.bf16.mxu1 %v6591_v10  ;;  %v6627_v10 = vpack.c.bf16 %v3846_v51, %v3844_v14  ;;  %6685 = vmatpush1.bf16.msra.mxu0 %v6684_v53  ;;  %v4174_v14 = vld [vmem:[#allocation7 + $0x58] sm:$0xff] }
0x10f4   :  { %6686 = vmatprep.subr.bf16.mxu0 %v7054_v40 }
0x10f6   :  { %6594 = vmatpush1.bf16.msra.mxu1 %v6593_v23  ;;  %v3850_v23 = vld [vmem:[%s9191_s11 + $0x78] sm:$0xff] }
0x10f7   :  { %6596 = vmatprep.subr.bf16.mxu1 %v6595_v37  ;;  %v6631_v37 = vpack.c.bf16 %v3850_v23, %v3848_v12  ;;  %v4178_v12 = vld [vmem:[#allocation7 + $0x78] sm:$0xff] }
0x10fa   :  { %6598 = vmatpush1.bf16.msra.mxu1 %v6597_v13  ;;  %v3854_v13 = vld [vmem:[%s9191_s11 + $0x98] sm:$0xff] }
0x10fb   :  { %6600 = vmatprep.subr.bf16.mxu1 %v6599_v62  ;;  %v3851_v62 = vld [vmem:[%s9191_s11 + $0x80] sm:$0xff]  ;;  %v6635_v39 = vpack.c.bf16 %v3854_v13, %v3852_v25 }
0x10fc   :  { %v4182_v25 = vld [vmem:[#allocation7 + $0x98] sm:$0xff] }
0x10fe   :  { %6602 = vmatpush1.bf16.msra.mxu1 %v6601_v54  ;;  %v6637_v54 = vpack.c.bf16 %v3853_v15, %v3851_v62 }
0x10ff   :  { %6604 = vmatprep.subr.bf16.mxu1 %v6603_v3  ;;  %v6639_v3 = vpack.c.bf16 %v3858_v45, %v3856_v60 }
0x1102   :  { %6606 = vmatpush1.bf16.msra.mxu1 %v6605_v38  ;;  %v3860_v38 = vld [vmem:[%s9191_s11 + $0xc8] sm:$0xff] }
0x1103   :  { %6608 = vmatprep.subr.bf16.mxu1 %v6607_v59  ;;  %v6643_v59 = vpack.c.bf16 %v3862_v22, %v3860_v38 }
0x1106   :  { %6610 = vmatpush1.bf16.msra.mxu1 %v6609_v29  ;;  %v3864_v29 = vld [vmem:[%s9191_s11 + $0xe8] sm:$0xff] }
0x1107   :  { %6612 = vmatprep.subr.bf16.mxu1 %v6611_v9  ;;  %v6647_v9 = vpack.c.bf16 %v3866_v7, %v3864_v29 }
0x110a   :  { %6614 = vmatpush1.bf16.msra.mxu1 %v6613_v32  ;;  %v4043_v32 = vld [vmem:[%s9193_s13 + $0x8] sm:$0xff] }
0x110b   :  { %6616 = vmatprep.subr.bf16.mxu1 %v6615_v4  ;;  %v6651_v4 = vpack.c.bf16 %v4045_v11, %v4043_v32 }
0x110e   :  { %6618 = vmatpush1.bf16.msra.mxu1 %v6617_v24  ;;  %v4165_v24 = vld [vmem:[#allocation7 + $0x10] sm:$0xff] }
0x110f   :  { %6620 = vmatprep.subr.bf16.mxu1 %v6619_v33  ;;  %v6687_v33 = vpack.c.bf16 %v4166_v28, %v4165_v24  ;;  %v4050_v28 = vld [vmem:[%s9193_s13 + $0x40] sm:$0xff] }
0x1111   :  { %3964 = vmatmul.mubr.f32.vlgmr.msra.gmra.mrb[48].mxu1 %v7000_v49  ;;  %6688 = vmatpush1.bf16.msra.mxu0 %v6687_v33  ;;  %v4169_v49 = vld [vmem:[#allocation7 + $0x30] sm:$0xff]  ;;  %v4052_v33 = vld [vmem:[%s9193_s13 + $0x50] sm:$0xff] }
0x1112   :  { %6622 = vmatpush1.bf16.msra.mxu1 %v6621_v36  ;;  %4034 = vmatprep.mubr.f32.mxu1 %v7053_v0  ;;  %v6690_v36 = vpack.c.bf16 %v4168_v34, %v4167_v18  ;;  %v6693_v8 = vpack.c.bf16 %v4170_v61, %v4169_v49  ;;  %v4055_v18 = vld [vmem:[%s9193_s13 + $0x68] sm:$0xff]  ;;  %v4057_v34 = vld [vmem:[%s9193_s13 + $0x78] sm:$0xff]  ;;  %v4054_v61 = vld [vmem:[%s9193_s13 + $0x60] sm:$0xff] }
0x1113   :  { %6624 = vmatprep.subr.bf16.mxu1 %v6623_v6  ;;  %6689 = vmatprep.subr.bf16.mxu0 %v7054_v40  ;;  %v4171_v6 = vld [vmem:[#allocation7 + $0x40] sm:$0xff]  ;;  %v6663_v49 = vpack.c.bf16 %v4057_v34, %v4055_v18  ;;  %v4280_v18 = vld [vmem:[%s9197_s17 + $0x58] sm:$0xff] }
0x1114   :  { %v6696_v21 = vpack.c.bf16 %v4172_v58, %v4171_v6  ;;  %v4059_v6 = vld [vmem:[%s9193_s13 + $0x88] sm:$0xff]  ;;  %v4061_v58 = vld [vmem:[%s9193_s13 + $0x98] sm:$0xff] }
0x1115   :  { %6691 = vmatpush1.bf16.msra.mxu0 %v6690_v36  ;;  %v6661_v36 = vpack.c.bf16 %v4052_v33, %v4050_v28  ;;  %v4279_v33 = vld [vmem:[%s9197_s17 + $0x50] sm:$0xff] }
0x1116   :  { %6626 = vmatpush1.bf16.msra.mxu1 %v6625_v30  ;;  %6692 = vmatprep.subr.bf16.mxu0 %v7054_v40  ;;  %v4173_v30 = vld [vmem:[#allocation7 + $0x50] sm:$0xff]  ;;  %v6735_v34 = vpack.c.bf16 %v4280_v18, %v4279_v33 }
0x1117   :  { %6628 = vmatprep.subr.bf16.mxu1 %v6627_v10  ;;  %v6699_v51 = vpack.c.bf16 %v4174_v14, %v4173_v30  ;;  %v4175_v10 = vld [vmem:[#allocation7 + $0x60] sm:$0xff]  ;;  %v6667_v30 = vpack.c.bf16 %v4061_v58, %v4059_v6  ;;  %v4058_v14 = vld [vmem:[%s9193_s13 + $0x80] sm:$0xff]  ;;  %v4284_v6 = vld [vmem:[%s9197_s17 + $0x78] sm:$0xff] }
0x1118   :  { %v6702_v56 = vpack.c.bf16 %v4176_v55, %v4175_v10  ;;  %v4063_v10 = vld [vmem:[%s9193_s13 + $0xa8] sm:$0xff]  ;;  %v4065_v55 = vld [vmem:[%s9193_s13 + $0xb8] sm:$0xff] }
0x1119   :  { %6694 = vmatpush1.bf16.msra.mxu0 %v6693_v8  ;;  %v4056_v8 = vld [vmem:[%s9193_s13 + $0x70] sm:$0xff] }
0x111a   :  { %6630 = vmatpush1.bf16.msra.mxu1 %v6629_v43  ;;  %6695 = vmatprep.subr.bf16.mxu0 %v7054_v40  ;;  %v4177_v43 = vld [vmem:[#allocation7 + $0x70] sm:$0xff] }
0x111b   :  { %6632 = vmatprep.subr.bf16.mxu1 %v6631_v37  ;;  %v6705_v23 = vpack.c.bf16 %v4178_v12, %v4177_v43  ;;  %v4179_v37 = vld [vmem:[#allocation7 + $0x80] sm:$0xff]  ;;  %v6671_v43 = vpack.c.bf16 %v4065_v55, %v4063_v10  ;;  %v4062_v12 = vld [vmem:[%s9193_s13 + $0xa0] sm:$0xff] }
0x111c   :  { %v6708_v52 = vpack.c.bf16 %v4180_v31, %v4179_v37  ;;  %v4067_v37 = vld [vmem:[%s9193_s13 + $0xc8] sm:$0xff]  ;;  %v4069_v31 = vld [vmem:[%s9193_s13 + $0xd8] sm:$0xff] }
0x111d   :  { %6697 = vmatpush1.bf16.msra.mxu0 %v6696_v21  ;;  %v6665_v21 = vpack.c.bf16 %v4056_v8, %v4054_v61  ;;  %v4283_v8 = vld [vmem:[%s9197_s17 + $0x70] sm:$0xff] }
0x111e   :  { %6634 = vmatpush1.bf16.msra.mxu1 %v6633_v50  ;;  %6698 = vmatprep.subr.bf16.mxu0 %v7054_v40  ;;  %v4181_v50 = vld [vmem:[#allocation7 + $0x90] sm:$0xff]  ;;  %v6741_v58 = vpack.c.bf16 %v4284_v6, %v4283_v8 }
0x111f   :  { %6636 = vmatprep.subr.bf16.mxu1 %v6635_v39  ;;  %v6711_v13 = vpack.c.bf16 %v4182_v25, %v4181_v50  ;;  %v6675_v50 = vpack.c.bf16 %v4069_v31, %v4067_v37  ;;  %v4066_v25 = vld [vmem:[%s9193_s13 + $0xc0] sm:$0xff] }
0x1121   :  { %6700 = vmatpush1.bf16.msra.mxu0 %v6699_v51  ;;  %v4060_v51 = vld [vmem:[%s9193_s13 + $0x90] sm:$0xff] }
0x1122   :  { %6638 = vmatpush1.bf16.msra.mxu1 %v6637_v54  ;;  %6701 = vmatprep.subr.bf16.mxu0 %v7054_v40 }
0x1123   :  { %6640 = vmatprep.subr.bf16.mxu1 %v6639_v3 }
0x1125   :  { %6703 = vmatpush1.bf16.msra.mxu0 %v6702_v56  ;;  %v6669_v56 = vpack.c.bf16 %v4060_v51, %v4058_v14 }
0x1126   :  { %6642 = vmatpush1.bf16.msra.mxu1 %v6641_v42  ;;  %6704 = vmatprep.subr.bf16.mxu0 %v7054_v40 }
0x1127   :  { %6644 = vmatprep.subr.bf16.mxu1 %v6643_v59 }
0x1129   :  { %6706 = vmatpush1.bf16.msra.mxu0 %v6705_v23  ;;  %v4064_v23 = vld [vmem:[%s9193_s13 + $0xb0] sm:$0xff] }
0x112a   :  { %6646 = vmatpush1.bf16.msra.mxu1 %v6645_v16  ;;  %6707 = vmatprep.subr.bf16.mxu0 %v7054_v40  ;;  %v4044_v16 = vld [vmem:[%s9193_s13 + $0x10] sm:$0xff] }
0x112b   :  { %6648 = vmatprep.subr.bf16.mxu1 %v6647_v9 }
0x112d   :  { %6709 = vmatpush1.bf16.msra.mxu0 %v6708_v52  ;;  %v6673_v52 = vpack.c.bf16 %v4064_v23, %v4062_v12 }
0x112e   :  { %6650 = vmatpush1.bf16.msra.mxu1 %v6649_v2  ;;  %6710 = vmatprep.subr.bf16.mxu0 %v7054_v40 }
0x112f   :  { %6652 = vmatprep.subr.bf16.mxu1 %v6651_v4  ;;  %v4046_v4 = vld [vmem:[%s9193_s13 + $0x20] sm:$0xff] }
0x1130   :  { %v6657_v24 = vpack.c.bf16 %v4048_v44, %v4046_v4  ;;  %v4274_v4 = vld [vmem:[%s9197_s17 + $0x28] sm:$0xff] }
0x1131   :  { %6712 = vmatpush1.bf16.msra.mxu0 %v6711_v13  ;;  %v4068_v13 = vld [vmem:[%s9193_s13 + $0xd0] sm:$0xff] }
0x1132   :  { %6713 = vmatprep.subr.bf16.mxu0 %v7054_v40 }
0x11c4   :  { %v3733_v62 = vpop.f32.mrb[46].mxu1  ;;  %v3804_v39 = vpop.f32.mrb[46].mxu0 }
0x11c5   :  { %v6773_v15 = vadd.f32 %v3733_v62, %v8545_v47  ;;  %v3735_v60 = vpop.f32.mrb[47].mxu1  ;;  %v5495_v45 = vpop.f32.mrb[47].mxu0  ;;  %v4071_v62 = vld [vmem:[%s9193_s13 + $0xe8] sm:$0xff] }
0x11c6   :  { %v6774_v54 = vadd.f32 %v3735_v60, %v8549_v27  ;;  %v4042_v27 = vld [vmem:[%s9193_s13] sm:$0xff] }
0x11c7   :  { %v4414_v3 = vmul.f32 -1.442695, %v6773_v15  ;;  %v6653_v32 = vpack.c.bf16 %v4044_v16, %v4042_v27  ;;  %v6677_v15 = vpack.c.bf16 %v4068_v13, %v4066_v25  ;;  %v4070_v45 = vld [vmem:[%s9193_s13 + $0xe0] sm:$0xff] }
0x11c8   :  { %v4415_v35 = vmul.f32 -1.442695, %v6774_v54  ;;  %v4072_v54 = vld [vmem:[%s9193_s13 + $0xf0] sm:$0xff] }
0x11c9   :  { %6986 = vpow2.f32 %v4414_v3  ;;  %v6681_v3 = vpack.c.bf16 %v4072_v54, %v4070_v45 }
0x11ca   :  { %6988 = vpow2.f32 %v4415_v35  ;;  %v4041_v35 = vld [vmem:[#allocation5] sm:$0xff] }
0x11d3   :  { %v6987_v17 = vpop.eup %6986 }
0x11d4   :  { %v6989_v38 = vpop.eup %6988  ;;  %v3815_v22 = vadd.f32 1.0, %v6987_v17  ;;  %v4183_v17 = vld [vmem:[#allocation7 + $0xa0] sm:$0xff] }
0x11d5   :  { %v3822_v42 = vadd.f32 1.0, %v6989_v38  ;;  %v4184_v38 = vld [vmem:[#allocation7 + $0xa8] sm:$0xff] }
0x11d6   :  { %6990 = vrcp.f32 %v3815_v22  ;;  %v6714_v22 = vpack.c.bf16 %v4184_v38, %v4183_v17 }
0x11d7   :  { %6992 = vrcp.f32 %v3822_v42  ;;  %v4185_v42 = vld [vmem:[#allocation7 + $0xb0] sm:$0xff] }
0x11d8   :  { %6715 = vmatpush1.bf16.msra.mxu0 %v6714_v22 }
0x11d9   :  { %6716 = vmatprep.subr.bf16.mxu0 %v7054_v40 }
0x11e0   :  { %v6991_v59 = vpop.eup %6990 }
0x11e1   :  { %v6993_v46 = vpop.eup %6992  ;;  %v3825_v20 = vmul.f32 %v6991_v59, %v3804_v39  ;;  %v4073_v39 = vld [vmem:[%s9193_s13 + $0xf8] sm:$0xff]  ;;  %v4186_v59 = vld [vmem:[#allocation7 + $0xb8] sm:$0xff] }
0x11e2   :  { %v3830_v29 = vmul.f32 %v6993_v46, %v8539_v19  ;;  %v4049_v19 = vld [vmem:[%s9193_s13 + $0x38] sm:$0xff]  ;;  %v6679_v60 = vpack.c.bf16 %v4073_v39, %v4071_v62  ;;  %v6717_v46 = vpack.c.bf16 %v4186_v59, %v4185_v42 }
0x11e3   :  { %v3826_v47 = vadd.f32 %v3825_v20, %v8217_v48  ;;  %v6655_v2 = vpack.c.bf16 %v4049_v19, %v4047_v26  ;;  %v4147_v20 = vld [vmem:[%s9194_s14] sm:$0x3]  ;;  %v4270_v26 = vld [vmem:[%s9197_s17 + $0x8] sm:$0xff] }
0x11e4   :  { %v3831_v7 = vsub.f32 1.0, %v3830_v29  ;;  %6718 = vmatpush1.bf16.msra.mxu0 %v6717_v46 }
0x11e5   :  { %6994 = vtanh.f32 %v3826_v47  ;;  %6719 = vmatprep.subr.bf16.mxu0 %v7054_v40  ;;  %v4156_v47 = vrot.slane %v4147_v20, %v7659_v1  ;;  %v4272_v1 = vld [vmem:[%s9197_s17 + $0x18] sm:$0xff] }
0x11e6   :  { %v3832_v48 = vmul.f32 %v3831_v7, %v8811_v57  ;;  %v4053_v57 = vld [vmem:[%s9193_s13 + $0x58] sm:$0xff] }
0x11e7   :  { %v6659_v53 = vpack.c.bf16 %v4053_v57, %v4051_v5  ;;  %v4275_v5 = vld [vmem:[%s9197_s17 + $0x30] sm:$0xff] }
0x11ef   :  { %v6995_v9 = vpop.eup %6994 }
0x11f0   :  { %v3833_v41 = vmul.f32 %v6995_v9, %v3830_v29  ;;  %v4152_v29 = vrot.slane %v4147_v20, %v7656_v63  ;;  %v4269_v9 = vld [vmem:[%s9197_s17] sm:$0xff]  ;;  %v4271_v63 = vld [vmem:[%s9197_s17 + $0x10] sm:$0xff] }
0x11f2   :  { %v3834_v11 = vadd.f32 %v3833_v41, %v3832_v48  ;;  %v6720_v41 = vpack.c.bf16 %v4270_v26, %v4269_v9 }
0x11f4   :  { %4035 = vmatmul.mubr.f32.vlgmr.msra.gmra.mrb[48].mxu1 %v3834_v11  ;;  %v6723_v11 = vpack.c.bf16 %v4272_v1, %v4271_v63 }
0x11f5   :  { %6654 = vmatpush1.bf16.msra.mxu1 %v6653_v32  ;;  %4138 = vmatprep.mubr.f32.mxu1 %v7053_v0 }
0x11f6   :  { %6656 = vmatprep.subr.bf16.mxu1 %v6655_v2  ;;  %v4273_v2 = vld [vmem:[%s9197_s17 + $0x20] sm:$0xff] }
0x11f7   :  { %v6726_v44 = vpack.c.bf16 %v4274_v4, %v4273_v2 }
0x11f9   :  { %6658 = vmatpush1.bf16.msra.mxu1 %v6657_v24  ;;  %v4277_v24 = vld [vmem:[%s9197_s17 + $0x40] sm:$0xff] }
0x11fa   :  { %6660 = vmatprep.subr.bf16.mxu1 %v6659_v53  ;;  %v4278_v53 = vld [vmem:[%s9197_s17 + $0x48] sm:$0xff] }
0x11fb   :  { %v6732_v28 = vpack.c.bf16 %v4278_v53, %v4277_v24 }
0x11fd   :  { %6662 = vmatpush1.bf16.msra.mxu1 %v6661_v36  ;;  %v4281_v36 = vld [vmem:[%s9197_s17 + $0x60] sm:$0xff] }
0x11fe   :  { %6664 = vmatprep.subr.bf16.mxu1 %v6663_v49  ;;  %v4282_v49 = vld [vmem:[%s9197_s17 + $0x68] sm:$0xff] }
0x11ff   :  { %v6738_v61 = vpack.c.bf16 %v4282_v49, %v4281_v36 }
0x1201   :  { %6666 = vmatpush1.bf16.msra.mxu1 %v6665_v21  ;;  %v4416_v21 = vld [vmem:[%s9196_s16] ss:$0 sm:$0xff] }
0x1202   :  { %6668 = vmatprep.subr.bf16.mxu1 %v6667_v30 }
0x1205   :  { %6670 = vmatpush1.bf16.msra.mxu1 %v6669_v56 }
0x1206   :  { %6672 = vmatprep.subr.bf16.mxu1 %v6671_v43 }
0x1209   :  { %6674 = vmatpush1.bf16.msra.mxu1 %v6673_v52 }
0x120a   :  { %6676 = vmatprep.subr.bf16.mxu1 %v6675_v50 }
0x120d   :  { %6678 = vmatpush1.bf16.msra.mxu1 %v6677_v15 }
0x120e   :  { %6680 = vmatprep.subr.bf16.mxu1 %v6679_v60 }
0x1211   :  { %6682 = vmatpush1.bf16.msra.mxu1 %v6681_v3 }
0x1214   :  { %4139 = vmatmul.mubr.f32.vlgmr.msra.gmra.mrb[48].mxu1 %v4041_v35 }
0x12e7   :  { %v4140_v7 = vpop.f32.mrb[48].mxu1 }
0x12e8   :  { %v4159_v27 = vadd.f32 %v4152_v29, %v4140_v7  ;;  %v4142_v16 = vpop.f32.mrb[49].mxu1 }
0x12e9   :  { %v4160_v19 = vadd.f32 %v4156_v47, %v4142_v16 }
0x12ea   :  { %v4161_v32 = vmax.f32 %v4159_v27, 0.0 }
0x12eb   :  { %v4162_v48 = vmax.f32 %v4160_v19, 0.0 }
0x12ed   :  { %4417 = vmatprep.mubr.msk.f32.mxu0 %vm4194_vm3, %v4162_v48 }
0x12ee   :  { %4263 = vmatmul.mubr.f32.vlgmr.msra.gmra.mrb[48].mxu0 %v4161_v32 }
0x12ef   :  { %6721 = vmatpush3.bf16.msra.mxu0 %v6720_v41  ;;  %5528 = vmatprep.mubr.msk.f32.mxu0 %vm7055_vm0, %v7053_v0  ;;  %v4276_v0 = vld [vmem:[%s9197_s17 + $0x38] sm:$0xff] }
0x12f0   :  { %6722 = vmatprep.subr.bf16.mxu0 %v7054_v40  ;;  %v6729_v57 = vpack.c.bf16 %v4276_v0, %v4275_v5 }
0x12f3   :  { %6724 = vmatpush3.bf16.msra.mxu0 %v6723_v11 }
0x12f4   :  { %6725 = vmatprep.subr.bf16.mxu0 %v7054_v40 }
0x12f7   :  { %6727 = vmatpush3.bf16.msra.mxu0 %v6726_v44 }
0x12f8   :  { %6728 = vmatprep.subr.bf16.mxu0 %v7054_v40 }
0x12fb   :  { %6730 = vmatpush3.bf16.msra.mxu0 %v6729_v57 }
0x12fc   :  { %6731 = vmatprep.subr.bf16.mxu0 %v7054_v40 }
0x12ff   :  { %6733 = vmatpush3.bf16.msra.mxu0 %v6732_v28 }
0x1300   :  { %6734 = vmatprep.subr.bf16.mxu0 %v7054_v40 }
0x1303   :  { %6736 = vmatpush3.bf16.msra.mxu0 %v6735_v34 }
0x1304   :  { %6737 = vmatprep.subr.bf16.mxu0 %v7054_v40 }
0x1307   :  { %6739 = vmatpush3.bf16.msra.mxu0 %v6738_v61 }
0x1308   :  { %6740 = vmatprep.subr.bf16.mxu0 %v7054_v40  ;;  %v4418_v40 = vld [vmem:[%s9198_s18] ss:$0 sm:$0xff] }
0x130b   :  { %6742 = vmatpush3.bf16.msra.mxu0 %v6741_v58 }
0x13c1   :  { %v4264_v30 = vpop.f32.mrb[48].mxu0 }
0x13c2   :  { %v4265_v14 = vadd.f32 %v4416_v21, %v4264_v30  ;;  %v4266_v51 = vpop.f32.mrb[49].mxu0 }
0x13c4   :  { %v4268_v10 = vmax.f32 %v4265_v14, 0.0 }
0x13c6   :  { %5529 = vmatmul.mubr.f32.vlgmr.msra.gmra.mrb[50].mxu0 %v4268_v10 }
0x1499   :  { %v4358_v55 = vpop.f32.mrb[50].mxu0 }
0x149a   :  { %v4359_v56 = vadd.f32 %v4418_v40, %v4358_v55  ;;  %v5530_v43 = vpop.f32.mrb[51].mxu0 }
0x149c   :  { %v4419_v12 = vmul.f32 -1.442695, %v4359_v56 }
0x149e   :  { %6996 = vpow2.f32 %v4419_v12 }
0x14a8   :  { %v6997_v23 = vpop.eup %6996 }
0x14a9   :  { %v4365_v37 = vadd.f32 1.0, %v6997_v23 }
0x14ab   :  { %6998 = vrcp.f32 %v4365_v37 }
0x14b5   :  { %v6999_v31 = vpop.eup %6998 }
0x14b6   :  { %4368 = vst.msk [vmem:[%s9199_s19] sm:$0xff] %vm1931_vm1, %v6999_v31 }
0x14b7   :  { %4373 = vsyncpa [#allocation6], 1 }
0x14b8   :  { %4374 = vsyncpa [#allocation8], 1 }

</bundles_post_ra>
